<compile_context>
chip_gen: v6e
topology: v6e:2x2x1
jax: 0.10.0
libtpu: 0.0.40
codegen_flags: <defaults>
</compile_context>

<pallas_src>
import numpy as np
import jax
import jax.numpy as jnp
from jax.experimental import pallas as pl
from jax.experimental.pallas import tpu as pltpu

# ---------------- model constants (hidden_channels chosen = 8) ----------------
IN_CHANNELS = 7
NUM_AGENTS = 5
HIDDEN = 8            # hidden_channels
HEADS = 8
OUT = HIDDEN          # per-head output width
D = HEADS * HIDDEN    # 64 = concat width
FC1 = 4 * HIDDEN      # 32
B = 2                 # number of graphs (environments)
N = B * NUM_AGENTS    # 10 total nodes

NEG = -1e30           # mask value for non-edges


# ------------------------------- Pallas kernel --------------------------------
def _gat_critic_kernel(we_ref,                                   # SMEM [3, HEADS]
                       x_ref, adj0_ref, e0_ref, adj1_ref, e1_ref, pool_ref, hmask_ref,
                       w1_ref, ab1_ref, b1_ref,
                       w2_ref, ab2_ref, b2_ref,
                       w3_ref, ab3_ref, b3_ref,
                       wf1_ref, bf1_ref, wf2_ref, bf2_ref,
                       out_ref):
    f32 = jnp.float32
    hmask = hmask_ref[...]                                        # [HEADS, D] lane masks

    def gat_layer(h_in, adj, e, W, AB, bias, layer):
        # Shared linear projection (no bias) + fused src/dst attention coefficients.
        H = jnp.dot(h_in, W, preferred_element_type=f32)          # [N, D]
        a_both = jnp.dot(H, AB, preferred_element_type=f32)       # [N, 2*HEADS]
        a_src = a_both[:, :HEADS]                                 # [N, HEADS]
        a_dst = a_both[:, HEADS:2 * HEADS]                        # [N, HEADS]
        a_srcT = a_src.T                                          # [HEADS, N] (one XLU op)

        # Per-head softmax over incoming edges: VPU/XLU/EUP only, no MXU in this loop.
        alphas = []
        for h in range(HEADS):                                    # static unroll
            logit = (a_dst[:, h:h + 1] + a_srcT[h:h + 1, :]
                     + e * we_ref[layer, h])                      # [N, N]
            leaky = jnp.where(logit > 0, logit, 0.2 * logit)
            masked = jnp.where(adj > 0, leaky, NEG)
            m = jnp.max(masked, axis=1, keepdims=True)
            p = jnp.where(adj > 0, jnp.exp(masked - m), 0.0)
            denom = jnp.maximum(jnp.sum(p, axis=1, keepdims=True), 1e-20)  # deg==0 guard
            alphas.append(p / denom)

        # Fused aggregation: one matmul for all 8 heads, then per-head lane masking.
        a_stack = jnp.concatenate(alphas, axis=0)                 # [HEADS*N, N]
        out_stack = jnp.dot(a_stack, H, preferred_element_type=f32)   # [HEADS*N, D]
        out = bias                                                # [1, D] -> broadcast
        for h in range(HEADS):
            out = out + out_stack[h * N:(h + 1) * N, :] * hmask[h:h + 1, :]
        return out                                                # [N, D]

    x = x_ref[...]
    h1 = jnp.maximum(gat_layer(x, adj0_ref[...], e0_ref[...],
                               w1_ref[...], ab1_ref[...], b1_ref[...], 0), 0.0)
    h2 = jnp.maximum(gat_layer(h1, adj1_ref[...], e1_ref[...],
                               w2_ref[...], ab2_ref[...], b2_ref[...], 1), 0.0)
    h3 = jnp.maximum(gat_layer(h2, adj1_ref[...], e1_ref[...],
                               w3_ref[...], ab3_ref[...], b3_ref[...], 2), 0.0)
    emb = jnp.dot(pool_ref[...], h3, preferred_element_type=f32)      # [B, D] mean pool
    hid = jnp.maximum(jnp.dot(emb, wf1_ref[...], preferred_element_type=f32)
                      + bf1_ref[...], 0.0)                            # [B, FC1]
    out_ref[...] = jnp.dot(hid, wf2_ref[...], preferred_element_type=f32) + bf2_ref[...]


def gat_critic_pallas(x, adj0, e0, adj1, e1, pool_mat, p):
    operands = [p["we_all"], x, adj0, e0, adj1, e1, pool_mat, p["hmask"],
                p["W1"], p["AB1"], p["b1"],
                p["W2"], p["AB2"], p["b2"],
                p["W3"], p["AB3"], p["b3"],
                p["Wf1"], p["bf1"], p["Wf2"], p["bf2"]]

    smem = pl.BlockSpec(memory_space=pltpu.MemorySpace.SMEM)      # we_all scalars
    vmem = pl.BlockSpec(memory_space=pltpu.MemorySpace.VMEM)      # whole-array resident

    return pl.pallas_call(
        _gat_critic_kernel,
        out_shape=jax.ShapeDtypeStruct((B, 1), jnp.float32),
        in_specs=[smem] + [vmem] * (len(operands) - 1),
        out_specs=vmem,
    )(*operands)


# ----------------------- deterministic parameter setup ------------------------
def init_params(key):
    keys = jax.random.split(key, 32)
    ki = iter(keys)

    def gat_params(fin):
        return dict(
            W=jax.random.normal(next(ki), (fin, D), jnp.float32) / np.sqrt(fin),
            att_src=jax.random.normal(next(ki), (HEADS, OUT), jnp.float32) / np.sqrt(OUT),
            att_dst=jax.random.normal(next(ki), (HEADS, OUT), jnp.float32) / np.sqrt(OUT),
            w_edge=jax.random.normal(next(ki), (D,), jnp.float32),
            att_edge=jax.random.normal(next(ki), (HEADS, OUT), jnp.float32) / np.sqrt(OUT),
            bias=0.1 * jax.random.normal(next(ki), (D,), jnp.float32),
        )

    raw = dict(g1=gat_params(IN_CHANNELS), g2=gat_params(D), g3=gat_params(D))
    raw["Wf1"] = jax.random.normal(next(ki), (D, FC1), jnp.float32) / np.sqrt(D)
    raw["bf1"] = 0.1 * jax.random.normal(next(ki), (FC1,), jnp.float32)
    raw["Wf2"] = jax.random.normal(next(ki), (FC1, 1), jnp.float32) / np.sqrt(FC1)
    raw["bf2"] = 0.1 * jax.random.normal(next(ki), (1,), jnp.float32)
    return raw


def pack_params(raw):
    def pack_att(att):  # [HEADS, OUT] -> block-diagonal [D, HEADS]
        M = np.zeros((D, HEADS), np.float32)
        a = np.asarray(att)
        for h in range(HEADS):
            M[h * OUT:(h + 1) * OUT, h] = a[h]
        return M

    packed = {}
    for i, name in enumerate(["g1", "g2", "g3"], start=1):
        g = raw[name]
        packed[f"W{i}"] = g["W"]
        packed[f"AB{i}"] = jnp.asarray(
            np.concatenate([pack_att(g["att_src"]), pack_att(g["att_dst"])], axis=1))
        packed[f"b{i}"] = g["bias"].reshape(1, D)
    packed["we_all"] = jnp.stack(
        [jnp.sum(raw[n]["w_edge"].reshape(HEADS, OUT) * raw[n]["att_edge"], axis=-1)
         for n in ["g1", "g2", "g3"]], axis=0).astype(jnp.float32)      # [3, HEADS]
    hm = np.zeros((HEADS, D), np.float32)
    for h in range(HEADS):
        hm[h, h * OUT:(h + 1) * OUT] = 1.0
    packed["hmask"] = jnp.asarray(hm)                                   # [HEADS, D]
    packed["Wf1"] = raw["Wf1"]; packed["bf1"] = raw["bf1"].reshape(1, FC1)
    packed["Wf2"] = raw["Wf2"]; packed["bf2"] = raw["bf2"].reshape(1, 1)
    return packed


# --------------------------- pure-JAX reference --------------------------------
def _gat_layer_ref(x, adj, e, g):
    H = x @ g["W"]
    H3 = H.reshape(N, HEADS, OUT)
    a_src = jnp.einsum("nhc,hc->nh", H3, g["att_src"])
    a_dst = jnp.einsum("nhc,hc->nh", H3, g["att_dst"])
    we = jnp.sum(g["w_edge"].reshape(HEADS, OUT) * g["att_edge"], axis=-1)
    logits = a_dst[:, None, :] + a_src[None, :, :] + e[:, :, None] * we[None, None, :]
    leaky = jnp.where(logits > 0, logits, 0.2 * logits)
    mask = adj[:, :, None] > 0
    masked = jnp.where(mask, leaky, NEG)
    m = masked.max(axis=1, keepdims=True)
    p = jnp.where(mask, jnp.exp(masked - m), 0.0)
    alpha = p / p.sum(axis=1, keepdims=True)
    return jnp.einsum("ijh,jhc->ihc", alpha, H3).reshape(N, D) + g["bias"]


def forward_ref(x, adj0, e0, adj1, e1, pool_mat, raw):
    h = jnp.maximum(_gat_layer_ref(x, adj0, e0, raw["g1"]), 0.0)
    h = jnp.maximum(_gat_layer_ref(h, adj1, e1, raw["g2"]), 0.0)
    h = jnp.maximum(_gat_layer_ref(h, adj1, e1, raw["g3"]), 0.0)
    emb = pool_mat @ h
    hid = jnp.maximum(emb @ raw["Wf1"] + raw["bf1"], 0.0)
    return hid @ raw["Wf2"] + raw["bf2"]


# ------------------------------------ main -------------------------------------
if __name__ == "__main__":
    key = jax.random.PRNGKey(0)
    k_x, k_e, k_p = jax.random.split(key, 3)

    # Fully-connected agent graph per environment (no self loops), like the VMAS setup.
    graph_id = np.repeat(np.arange(B), NUM_AGENTS)
    src, dst = [], []
    for b in range(B):
        for i in range(NUM_AGENTS):
            for j in range(NUM_AGENTS):
                if i != j:
                    src.append(b * NUM_AGENTS + i)
                    dst.append(b * NUM_AGENTS + j)
    edge_index = np.stack([np.array(src), np.array(dst)])      # [2, E], row0=src, row1=dst
    E = edge_index.shape[1]
    edge_attr = np.asarray(jax.random.uniform(k_e, (E, 1), jnp.float32))
    x = jax.random.normal(k_x, (N, IN_CHANNELS), jnp.float32)

    # Densify graph (exact for this edge set): rows = destination, cols = source.
    adj0 = np.zeros((N, N), np.float32); e0 = np.zeros((N, N), np.float32)
    adj0[edge_index[1], edge_index[0]] = 1.0
    e0[edge_index[1], edge_index[0]] = edge_attr[:, 0]
    # add_self_loops(fill_value='mean') for conv2/conv3: mean of incoming edge_attr.
    deg = adj0.sum(axis=1)
    loop_attr = np.where(deg > 0, e0.sum(axis=1) / np.maximum(deg, 1.0), 0.0)
    adj1 = adj0.copy(); np.fill_diagonal(adj1, 1.0)
    e1 = e0.copy(); e1[np.arange(N), np.arange(N)] = loop_attr
    # global_mean_pool over data.batch as a [B, N] matrix.
    pool_mat = (graph_id[None, :] == np.arange(B)[:, None]).astype(np.float32) / NUM_AGENTS

    adj0, e0, adj1, e1, pool_mat = map(jnp.asarray, (adj0, e0, adj1, e1, pool_mat))

    raw = init_params(k_p)
    packed = pack_params(raw)

    out = gat_critic_pallas(x, adj0, e0, adj1, e1, pool_mat, packed)
    out = jax.block_until_ready(out)

    # Default (bf16-pass) matmul precision in both kernel and reference -> looser tolerance.
    ref = forward_ref(x, adj0, e0, adj1, e1, pool_mat, raw)
    np.testing.assert_allclose(np.asarray(out), np.asarray(ref), rtol=3e-2, atol=3e-2)
    print("KERNEL_OK")
</pallas_src>

<mosaic_0001>
module attributes {stable_mosaic.version = 11 : i64} {
  func.func @_gat_critic_kernel(%arg0: memref<3x8xf32, #tpu.memory_space<smem>>, %arg1: memref<10x7xf32, #tpu.memory_space<vmem>>, %arg2: memref<10x10xf32, #tpu.memory_space<vmem>>, %arg3: memref<10x10xf32, #tpu.memory_space<vmem>>, %arg4: memref<10x10xf32, #tpu.memory_space<vmem>>, %arg5: memref<10x10xf32, #tpu.memory_space<vmem>>, %arg6: memref<2x10xf32, #tpu.memory_space<vmem>>, %arg7: memref<8x64xf32, #tpu.memory_space<vmem>>, %arg8: memref<7x64xf32, #tpu.memory_space<vmem>>, %arg9: memref<64x16xf32, #tpu.memory_space<vmem>>, %arg10: memref<1x64xf32, #tpu.memory_space<vmem>>, %arg11: memref<64x64xf32, #tpu.memory_space<vmem>>, %arg12: memref<64x16xf32, #tpu.memory_space<vmem>>, %arg13: memref<1x64xf32, #tpu.memory_space<vmem>>, %arg14: memref<64x64xf32, #tpu.memory_space<vmem>>, %arg15: memref<64x16xf32, #tpu.memory_space<vmem>>, %arg16: memref<1x64xf32, #tpu.memory_space<vmem>>, %arg17: memref<64x32xf32, #tpu.memory_space<vmem>>, %arg18: memref<1x32xf32, #tpu.memory_space<vmem>>, %arg19: memref<32x1xf32, #tpu.memory_space<vmem>>, %arg20: memref<1x1xf32, #tpu.memory_space<vmem>>, %arg21: memref<2x1xf32, #tpu.memory_space<vmem>>) attributes {dimension_semantics = [], scalar_prefetch = 0 : i64, scratch_operands = 0 : i64, tpu.core_type = #tpu.core_type<tc>} {
    %c0 = arith.constant 0 : index
    %c0_0 = arith.constant 0 : index
    %0 = vector.load %arg7[%c0, %c0_0] : memref<8x64xf32, #tpu.memory_space<vmem>>, vector<8x64xf32>
    %c0_1 = arith.constant 0 : index
    %c0_2 = arith.constant 0 : index
    %1 = vector.load %arg1[%c0_1, %c0_2] : memref<10x7xf32, #tpu.memory_space<vmem>>, vector<10x7xf32>
    %c0_3 = arith.constant 0 : index
    %c0_4 = arith.constant 0 : index
    %2 = vector.load %arg2[%c0_3, %c0_4] : memref<10x10xf32, #tpu.memory_space<vmem>>, vector<10x10xf32>
    %c0_5 = arith.constant 0 : index
    %c0_6 = arith.constant 0 : index
    %3 = vector.load %arg3[%c0_5, %c0_6] : memref<10x10xf32, #tpu.memory_space<vmem>>, vector<10x10xf32>
    %c0_7 = arith.constant 0 : index
    %c0_8 = arith.constant 0 : index
    %4 = vector.load %arg8[%c0_7, %c0_8] : memref<7x64xf32, #tpu.memory_space<vmem>>, vector<7x64xf32>
    %c0_9 = arith.constant 0 : index
    %c0_10 = arith.constant 0 : index
    %5 = vector.load %arg9[%c0_9, %c0_10] : memref<64x16xf32, #tpu.memory_space<vmem>>, vector<64x16xf32>
    %c0_11 = arith.constant 0 : index
    %c0_12 = arith.constant 0 : index
    %6 = vector.load %arg10[%c0_11, %c0_12] : memref<1x64xf32, #tpu.memory_space<vmem>>, vector<1x64xf32>
    %cst = arith.constant dense<0.000000e+00> : vector<10x64xf32>
    %7 = tpu.matmul %1, %4, %cst {dimension_numbers = #tpu.dot_dimension_numbers<[1], [0], [0], [1], [0, 0, 1, 1], [], []>} : vector<10x7xf32>, vector<7x64xf32>, vector<10x64xf32> -> vector<10x64xf32>
    %cst_13 = arith.constant dense<0.000000e+00> : vector<10x16xf32>
    %8 = tpu.matmul %7, %5, %cst_13 {dimension_numbers = #tpu.dot_dimension_numbers<[1], [0], [0], [1], [0, 0, 1, 1], [], []>} : vector<10x64xf32>, vector<64x16xf32>, vector<10x16xf32> -> vector<10x16xf32>
    %9 = vector.extract_strided_slice %8 {offsets = [0, 0], sizes = [10, 8], strides = [1, 1]} : vector<10x16xf32> to vector<10x8xf32>
    %10 = vector.extract_strided_slice %8 {offsets = [0, 8], sizes = [10, 8], strides = [1, 1]} : vector<10x16xf32> to vector<10x8xf32>
    %11 = tpu.transpose %9, [1, 0] : vector<10x8xf32> -> vector<8x10xf32>
    %12 = vector.extract_strided_slice %10 {offsets = [0, 0], sizes = [10, 1], strides = [1, 1]} : vector<10x8xf32> to vector<10x1xf32>
    %13 = vector.extract_strided_slice %11 {offsets = [0, 0], sizes = [1, 10], strides = [1, 1]} : vector<8x10xf32> to vector<1x10xf32>
    %14 = vector.broadcast %12 : vector<10x1xf32> to vector<10x10xf32>
    %15 = vector.broadcast %13 : vector<1x10xf32> to vector<10x10xf32>
    %16 = arith.addf %14, %15 : vector<10x10xf32>
    %c0_14 = arith.constant 0 : index
    %c0_15 = arith.constant 0 : index
    %17 = memref.load %arg0[%c0_14, %c0_15] : memref<3x8xf32, #tpu.memory_space<smem>>
    %18 = vector.broadcast %17 : f32 to vector<10x10xf32>
    %19 = arith.mulf %3, %18 : vector<10x10xf32>
    %20 = arith.addf %16, %19 : vector<10x10xf32>
    %cst_16 = arith.constant 0.000000e+00 : f32
    %21 = vector.broadcast %cst_16 : f32 to vector<10x10xf32>
    %22 = arith.cmpf ogt, %20, %21 : vector<10x10xf32>
    %cst_17 = arith.constant 2.000000e-01 : f32
    %23 = vector.broadcast %cst_17 : f32 to vector<10x10xf32>
    %24 = arith.mulf %23, %20 : vector<10x10xf32>
    %25 = arith.select %22, %20, %24 : vector<10x10xi1>, vector<10x10xf32>
    %cst_18 = arith.constant 0.000000e+00 : f32
    %26 = vector.broadcast %cst_18 : f32 to vector<10x10xf32>
    %27 = arith.cmpf ogt, %2, %26 : vector<10x10xf32>
    %cst_19 = arith.constant -1.000000e+30 : f32
    %28 = vector.broadcast %cst_19 : f32 to vector<10x10xf32>
    %29 = arith.select %27, %25, %28 : vector<10x10xi1>, vector<10x10xf32>
    %cst_20 = arith.constant dense<0xFF800000> : vector<10xf32>
    %30 = vector.multi_reduction <maximumf>, %29, %cst_20 [1] : vector<10x10xf32> to vector<10xf32>
    %31 = vector.shape_cast %30 : vector<10xf32> to vector<10x1xf32>
    %cst_21 = arith.constant 0.000000e+00 : f32
    %32 = vector.broadcast %cst_21 : f32 to vector<10x10xf32>
    %33 = arith.cmpf ogt, %2, %32 : vector<10x10xf32>
    %34 = vector.broadcast %31 : vector<10x1xf32> to vector<10x10xf32>
    %35 = arith.subf %29, %34 : vector<10x10xf32>
    %36 = math.exp %35 : vector<10x10xf32>
    %cst_22 = arith.constant 0.000000e+00 : f32
    %37 = vector.broadcast %cst_22 : f32 to vector<10x10xf32>
    %38 = arith.select %33, %36, %37 : vector<10x10xi1>, vector<10x10xf32>
    %cst_23 = arith.constant dense<0.000000e+00> : vector<10xf32>
    %39 = vector.multi_reduction <add>, %38, %cst_23 [1] : vector<10x10xf32> to vector<10xf32>
    %40 = vector.shape_cast %39 : vector<10xf32> to vector<10x1xf32>
    %cst_24 = arith.constant 9.99999968E-21 : f32
    %41 = vector.broadcast %cst_24 : f32 to vector<10x1xf32>
    %42 = arith.maximumf %40, %41 : vector<10x1xf32>
    %43 = vector.broadcast %42 : vector<10x1xf32> to vector<10x10xf32>
    %44 = arith.divf %38, %43 : vector<10x10xf32>
    %45 = vector.extract_strided_slice %10 {offsets = [0, 1], sizes = [10, 1], strides = [1, 1]} : vector<10x8xf32> to vector<10x1xf32>
    %46 = vector.extract_strided_slice %11 {offsets = [1, 0], sizes = [1, 10], strides = [1, 1]} : vector<8x10xf32> to vector<1x10xf32>
    %47 = vector.broadcast %45 : vector<10x1xf32> to vector<10x10xf32>
    %48 = vector.broadcast %46 : vector<1x10xf32> to vector<10x10xf32>
    %49 = arith.addf %47, %48 : vector<10x10xf32>
    %c0_25 = arith.constant 0 : index
    %c1 = arith.constant 1 : index
    %50 = memref.load %arg0[%c0_25, %c1] : memref<3x8xf32, #tpu.memory_space<smem>>
    %51 = vector.broadcast %50 : f32 to vector<10x10xf32>
    %52 = arith.mulf %3, %51 : vector<10x10xf32>
    %53 = arith.addf %49, %52 : vector<10x10xf32>
    %cst_26 = arith.constant 0.000000e+00 : f32
    %54 = vector.broadcast %cst_26 : f32 to vector<10x10xf32>
    %55 = arith.cmpf ogt, %53, %54 : vector<10x10xf32>
    %cst_27 = arith.constant 2.000000e-01 : f32
    %56 = vector.broadcast %cst_27 : f32 to vector<10x10xf32>
    %57 = arith.mulf %56, %53 : vector<10x10xf32>
    %58 = arith.select %55, %53, %57 : vector<10x10xi1>, vector<10x10xf32>
    %cst_28 = arith.constant 0.000000e+00 : f32
    %59 = vector.broadcast %cst_28 : f32 to vector<10x10xf32>
    %60 = arith.cmpf ogt, %2, %59 : vector<10x10xf32>
    %cst_29 = arith.constant -1.000000e+30 : f32
    %61 = vector.broadcast %cst_29 : f32 to vector<10x10xf32>
    %62 = arith.select %60, %58, %61 : vector<10x10xi1>, vector<10x10xf32>
    %cst_30 = arith.constant dense<0xFF800000> : vector<10xf32>
    %63 = vector.multi_reduction <maximumf>, %62, %cst_30 [1] : vector<10x10xf32> to vector<10xf32>
    %64 = vector.shape_cast %63 : vector<10xf32> to vector<10x1xf32>
    %cst_31 = arith.constant 0.000000e+00 : f32
    %65 = vector.broadcast %cst_31 : f32 to vector<10x10xf32>
    %66 = arith.cmpf ogt, %2, %65 : vector<10x10xf32>
    %67 = vector.broadcast %64 : vector<10x1xf32> to vector<10x10xf32>
    %68 = arith.subf %62, %67 : vector<10x10xf32>
    %69 = math.exp %68 : vector<10x10xf32>
    %cst_32 = arith.constant 0.000000e+00 : f32
    %70 = vector.broadcast %cst_32 : f32 to vector<10x10xf32>
    %71 = arith.select %66, %69, %70 : vector<10x10xi1>, vector<10x10xf32>
    %cst_33 = arith.constant dense<0.000000e+00> : vector<10xf32>
    %72 = vector.multi_reduction <add>, %71, %cst_33 [1] : vector<10x10xf32> to vector<10xf32>
    %73 = vector.shape_cast %72 : vector<10xf32> to vector<10x1xf32>
    %cst_34 = arith.constant 9.99999968E-21 : f32
    %74 = vector.broadcast %cst_34 : f32 to vector<10x1xf32>
    %75 = arith.maximumf %73, %74 : vector<10x1xf32>
    %76 = vector.broadcast %75 : vector<10x1xf32> to vector<10x10xf32>
    %77 = arith.divf %71, %76 : vector<10x10xf32>
    %78 = vector.extract_strided_slice %10 {offsets = [0, 2], sizes = [10, 1], strides = [1, 1]} : vector<10x8xf32> to vector<10x1xf32>
    %79 = vector.extract_strided_slice %11 {offsets = [2, 0], sizes = [1, 10], strides = [1, 1]} : vector<8x10xf32> to vector<1x10xf32>
    %80 = vector.broadcast %78 : vector<10x1xf32> to vector<10x10xf32>
    %81 = vector.broadcast %79 : vector<1x10xf32> to vector<10x10xf32>
    %82 = arith.addf %80, %81 : vector<10x10xf32>
    %c0_35 = arith.constant 0 : index
    %c2 = arith.constant 2 : index
    %83 = memref.load %arg0[%c0_35, %c2] : memref<3x8xf32, #tpu.memory_space<smem>>
    %84 = vector.broadcast %83 : f32 to vector<10x10xf32>
    %85 = arith.mulf %3, %84 : vector<10x10xf32>
    %86 = arith.addf %82, %85 : vector<10x10xf32>
    %cst_36 = arith.constant 0.000000e+00 : f32
    %87 = vector.broadcast %cst_36 : f32 to vector<10x10xf32>
    %88 = arith.cmpf ogt, %86, %87 : vector<10x10xf32>
    %cst_37 = arith.constant 2.000000e-01 : f32
    %89 = vector.broadcast %cst_37 : f32 to vector<10x10xf32>
    %90 = arith.mulf %89, %86 : vector<10x10xf32>
    %91 = arith.select %88, %86, %90 : vector<10x10xi1>, vector<10x10xf32>
    %cst_38 = arith.constant 0.000000e+00 : f32
    %92 = vector.broadcast %cst_38 : f32 to vector<10x10xf32>
    %93 = arith.cmpf ogt, %2, %92 : vector<10x10xf32>
    %cst_39 = arith.constant -1.000000e+30 : f32
    %94 = vector.broadcast %cst_39 : f32 to vector<10x10xf32>
    %95 = arith.select %93, %91, %94 : vector<10x10xi1>, vector<10x10xf32>
    %cst_40 = arith.constant dense<0xFF800000> : vector<10xf32>
    %96 = vector.multi_reduction <maximumf>, %95, %cst_40 [1] : vector<10x10xf32> to vector<10xf32>
    %97 = vector.shape_cast %96 : vector<10xf32> to vector<10x1xf32>
    %cst_41 = arith.constant 0.000000e+00 : f32
    %98 = vector.broadcast %cst_41 : f32 to vector<10x10xf32>
    %99 = arith.cmpf ogt, %2, %98 : vector<10x10xf32>
    %100 = vector.broadcast %97 : vector<10x1xf32> to vector<10x10xf32>
    %101 = arith.subf %95, %100 : vector<10x10xf32>
    %102 = math.exp %101 : vector<10x10xf32>
    %cst_42 = arith.constant 0.000000e+00 : f32
    %103 = vector.broadcast %cst_42 : f32 to vector<10x10xf32>
    %104 = arith.select %99, %102, %103 : vector<10x10xi1>, vector<10x10xf32>
    %cst_43 = arith.constant dense<0.000000e+00> : vector<10xf32>
    %105 = vector.multi_reduction <add>, %104, %cst_43 [1] : vector<10x10xf32> to vector<10xf32>
    %106 = vector.shape_cast %105 : vector<10xf32> to vector<10x1xf32>
    %cst_44 = arith.constant 9.99999968E-21 : f32
    %107 = vector.broadcast %cst_44 : f32 to vector<10x1xf32>
    %108 = arith.maximumf %106, %107 : vector<10x1xf32>
    %109 = vector.broadcast %108 : vector<10x1xf32> to vector<10x10xf32>
    %110 = arith.divf %104, %109 : vector<10x10xf32>
    %111 = vector.extract_strided_slice %10 {offsets = [0, 3], sizes = [10, 1], strides = [1, 1]} : vector<10x8xf32> to vector<10x1xf32>
    %112 = vector.extract_strided_slice %11 {offsets = [3, 0], sizes = [1, 10], strides = [1, 1]} : vector<8x10xf32> to vector<1x10xf32>
    %113 = vector.broadcast %111 : vector<10x1xf32> to vector<10x10xf32>
    %114 = vector.broadcast %112 : vector<1x10xf32> to vector<10x10xf32>
    %115 = arith.addf %113, %114 : vector<10x10xf32>
    %c0_45 = arith.constant 0 : index
    %c3 = arith.constant 3 : index
    %116 = memref.load %arg0[%c0_45, %c3] : memref<3x8xf32, #tpu.memory_space<smem>>
    %117 = vector.broadcast %116 : f32 to vector<10x10xf32>
    %118 = arith.mulf %3, %117 : vector<10x10xf32>
    %119 = arith.addf %115, %118 : vector<10x10xf32>
    %cst_46 = arith.constant 0.000000e+00 : f32
    %120 = vector.broadcast %cst_46 : f32 to vector<10x10xf32>
    %121 = arith.cmpf ogt, %119, %120 : vector<10x10xf32>
    %cst_47 = arith.constant 2.000000e-01 : f32
    %122 = vector.broadcast %cst_47 : f32 to vector<10x10xf32>
    %123 = arith.mulf %122, %119 : vector<10x10xf32>
    %124 = arith.select %121, %119, %123 : vector<10x10xi1>, vector<10x10xf32>
    %cst_48 = arith.constant 0.000000e+00 : f32
    %125 = vector.broadcast %cst_48 : f32 to vector<10x10xf32>
    %126 = arith.cmpf ogt, %2, %125 : vector<10x10xf32>
    %cst_49 = arith.constant -1.000000e+30 : f32
    %127 = vector.broadcast %cst_49 : f32 to vector<10x10xf32>
    %128 = arith.select %126, %124, %127 : vector<10x10xi1>, vector<10x10xf32>
    %cst_50 = arith.constant dense<0xFF800000> : vector<10xf32>
    %129 = vector.multi_reduction <maximumf>, %128, %cst_50 [1] : vector<10x10xf32> to vector<10xf32>
    %130 = vector.shape_cast %129 : vector<10xf32> to vector<10x1xf32>
    %cst_51 = arith.constant 0.000000e+00 : f32
    %131 = vector.broadcast %cst_51 : f32 to vector<10x10xf32>
    %132 = arith.cmpf ogt, %2, %131 : vector<10x10xf32>
    %133 = vector.broadcast %130 : vector<10x1xf32> to vector<10x10xf32>
    %134 = arith.subf %128, %133 : vector<10x10xf32>
    %135 = math.exp %134 : vector<10x10xf32>
    %cst_52 = arith.constant 0.000000e+00 : f32
    %136 = vector.broadcast %cst_52 : f32 to vector<10x10xf32>
    %137 = arith.select %132, %135, %136 : vector<10x10xi1>, vector<10x10xf32>
    %cst_53 = arith.constant dense<0.000000e+00> : vector<10xf32>
    %138 = vector.multi_reduction <add>, %137, %cst_53 [1] : vector<10x10xf32> to vector<10xf32>
    %139 = vector.shape_cast %138 : vector<10xf32> to vector<10x1xf32>
    %cst_54 = arith.constant 9.99999968E-21 : f32
    %140 = vector.broadcast %cst_54 : f32 to vector<10x1xf32>
    %141 = arith.maximumf %139, %140 : vector<10x1xf32>
    %142 = vector.broadcast %141 : vector<10x1xf32> to vector<10x10xf32>
    %143 = arith.divf %137, %142 : vector<10x10xf32>
    %144 = vector.extract_strided_slice %10 {offsets = [0, 4], sizes = [10, 1], strides = [1, 1]} : vector<10x8xf32> to vector<10x1xf32>
    %145 = vector.extract_strided_slice %11 {offsets = [4, 0], sizes = [1, 10], strides = [1, 1]} : vector<8x10xf32> to vector<1x10xf32>
    %146 = vector.broadcast %144 : vector<10x1xf32> to vector<10x10xf32>
    %147 = vector.broadcast %145 : vector<1x10xf32> to vector<10x10xf32>
    %148 = arith.addf %146, %147 : vector<10x10xf32>
    %c0_55 = arith.constant 0 : index
    %c4 = arith.constant 4 : index
    %149 = memref.load %arg0[%c0_55, %c4] : memref<3x8xf32, #tpu.memory_space<smem>>
    %150 = vector.broadcast %149 : f32 to vector<10x10xf32>
    %151 = arith.mulf %3, %150 : vector<10x10xf32>
    %152 = arith.addf %148, %151 : vector<10x10xf32>
    %cst_56 = arith.constant 0.000000e+00 : f32
    %153 = vector.broadcast %cst_56 : f32 to vector<10x10xf32>
    %154 = arith.cmpf ogt, %152, %153 : vector<10x10xf32>
    %cst_57 = arith.constant 2.000000e-01 : f32
    %155 = vector.broadcast %cst_57 : f32 to vector<10x10xf32>
    %156 = arith.mulf %155, %152 : vector<10x10xf32>
    %157 = arith.select %154, %152, %156 : vector<10x10xi1>, vector<10x10xf32>
    %cst_58 = arith.constant 0.000000e+00 : f32
    %158 = vector.broadcast %cst_58 : f32 to vector<10x10xf32>
    %159 = arith.cmpf ogt, %2, %158 : vector<10x10xf32>
    %cst_59 = arith.constant -1.000000e+30 : f32
    %160 = vector.broadcast %cst_59 : f32 to vector<10x10xf32>
    %161 = arith.select %159, %157, %160 : vector<10x10xi1>, vector<10x10xf32>
    %cst_60 = arith.constant dense<0xFF800000> : vector<10xf32>
    %162 = vector.multi_reduction <maximumf>, %161, %cst_60 [1] : vector<10x10xf32> to vector<10xf32>
    %163 = vector.shape_cast %162 : vector<10xf32> to vector<10x1xf32>
    %cst_61 = arith.constant 0.000000e+00 : f32
    %164 = vector.broadcast %cst_61 : f32 to vector<10x10xf32>
    %165 = arith.cmpf ogt, %2, %164 : vector<10x10xf32>
    %166 = vector.broadcast %163 : vector<10x1xf32> to vector<10x10xf32>
    %167 = arith.subf %161, %166 : vector<10x10xf32>
    %168 = math.exp %167 : vector<10x10xf32>
    %cst_62 = arith.constant 0.000000e+00 : f32
    %169 = vector.broadcast %cst_62 : f32 to vector<10x10xf32>
    %170 = arith.select %165, %168, %169 : vector<10x10xi1>, vector<10x10xf32>
    %cst_63 = arith.constant dense<0.000000e+00> : vector<10xf32>
    %171 = vector.multi_reduction <add>, %170, %cst_63 [1] : vector<10x10xf32> to vector<10xf32>
    %172 = vector.shape_cast %171 : vector<10xf32> to vector<10x1xf32>
    %cst_64 = arith.constant 9.99999968E-21 : f32
    %173 = vector.broadcast %cst_64 : f32 to vector<10x1xf32>
    %174 = arith.maximumf %172, %173 : vector<10x1xf32>
    %175 = vector.broadcast %174 : vector<10x1xf32> to vector<10x10xf32>
    %176 = arith.divf %170, %175 : vector<10x10xf32>
    %177 = vector.extract_strided_slice %10 {offsets = [0, 5], sizes = [10, 1], strides = [1, 1]} : vector<10x8xf32> to vector<10x1xf32>
    %178 = vector.extract_strided_slice %11 {offsets = [5, 0], sizes = [1, 10], strides = [1, 1]} : vector<8x10xf32> to vector<1x10xf32>
    %179 = vector.broadcast %177 : vector<10x1xf32> to vector<10x10xf32>
    %180 = vector.broadcast %178 : vector<1x10xf32> to vector<10x10xf32>
    %181 = arith.addf %179, %180 : vector<10x10xf32>
    %c0_65 = arith.constant 0 : index
    %c5 = arith.constant 5 : index
    %182 = memref.load %arg0[%c0_65, %c5] : memref<3x8xf32, #tpu.memory_space<smem>>
    %183 = vector.broadcast %182 : f32 to vector<10x10xf32>
    %184 = arith.mulf %3, %183 : vector<10x10xf32>
    %185 = arith.addf %181, %184 : vector<10x10xf32>
    %cst_66 = arith.constant 0.000000e+00 : f32
    %186 = vector.broadcast %cst_66 : f32 to vector<10x10xf32>
    %187 = arith.cmpf ogt, %185, %186 : vector<10x10xf32>
    %cst_67 = arith.constant 2.000000e-01 : f32
    %188 = vector.broadcast %cst_67 : f32 to vector<10x10xf32>
    %189 = arith.mulf %188, %185 : vector<10x10xf32>
    %190 = arith.select %187, %185, %189 : vector<10x10xi1>, vector<10x10xf32>
    %cst_68 = arith.constant 0.000000e+00 : f32
    %191 = vector.broadcast %cst_68 : f32 to vector<10x10xf32>
    %192 = arith.cmpf ogt, %2, %191 : vector<10x10xf32>
    %cst_69 = arith.constant -1.000000e+30 : f32
    %193 = vector.broadcast %cst_69 : f32 to vector<10x10xf32>
    %194 = arith.select %192, %190, %193 : vector<10x10xi1>, vector<10x10xf32>
    %cst_70 = arith.constant dense<0xFF800000> : vector<10xf32>
    %195 = vector.multi_reduction <maximumf>, %194, %cst_70 [1] : vector<10x10xf32> to vector<10xf32>
    %196 = vector.shape_cast %195 : vector<10xf32> to vector<10x1xf32>
    %cst_71 = arith.constant 0.000000e+00 : f32
    %197 = vector.broadcast %cst_71 : f32 to vector<10x10xf32>
    %198 = arith.cmpf ogt, %2, %197 : vector<10x10xf32>
    %199 = vector.broadcast %196 : vector<10x1xf32> to vector<10x10xf32>
    %200 = arith.subf %194, %199 : vector<10x10xf32>
    %201 = math.exp %200 : vector<10x10xf32>
    %cst_72 = arith.constant 0.000000e+00 : f32
    %202 = vector.broadcast %cst_72 : f32 to vector<10x10xf32>
    %203 = arith.select %198, %201, %202 : vector<10x10xi1>, vector<10x10xf32>
    %cst_73 = arith.constant dense<0.000000e+00> : vector<10xf32>
    %204 = vector.multi_reduction <add>, %203, %cst_73 [1] : vector<10x10xf32> to vector<10xf32>
    %205 = vector.shape_cast %204 : vector<10xf32> to vector<10x1xf32>
    %cst_74 = arith.constant 9.99999968E-21 : f32
    %206 = vector.broadcast %cst_74 : f32 to vector<10x1xf32>
    %207 = arith.maximumf %205, %206 : vector<10x1xf32>
    %208 = vector.broadcast %207 : vector<10x1xf32> to vector<10x10xf32>
    %209 = arith.divf %203, %208 : vector<10x10xf32>
    %210 = vector.extract_strided_slice %10 {offsets = [0, 6], sizes = [10, 1], strides = [1, 1]} : vector<10x8xf32> to vector<10x1xf32>
    %211 = vector.extract_strided_slice %11 {offsets = [6, 0], sizes = [1, 10], strides = [1, 1]} : vector<8x10xf32> to vector<1x10xf32>
    %212 = vector.broadcast %210 : vector<10x1xf32> to vector<10x10xf32>
    %213 = vector.broadcast %211 : vector<1x10xf32> to vector<10x10xf32>
    %214 = arith.addf %212, %213 : vector<10x10xf32>
    %c0_75 = arith.constant 0 : index
    %c6 = arith.constant 6 : index
    %215 = memref.load %arg0[%c0_75, %c6] : memref<3x8xf32, #tpu.memory_space<smem>>
    %216 = vector.broadcast %215 : f32 to vector<10x10xf32>
    %217 = arith.mulf %3, %216 : vector<10x10xf32>
    %218 = arith.addf %214, %217 : vector<10x10xf32>
    %cst_76 = arith.constant 0.000000e+00 : f32
    %219 = vector.broadcast %cst_76 : f32 to vector<10x10xf32>
    %220 = arith.cmpf ogt, %218, %219 : vector<10x10xf32>
    %cst_77 = arith.constant 2.000000e-01 : f32
    %221 = vector.broadcast %cst_77 : f32 to vector<10x10xf32>
    %222 = arith.mulf %221, %218 : vector<10x10xf32>
    %223 = arith.select %220, %218, %222 : vector<10x10xi1>, vector<10x10xf32>
    %cst_78 = arith.constant 0.000000e+00 : f32
    %224 = vector.broadcast %cst_78 : f32 to vector<10x10xf32>
    %225 = arith.cmpf ogt, %2, %224 : vector<10x10xf32>
    %cst_79 = arith.constant -1.000000e+30 : f32
    %226 = vector.broadcast %cst_79 : f32 to vector<10x10xf32>
    %227 = arith.select %225, %223, %226 : vector<10x10xi1>, vector<10x10xf32>
    %cst_80 = arith.constant dense<0xFF800000> : vector<10xf32>
    %228 = vector.multi_reduction <maximumf>, %227, %cst_80 [1] : vector<10x10xf32> to vector<10xf32>
    %229 = vector.shape_cast %228 : vector<10xf32> to vector<10x1xf32>
    %cst_81 = arith.constant 0.000000e+00 : f32
    %230 = vector.broadcast %cst_81 : f32 to vector<10x10xf32>
    %231 = arith.cmpf ogt, %2, %230 : vector<10x10xf32>
    %232 = vector.broadcast %229 : vector<10x1xf32> to vector<10x10xf32>
    %233 = arith.subf %227, %232 : vector<10x10xf32>
    %234 = math.exp %233 : vector<10x10xf32>
    %cst_82 = arith.constant 0.000000e+00 : f32
    %235 = vector.broadcast %cst_82 : f32 to vector<10x10xf32>
    %236 = arith.select %231, %234, %235 : vector<10x10xi1>, vector<10x10xf32>
    %cst_83 = arith.constant dense<0.000000e+00> : vector<10xf32>
    %237 = vector.multi_reduction <add>, %236, %cst_83 [1] : vector<10x10xf32> to vector<10xf32>
    %238 = vector.shape_cast %237 : vector<10xf32> to vector<10x1xf32>
    %cst_84 = arith.constant 9.99999968E-21 : f32
    %239 = vector.broadcast %cst_84 : f32 to vector<10x1xf32>
    %240 = arith.maximumf %238, %239 : vector<10x1xf32>
    %241 = vector.broadcast %240 : vector<10x1xf32> to vector<10x10xf32>
    %242 = arith.divf %236, %241 : vector<10x10xf32>
    %243 = vector.extract_strided_slice %10 {offsets = [0, 7], sizes = [10, 1], strides = [1, 1]} : vector<10x8xf32> to vector<10x1xf32>
    %244 = vector.extract_strided_slice %11 {offsets = [7, 0], sizes = [1, 10], strides = [1, 1]} : vector<8x10xf32> to vector<1x10xf32>
    %245 = vector.broadcast %243 : vector<10x1xf32> to vector<10x10xf32>
    %246 = vector.broadcast %244 : vector<1x10xf32> to vector<10x10xf32>
    %247 = arith.addf %245, %246 : vector<10x10xf32>
    %c0_85 = arith.constant 0 : index
    %c7 = arith.constant 7 : index
    %248 = memref.load %arg0[%c0_85, %c7] : memref<3x8xf32, #tpu.memory_space<smem>>
    %249 = vector.broadcast %248 : f32 to vector<10x10xf32>
    %250 = arith.mulf %3, %249 : vector<10x10xf32>
    %251 = arith.addf %247, %250 : vector<10x10xf32>
    %cst_86 = arith.constant 0.000000e+00 : f32
    %252 = vector.broadcast %cst_86 : f32 to vector<10x10xf32>
    %253 = arith.cmpf ogt, %251, %252 : vector<10x10xf32>
    %cst_87 = arith.constant 2.000000e-01 : f32
    %254 = vector.broadcast %cst_87 : f32 to vector<10x10xf32>
    %255 = arith.mulf %254, %251 : vector<10x10xf32>
    %256 = arith.select %253, %251, %255 : vector<10x10xi1>, vector<10x10xf32>
    %cst_88 = arith.constant 0.000000e+00 : f32
    %257 = vector.broadcast %cst_88 : f32 to vector<10x10xf32>
    %258 = arith.cmpf ogt, %2, %257 : vector<10x10xf32>
    %cst_89 = arith.constant -1.000000e+30 : f32
    %259 = vector.broadcast %cst_89 : f32 to vector<10x10xf32>
    %260 = arith.select %258, %256, %259 : vector<10x10xi1>, vector<10x10xf32>
    %cst_90 = arith.constant dense<0xFF800000> : vector<10xf32>
    %261 = vector.multi_reduction <maximumf>, %260, %cst_90 [1] : vector<10x10xf32> to vector<10xf32>
    %262 = vector.shape_cast %261 : vector<10xf32> to vector<10x1xf32>
    %cst_91 = arith.constant 0.000000e+00 : f32
    %263 = vector.broadcast %cst_91 : f32 to vector<10x10xf32>
    %264 = arith.cmpf ogt, %2, %263 : vector<10x10xf32>
    %265 = vector.broadcast %262 : vector<10x1xf32> to vector<10x10xf32>
    %266 = arith.subf %260, %265 : vector<10x10xf32>
    %267 = math.exp %266 : vector<10x10xf32>
    %cst_92 = arith.constant 0.000000e+00 : f32
    %268 = vector.broadcast %cst_92 : f32 to vector<10x10xf32>
    %269 = arith.select %264, %267, %268 : vector<10x10xi1>, vector<10x10xf32>
    %cst_93 = arith.constant dense<0.000000e+00> : vector<10xf32>
    %270 = vector.multi_reduction <add>, %269, %cst_93 [1] : vector<10x10xf32> to vector<10xf32>
    %271 = vector.shape_cast %270 : vector<10xf32> to vector<10x1xf32>
    %cst_94 = arith.constant 9.99999968E-21 : f32
    %272 = vector.broadcast %cst_94 : f32 to vector<10x1xf32>
    %273 = arith.maximumf %271, %272 : vector<10x1xf32>
    %274 = vector.broadcast %273 : vector<10x1xf32> to vector<10x10xf32>
    %275 = arith.divf %269, %274 : vector<10x10xf32>
    %276 = tpu.concatenate %44, %77, %110, %143, %176, %209, %242, %275 in 0 : vector<10x10xf32>, vector<10x10xf32>, vector<10x10xf32>, vector<10x10xf32>, vector<10x10xf32>, vector<10x10xf32>, vector<10x10xf32>, vector<10x10xf32> -> vector<80x10xf32>
    %cst_95 = arith.constant dense<0.000000e+00> : vector<80x64xf32>
    %277 = tpu.matmul %276, %7, %cst_95 {dimension_numbers = #tpu.dot_dimension_numbers<[1], [0], [0], [1], [0, 0, 1, 1], [], []>} : vector<80x10xf32>, vector<10x64xf32>, vector<80x64xf32> -> vector<80x64xf32>
    %278 = vector.extract_strided_slice %277 {offsets = [0, 0], sizes = [10, 64], strides = [1, 1]} : vector<80x64xf32> to vector<10x64xf32>
    %279 = vector.extract_strided_slice %0 {offsets = [0, 0], sizes = [1, 64], strides = [1, 1]} : vector<8x64xf32> to vector<1x64xf32>
    %280 = vector.broadcast %279 : vector<1x64xf32> to vector<10x64xf32>
    %281 = arith.mulf %278, %280 : vector<10x64xf32>
    %282 = vector.broadcast %6 : vector<1x64xf32> to vector<10x64xf32>
    %283 = arith.addf %282, %281 : vector<10x64xf32>
    %284 = vector.extract_strided_slice %277 {offsets = [10, 0], sizes = [10, 64], strides = [1, 1]} : vector<80x64xf32> to vector<10x64xf32>
    %285 = vector.extract_strided_slice %0 {offsets = [1, 0], sizes = [1, 64], strides = [1, 1]} : vector<8x64xf32> to vector<1x64xf32>
    %286 = vector.broadcast %285 : vector<1x64xf32> to vector<10x64xf32>
    %287 = arith.mulf %284, %286 : vector<10x64xf32>
    %288 = arith.addf %283, %287 : vector<10x64xf32>
    %289 = vector.extract_strided_slice %277 {offsets = [20, 0], sizes = [10, 64], strides = [1, 1]} : vector<80x64xf32> to vector<10x64xf32>
    %290 = vector.extract_strided_slice %0 {offsets = [2, 0], sizes = [1, 64], strides = [1, 1]} : vector<8x64xf32> to vector<1x64xf32>
    %291 = vector.broadcast %290 : vector<1x64xf32> to vector<10x64xf32>
    %292 = arith.mulf %289, %291 : vector<10x64xf32>
    %293 = arith.addf %288, %292 : vector<10x64xf32>
    %294 = vector.extract_strided_slice %277 {offsets = [30, 0], sizes = [10, 64], strides = [1, 1]} : vector<80x64xf32> to vector<10x64xf32>
    %295 = vector.extract_strided_slice %0 {offsets = [3, 0], sizes = [1, 64], strides = [1, 1]} : vector<8x64xf32> to vector<1x64xf32>
    %296 = vector.broadcast %295 : vector<1x64xf32> to vector<10x64xf32>
    %297 = arith.mulf %294, %296 : vector<10x64xf32>
    %298 = arith.addf %293, %297 : vector<10x64xf32>
    %299 = vector.extract_strided_slice %277 {offsets = [40, 0], sizes = [10, 64], strides = [1, 1]} : vector<80x64xf32> to vector<10x64xf32>
    %300 = vector.extract_strided_slice %0 {offsets = [4, 0], sizes = [1, 64], strides = [1, 1]} : vector<8x64xf32> to vector<1x64xf32>
    %301 = vector.broadcast %300 : vector<1x64xf32> to vector<10x64xf32>
    %302 = arith.mulf %299, %301 : vector<10x64xf32>
    %303 = arith.addf %298, %302 : vector<10x64xf32>
    %304 = vector.extract_strided_slice %277 {offsets = [50, 0], sizes = [10, 64], strides = [1, 1]} : vector<80x64xf32> to vector<10x64xf32>
    %305 = vector.extract_strided_slice %0 {offsets = [5, 0], sizes = [1, 64], strides = [1, 1]} : vector<8x64xf32> to vector<1x64xf32>
    %306 = vector.broadcast %305 : vector<1x64xf32> to vector<10x64xf32>
    %307 = arith.mulf %304, %306 : vector<10x64xf32>
    %308 = arith.addf %303, %307 : vector<10x64xf32>
    %309 = vector.extract_strided_slice %277 {offsets = [60, 0], sizes = [10, 64], strides = [1, 1]} : vector<80x64xf32> to vector<10x64xf32>
    %310 = vector.extract_strided_slice %0 {offsets = [6, 0], sizes = [1, 64], strides = [1, 1]} : vector<8x64xf32> to vector<1x64xf32>
    %311 = vector.broadcast %310 : vector<1x64xf32> to vector<10x64xf32>
    %312 = arith.mulf %309, %311 : vector<10x64xf32>
    %313 = arith.addf %308, %312 : vector<10x64xf32>
    %314 = vector.extract_strided_slice %277 {offsets = [70, 0], sizes = [10, 64], strides = [1, 1]} : vector<80x64xf32> to vector<10x64xf32>
    %315 = vector.extract_strided_slice %0 {offsets = [7, 0], sizes = [1, 64], strides = [1, 1]} : vector<8x64xf32> to vector<1x64xf32>
    %316 = vector.broadcast %315 : vector<1x64xf32> to vector<10x64xf32>
    %317 = arith.mulf %314, %316 : vector<10x64xf32>
    %318 = arith.addf %313, %317 : vector<10x64xf32>
    %cst_96 = arith.constant 0.000000e+00 : f32
    %319 = vector.broadcast %cst_96 : f32 to vector<10x64xf32>
    %320 = arith.maximumf %318, %319 : vector<10x64xf32>
    %c0_97 = arith.constant 0 : index
    %c0_98 = arith.constant 0 : index
    %321 = vector.load %arg4[%c0_97, %c0_98] : memref<10x10xf32, #tpu.memory_space<vmem>>, vector<10x10xf32>
    %c0_99 = arith.constant 0 : index
    %c0_100 = arith.constant 0 : index
    %322 = vector.load %arg5[%c0_99, %c0_100] : memref<10x10xf32, #tpu.memory_space<vmem>>, vector<10x10xf32>
    %c0_101 = arith.constant 0 : index
    %c0_102 = arith.constant 0 : index
    %323 = vector.load %arg11[%c0_101, %c0_102] : memref<64x64xf32, #tpu.memory_space<vmem>>, vector<64x64xf32>
    %c0_103 = arith.constant 0 : index
    %c0_104 = arith.constant 0 : index
    %324 = vector.load %arg12[%c0_103, %c0_104] : memref<64x16xf32, #tpu.memory_space<vmem>>, vector<64x16xf32>
    %c0_105 = arith.constant 0 : index
    %c0_106 = arith.constant 0 : index
    %325 = vector.load %arg13[%c0_105, %c0_106] : memref<1x64xf32, #tpu.memory_space<vmem>>, vector<1x64xf32>
    %cst_107 = arith.constant dense<0.000000e+00> : vector<10x64xf32>
    %326 = tpu.matmul %320, %323, %cst_107 {dimension_numbers = #tpu.dot_dimension_numbers<[1], [0], [0], [1], [0, 0, 1, 1], [], []>} : vector<10x64xf32>, vector<64x64xf32>, vector<10x64xf32> -> vector<10x64xf32>
    %cst_108 = arith.constant dense<0.000000e+00> : vector<10x16xf32>
    %327 = tpu.matmul %326, %324, %cst_108 {dimension_numbers = #tpu.dot_dimension_numbers<[1], [0], [0], [1], [0, 0, 1, 1], [], []>} : vector<10x64xf32>, vector<64x16xf32>, vector<10x16xf32> -> vector<10x16xf32>
    %328 = vector.extract_strided_slice %327 {offsets = [0, 0], sizes = [10, 8], strides = [1, 1]} : vector<10x16xf32> to vector<10x8xf32>
    %329 = vector.extract_strided_slice %327 {offsets = [0, 8], sizes = [10, 8], strides = [1, 1]} : vector<10x16xf32> to vector<10x8xf32>
    %330 = tpu.transpose %328, [1, 0] : vector<10x8xf32> -> vector<8x10xf32>
    %331 = vector.extract_strided_slice %329 {offsets = [0, 0], sizes = [10, 1], strides = [1, 1]} : vector<10x8xf32> to vector<10x1xf32>
    %332 = vector.extract_strided_slice %330 {offsets = [0, 0], sizes = [1, 10], strides = [1, 1]} : vector<8x10xf32> to vector<1x10xf32>
    %333 = vector.broadcast %331 : vector<10x1xf32> to vector<10x10xf32>
    %334 = vector.broadcast %332 : vector<1x10xf32> to vector<10x10xf32>
    %335 = arith.addf %333, %334 : vector<10x10xf32>
    %c1_109 = arith.constant 1 : index
    %c0_110 = arith.constant 0 : index
    %336 = memref.load %arg0[%c1_109, %c0_110] : memref<3x8xf32, #tpu.memory_space<smem>>
    %337 = vector.broadcast %336 : f32 to vector<10x10xf32>
    %338 = arith.mulf %322, %337 : vector<10x10xf32>
    %339 = arith.addf %335, %338 : vector<10x10xf32>
    %cst_111 = arith.constant 0.000000e+00 : f32
    %340 = vector.broadcast %cst_111 : f32 to vector<10x10xf32>
    %341 = arith.cmpf ogt, %339, %340 : vector<10x10xf32>
    %cst_112 = arith.constant 2.000000e-01 : f32
    %342 = vector.broadcast %cst_112 : f32 to vector<10x10xf32>
    %343 = arith.mulf %342, %339 : vector<10x10xf32>
    %344 = arith.select %341, %339, %343 : vector<10x10xi1>, vector<10x10xf32>
    %cst_113 = arith.constant 0.000000e+00 : f32
    %345 = vector.broadcast %cst_113 : f32 to vector<10x10xf32>
    %346 = arith.cmpf ogt, %321, %345 : vector<10x10xf32>
    %cst_114 = arith.constant -1.000000e+30 : f32
    %347 = vector.broadcast %cst_114 : f32 to vector<10x10xf32>
    %348 = arith.select %346, %344, %347 : vector<10x10xi1>, vector<10x10xf32>
    %cst_115 = arith.constant dense<0xFF800000> : vector<10xf32>
    %349 = vector.multi_reduction <maximumf>, %348, %cst_115 [1] : vector<10x10xf32> to vector<10xf32>
    %350 = vector.shape_cast %349 : vector<10xf32> to vector<10x1xf32>
    %cst_116 = arith.constant 0.000000e+00 : f32
    %351 = vector.broadcast %cst_116 : f32 to vector<10x10xf32>
    %352 = arith.cmpf ogt, %321, %351 : vector<10x10xf32>
    %353 = vector.broadcast %350 : vector<10x1xf32> to vector<10x10xf32>
    %354 = arith.subf %348, %353 : vector<10x10xf32>
    %355 = math.exp %354 : vector<10x10xf32>
    %cst_117 = arith.constant 0.000000e+00 : f32
    %356 = vector.broadcast %cst_117 : f32 to vector<10x10xf32>
    %357 = arith.select %352, %355, %356 : vector<10x10xi1>, vector<10x10xf32>
    %cst_118 = arith.constant dense<0.000000e+00> : vector<10xf32>
    %358 = vector.multi_reduction <add>, %357, %cst_118 [1] : vector<10x10xf32> to vector<10xf32>
    %359 = vector.shape_cast %358 : vector<10xf32> to vector<10x1xf32>
    %cst_119 = arith.constant 9.99999968E-21 : f32
    %360 = vector.broadcast %cst_119 : f32 to vector<10x1xf32>
    %361 = arith.maximumf %359, %360 : vector<10x1xf32>
    %362 = vector.broadcast %361 : vector<10x1xf32> to vector<10x10xf32>
    %363 = arith.divf %357, %362 : vector<10x10xf32>
    %364 = vector.extract_strided_slice %329 {offsets = [0, 1], sizes = [10, 1], strides = [1, 1]} : vector<10x8xf32> to vector<10x1xf32>
    %365 = vector.extract_strided_slice %330 {offsets = [1, 0], sizes = [1, 10], strides = [1, 1]} : vector<8x10xf32> to vector<1x10xf32>
    %366 = vector.broadcast %364 : vector<10x1xf32> to vector<10x10xf32>
    %367 = vector.broadcast %365 : vector<1x10xf32> to vector<10x10xf32>
    %368 = arith.addf %366, %367 : vector<10x10xf32>
    %c1_120 = arith.constant 1 : index
    %c1_121 = arith.constant 1 : index
    %369 = memref.load %arg0[%c1_120, %c1_121] : memref<3x8xf32, #tpu.memory_space<smem>>
    %370 = vector.broadcast %369 : f32 to vector<10x10xf32>
    %371 = arith.mulf %322, %370 : vector<10x10xf32>
    %372 = arith.addf %368, %371 : vector<10x10xf32>
    %cst_122 = arith.constant 0.000000e+00 : f32
    %373 = vector.broadcast %cst_122 : f32 to vector<10x10xf32>
    %374 = arith.cmpf ogt, %372, %373 : vector<10x10xf32>
    %cst_123 = arith.constant 2.000000e-01 : f32
    %375 = vector.broadcast %cst_123 : f32 to vector<10x10xf32>
    %376 = arith.mulf %375, %372 : vector<10x10xf32>
    %377 = arith.select %374, %372, %376 : vector<10x10xi1>, vector<10x10xf32>
    %cst_124 = arith.constant 0.000000e+00 : f32
    %378 = vector.broadcast %cst_124 : f32 to vector<10x10xf32>
    %379 = arith.cmpf ogt, %321, %378 : vector<10x10xf32>
    %cst_125 = arith.constant -1.000000e+30 : f32
    %380 = vector.broadcast %cst_125 : f32 to vector<10x10xf32>
    %381 = arith.select %379, %377, %380 : vector<10x10xi1>, vector<10x10xf32>
    %cst_126 = arith.constant dense<0xFF800000> : vector<10xf32>
    %382 = vector.multi_reduction <maximumf>, %381, %cst_126 [1] : vector<10x10xf32> to vector<10xf32>
    %383 = vector.shape_cast %382 : vector<10xf32> to vector<10x1xf32>
    %cst_127 = arith.constant 0.000000e+00 : f32
    %384 = vector.broadcast %cst_127 : f32 to vector<10x10xf32>
    %385 = arith.cmpf ogt, %321, %384 : vector<10x10xf32>
    %386 = vector.broadcast %383 : vector<10x1xf32> to vector<10x10xf32>
    %387 = arith.subf %381, %386 : vector<10x10xf32>
    %388 = math.exp %387 : vector<10x10xf32>
    %cst_128 = arith.constant 0.000000e+00 : f32
    %389 = vector.broadcast %cst_128 : f32 to vector<10x10xf32>
    %390 = arith.select %385, %388, %389 : vector<10x10xi1>, vector<10x10xf32>
    %cst_129 = arith.constant dense<0.000000e+00> : vector<10xf32>
    %391 = vector.multi_reduction <add>, %390, %cst_129 [1] : vector<10x10xf32> to vector<10xf32>
    %392 = vector.shape_cast %391 : vector<10xf32> to vector<10x1xf32>
    %cst_130 = arith.constant 9.99999968E-21 : f32
    %393 = vector.broadcast %cst_130 : f32 to vector<10x1xf32>
    %394 = arith.maximumf %392, %393 : vector<10x1xf32>
    %395 = vector.broadcast %394 : vector<10x1xf32> to vector<10x10xf32>
    %396 = arith.divf %390, %395 : vector<10x10xf32>
    %397 = vector.extract_strided_slice %329 {offsets = [0, 2], sizes = [10, 1], strides = [1, 1]} : vector<10x8xf32> to vector<10x1xf32>
    %398 = vector.extract_strided_slice %330 {offsets = [2, 0], sizes = [1, 10], strides = [1, 1]} : vector<8x10xf32> to vector<1x10xf32>
    %399 = vector.broadcast %397 : vector<10x1xf32> to vector<10x10xf32>
    %400 = vector.broadcast %398 : vector<1x10xf32> to vector<10x10xf32>
    %401 = arith.addf %399, %400 : vector<10x10xf32>
    %c1_131 = arith.constant 1 : index
    %c2_132 = arith.constant 2 : index
    %402 = memref.load %arg0[%c1_131, %c2_132] : memref<3x8xf32, #tpu.memory_space<smem>>
    %403 = vector.broadcast %402 : f32 to vector<10x10xf32>
    %404 = arith.mulf %322, %403 : vector<10x10xf32>
    %405 = arith.addf %401, %404 : vector<10x10xf32>
    %cst_133 = arith.constant 0.000000e+00 : f32
    %406 = vector.broadcast %cst_133 : f32 to vector<10x10xf32>
    %407 = arith.cmpf ogt, %405, %406 : vector<10x10xf32>
    %cst_134 = arith.constant 2.000000e-01 : f32
    %408 = vector.broadcast %cst_134 : f32 to vector<10x10xf32>
    %409 = arith.mulf %408, %405 : vector<10x10xf32>
    %410 = arith.select %407, %405, %409 : vector<10x10xi1>, vector<10x10xf32>
    %cst_135 = arith.constant 0.000000e+00 : f32
    %411 = vector.broadcast %cst_135 : f32 to vector<10x10xf32>
    %412 = arith.cmpf ogt, %321, %411 : vector<10x10xf32>
    %cst_136 = arith.constant -1.000000e+30 : f32
    %413 = vector.broadcast %cst_136 : f32 to vector<10x10xf32>
    %414 = arith.select %412, %410, %413 : vector<10x10xi1>, vector<10x10xf32>
    %cst_137 = arith.constant dense<0xFF800000> : vector<10xf32>
    %415 = vector.multi_reduction <maximumf>, %414, %cst_137 [1] : vector<10x10xf32> to vector<10xf32>
    %416 = vector.shape_cast %415 : vector<10xf32> to vector<10x1xf32>
    %cst_138 = arith.constant 0.000000e+00 : f32
    %417 = vector.broadcast %cst_138 : f32 to vector<10x10xf32>
    %418 = arith.cmpf ogt, %321, %417 : vector<10x10xf32>
    %419 = vector.broadcast %416 : vector<10x1xf32> to vector<10x10xf32>
    %420 = arith.subf %414, %419 : vector<10x10xf32>
    %421 = math.exp %420 : vector<10x10xf32>
    %cst_139 = arith.constant 0.000000e+00 : f32
    %422 = vector.broadcast %cst_139 : f32 to vector<10x10xf32>
    %423 = arith.select %418, %421, %422 : vector<10x10xi1>, vector<10x10xf32>
    %cst_140 = arith.constant dense<0.000000e+00> : vector<10xf32>
    %424 = vector.multi_reduction <add>, %423, %cst_140 [1] : vector<10x10xf32> to vector<10xf32>
    %425 = vector.shape_cast %424 : vector<10xf32> to vector<10x1xf32>
    %cst_141 = arith.constant 9.99999968E-21 : f32
    %426 = vector.broadcast %cst_141 : f32 to vector<10x1xf32>
    %427 = arith.maximumf %425, %426 : vector<10x1xf32>
    %428 = vector.broadcast %427 : vector<10x1xf32> to vector<10x10xf32>
    %429 = arith.divf %423, %428 : vector<10x10xf32>
    %430 = vector.extract_strided_slice %329 {offsets = [0, 3], sizes = [10, 1], strides = [1, 1]} : vector<10x8xf32> to vector<10x1xf32>
    %431 = vector.extract_strided_slice %330 {offsets = [3, 0], sizes = [1, 10], strides = [1, 1]} : vector<8x10xf32> to vector<1x10xf32>
    %432 = vector.broadcast %430 : vector<10x1xf32> to vector<10x10xf32>
    %433 = vector.broadcast %431 : vector<1x10xf32> to vector<10x10xf32>
    %434 = arith.addf %432, %433 : vector<10x10xf32>
    %c1_142 = arith.constant 1 : index
    %c3_143 = arith.constant 3 : index
    %435 = memref.load %arg0[%c1_142, %c3_143] : memref<3x8xf32, #tpu.memory_space<smem>>
    %436 = vector.broadcast %435 : f32 to vector<10x10xf32>
    %437 = arith.mulf %322, %436 : vector<10x10xf32>
    %438 = arith.addf %434, %437 : vector<10x10xf32>
    %cst_144 = arith.constant 0.000000e+00 : f32
    %439 = vector.broadcast %cst_144 : f32 to vector<10x10xf32>
    %440 = arith.cmpf ogt, %438, %439 : vector<10x10xf32>
    %cst_145 = arith.constant 2.000000e-01 : f32
    %441 = vector.broadcast %cst_145 : f32 to vector<10x10xf32>
    %442 = arith.mulf %441, %438 : vector<10x10xf32>
    %443 = arith.select %440, %438, %442 : vector<10x10xi1>, vector<10x10xf32>
    %cst_146 = arith.constant 0.000000e+00 : f32
    %444 = vector.broadcast %cst_146 : f32 to vector<10x10xf32>
    %445 = arith.cmpf ogt, %321, %444 : vector<10x10xf32>
    %cst_147 = arith.constant -1.000000e+30 : f32
    %446 = vector.broadcast %cst_147 : f32 to vector<10x10xf32>
    %447 = arith.select %445, %443, %446 : vector<10x10xi1>, vector<10x10xf32>
    %cst_148 = arith.constant dense<0xFF800000> : vector<10xf32>
    %448 = vector.multi_reduction <maximumf>, %447, %cst_148 [1] : vector<10x10xf32> to vector<10xf32>
    %449 = vector.shape_cast %448 : vector<10xf32> to vector<10x1xf32>
    %cst_149 = arith.constant 0.000000e+00 : f32
    %450 = vector.broadcast %cst_149 : f32 to vector<10x10xf32>
    %451 = arith.cmpf ogt, %321, %450 : vector<10x10xf32>
    %452 = vector.broadcast %449 : vector<10x1xf32> to vector<10x10xf32>
    %453 = arith.subf %447, %452 : vector<10x10xf32>
    %454 = math.exp %453 : vector<10x10xf32>
    %cst_150 = arith.constant 0.000000e+00 : f32
    %455 = vector.broadcast %cst_150 : f32 to vector<10x10xf32>
    %456 = arith.select %451, %454, %455 : vector<10x10xi1>, vector<10x10xf32>
    %cst_151 = arith.constant dense<0.000000e+00> : vector<10xf32>
    %457 = vector.multi_reduction <add>, %456, %cst_151 [1] : vector<10x10xf32> to vector<10xf32>
    %458 = vector.shape_cast %457 : vector<10xf32> to vector<10x1xf32>
    %cst_152 = arith.constant 9.99999968E-21 : f32
    %459 = vector.broadcast %cst_152 : f32 to vector<10x1xf32>
    %460 = arith.maximumf %458, %459 : vector<10x1xf32>
    %461 = vector.broadcast %460 : vector<10x1xf32> to vector<10x10xf32>
    %462 = arith.divf %456, %461 : vector<10x10xf32>
    %463 = vector.extract_strided_slice %329 {offsets = [0, 4], sizes = [10, 1], strides = [1, 1]} : vector<10x8xf32> to vector<10x1xf32>
    %464 = vector.extract_strided_slice %330 {offsets = [4, 0], sizes = [1, 10], strides = [1, 1]} : vector<8x10xf32> to vector<1x10xf32>
    %465 = vector.broadcast %463 : vector<10x1xf32> to vector<10x10xf32>
    %466 = vector.broadcast %464 : vector<1x10xf32> to vector<10x10xf32>
    %467 = arith.addf %465, %466 : vector<10x10xf32>
    %c1_153 = arith.constant 1 : index
    %c4_154 = arith.constant 4 : index
    %468 = memref.load %arg0[%c1_153, %c4_154] : memref<3x8xf32, #tpu.memory_space<smem>>
    %469 = vector.broadcast %468 : f32 to vector<10x10xf32>
    %470 = arith.mulf %322, %469 : vector<10x10xf32>
    %471 = arith.addf %467, %470 : vector<10x10xf32>
    %cst_155 = arith.constant 0.000000e+00 : f32
    %472 = vector.broadcast %cst_155 : f32 to vector<10x10xf32>
    %473 = arith.cmpf ogt, %471, %472 : vector<10x10xf32>
    %cst_156 = arith.constant 2.000000e-01 : f32
    %474 = vector.broadcast %cst_156 : f32 to vector<10x10xf32>
    %475 = arith.mulf %474, %471 : vector<10x10xf32>
    %476 = arith.select %473, %471, %475 : vector<10x10xi1>, vector<10x10xf32>
    %cst_157 = arith.constant 0.000000e+00 : f32
    %477 = vector.broadcast %cst_157 : f32 to vector<10x10xf32>
    %478 = arith.cmpf ogt, %321, %477 : vector<10x10xf32>
    %cst_158 = arith.constant -1.000000e+30 : f32
    %479 = vector.broadcast %cst_158 : f32 to vector<10x10xf32>
    %480 = arith.select %478, %476, %479 : vector<10x10xi1>, vector<10x10xf32>
    %cst_159 = arith.constant dense<0xFF800000> : vector<10xf32>
    %481 = vector.multi_reduction <maximumf>, %480, %cst_159 [1] : vector<10x10xf32> to vector<10xf32>
    %482 = vector.shape_cast %481 : vector<10xf32> to vector<10x1xf32>
    %cst_160 = arith.constant 0.000000e+00 : f32
    %483 = vector.broadcast %cst_160 : f32 to vector<10x10xf32>
    %484 = arith.cmpf ogt, %321, %483 : vector<10x10xf32>
    %485 = vector.broadcast %482 : vector<10x1xf32> to vector<10x10xf32>
    %486 = arith.subf %480, %485 : vector<10x10xf32>
    %487 = math.exp %486 : vector<10x10xf32>
    %cst_161 = arith.constant 0.000000e+00 : f32
    %488 = vector.broadcast %cst_161 : f32 to vector<10x10xf32>
    %489 = arith.select %484, %487, %488 : vector<10x10xi1>, vector<10x10xf32>
    %cst_162 = arith.constant dense<0.000000e+00> : vector<10xf32>
    %490 = vector.multi_reduction <add>, %489, %cst_162 [1] : vector<10x10xf32> to vector<10xf32>
    %491 = vector.shape_cast %490 : vector<10xf32> to vector<10x1xf32>
    %cst_163 = arith.constant 9.99999968E-21 : f32
    %492 = vector.broadcast %cst_163 : f32 to vector<10x1xf32>
    %493 = arith.maximumf %491, %492 : vector<10x1xf32>
    %494 = vector.broadcast %493 : vector<10x1xf32> to vector<10x10xf32>
    %495 = arith.divf %489, %494 : vector<10x10xf32>
    %496 = vector.extract_strided_slice %329 {offsets = [0, 5], sizes = [10, 1], strides = [1, 1]} : vector<10x8xf32> to vector<10x1xf32>
    %497 = vector.extract_strided_slice %330 {offsets = [5, 0], sizes = [1, 10], strides = [1, 1]} : vector<8x10xf32> to vector<1x10xf32>
    %498 = vector.broadcast %496 : vector<10x1xf32> to vector<10x10xf32>
    %499 = vector.broadcast %497 : vector<1x10xf32> to vector<10x10xf32>
    %500 = arith.addf %498, %499 : vector<10x10xf32>
    %c1_164 = arith.constant 1 : index
    %c5_165 = arith.constant 5 : index
    %501 = memref.load %arg0[%c1_164, %c5_165] : memref<3x8xf32, #tpu.memory_space<smem>>
    %502 = vector.broadcast %501 : f32 to vector<10x10xf32>
    %503 = arith.mulf %322, %502 : vector<10x10xf32>
    %504 = arith.addf %500, %503 : vector<10x10xf32>
    %cst_166 = arith.constant 0.000000e+00 : f32
    %505 = vector.broadcast %cst_166 : f32 to vector<10x10xf32>
    %506 = arith.cmpf ogt, %504, %505 : vector<10x10xf32>
    %cst_167 = arith.constant 2.000000e-01 : f32
    %507 = vector.broadcast %cst_167 : f32 to vector<10x10xf32>
    %508 = arith.mulf %507, %504 : vector<10x10xf32>
    %509 = arith.select %506, %504, %508 : vector<10x10xi1>, vector<10x10xf32>
    %cst_168 = arith.constant 0.000000e+00 : f32
    %510 = vector.broadcast %cst_168 : f32 to vector<10x10xf32>
    %511 = arith.cmpf ogt, %321, %510 : vector<10x10xf32>
    %cst_169 = arith.constant -1.000000e+30 : f32
    %512 = vector.broadcast %cst_169 : f32 to vector<10x10xf32>
    %513 = arith.select %511, %509, %512 : vector<10x10xi1>, vector<10x10xf32>
    %cst_170 = arith.constant dense<0xFF800000> : vector<10xf32>
    %514 = vector.multi_reduction <maximumf>, %513, %cst_170 [1] : vector<10x10xf32> to vector<10xf32>
    %515 = vector.shape_cast %514 : vector<10xf32> to vector<10x1xf32>
    %cst_171 = arith.constant 0.000000e+00 : f32
    %516 = vector.broadcast %cst_171 : f32 to vector<10x10xf32>
    %517 = arith.cmpf ogt, %321, %516 : vector<10x10xf32>
    %518 = vector.broadcast %515 : vector<10x1xf32> to vector<10x10xf32>
    %519 = arith.subf %513, %518 : vector<10x10xf32>
    %520 = math.exp %519 : vector<10x10xf32>
    %cst_172 = arith.constant 0.000000e+00 : f32
    %521 = vector.broadcast %cst_172 : f32 to vector<10x10xf32>
    %522 = arith.select %517, %520, %521 : vector<10x10xi1>, vector<10x10xf32>
    %cst_173 = arith.constant dense<0.000000e+00> : vector<10xf32>
    %523 = vector.multi_reduction <add>, %522, %cst_173 [1] : vector<10x10xf32> to vector<10xf32>
    %524 = vector.shape_cast %523 : vector<10xf32> to vector<10x1xf32>
    %cst_174 = arith.constant 9.99999968E-21 : f32
    %525 = vector.broadcast %cst_174 : f32 to vector<10x1xf32>
    %526 = arith.maximumf %524, %525 : vector<10x1xf32>
    %527 = vector.broadcast %526 : vector<10x1xf32> to vector<10x10xf32>
    %528 = arith.divf %522, %527 : vector<10x10xf32>
    %529 = vector.extract_strided_slice %329 {offsets = [0, 6], sizes = [10, 1], strides = [1, 1]} : vector<10x8xf32> to vector<10x1xf32>
    %530 = vector.extract_strided_slice %330 {offsets = [6, 0], sizes = [1, 10], strides = [1, 1]} : vector<8x10xf32> to vector<1x10xf32>
    %531 = vector.broadcast %529 : vector<10x1xf32> to vector<10x10xf32>
    %532 = vector.broadcast %530 : vector<1x10xf32> to vector<10x10xf32>
    %533 = arith.addf %531, %532 : vector<10x10xf32>
    %c1_175 = arith.constant 1 : index
    %c6_176 = arith.constant 6 : index
    %534 = memref.load %arg0[%c1_175, %c6_176] : memref<3x8xf32, #tpu.memory_space<smem>>
    %535 = vector.broadcast %534 : f32 to vector<10x10xf32>
    %536 = arith.mulf %322, %535 : vector<10x10xf32>
    %537 = arith.addf %533, %536 : vector<10x10xf32>
    %cst_177 = arith.constant 0.000000e+00 : f32
    %538 = vector.broadcast %cst_177 : f32 to vector<10x10xf32>
    %539 = arith.cmpf ogt, %537, %538 : vector<10x10xf32>
    %cst_178 = arith.constant 2.000000e-01 : f32
    %540 = vector.broadcast %cst_178 : f32 to vector<10x10xf32>
    %541 = arith.mulf %540, %537 : vector<10x10xf32>
    %542 = arith.select %539, %537, %541 : vector<10x10xi1>, vector<10x10xf32>
    %cst_179 = arith.constant 0.000000e+00 : f32
    %543 = vector.broadcast %cst_179 : f32 to vector<10x10xf32>
    %544 = arith.cmpf ogt, %321, %543 : vector<10x10xf32>
    %cst_180 = arith.constant -1.000000e+30 : f32
    %545 = vector.broadcast %cst_180 : f32 to vector<10x10xf32>
    %546 = arith.select %544, %542, %545 : vector<10x10xi1>, vector<10x10xf32>
    %cst_181 = arith.constant dense<0xFF800000> : vector<10xf32>
    %547 = vector.multi_reduction <maximumf>, %546, %cst_181 [1] : vector<10x10xf32> to vector<10xf32>
    %548 = vector.shape_cast %547 : vector<10xf32> to vector<10x1xf32>
    %cst_182 = arith.constant 0.000000e+00 : f32
    %549 = vector.broadcast %cst_182 : f32 to vector<10x10xf32>
    %550 = arith.cmpf ogt, %321, %549 : vector<10x10xf32>
    %551 = vector.broadcast %548 : vector<10x1xf32> to vector<10x10xf32>
    %552 = arith.subf %546, %551 : vector<10x10xf32>
    %553 = math.exp %552 : vector<10x10xf32>
    %cst_183 = arith.constant 0.000000e+00 : f32
    %554 = vector.broadcast %cst_183 : f32 to vector<10x10xf32>
    %555 = arith.select %550, %553, %554 : vector<10x10xi1>, vector<10x10xf32>
    %cst_184 = arith.constant dense<0.000000e+00> : vector<10xf32>
    %556 = vector.multi_reduction <add>, %555, %cst_184 [1] : vector<10x10xf32> to vector<10xf32>
    %557 = vector.shape_cast %556 : vector<10xf32> to vector<10x1xf32>
    %cst_185 = arith.constant 9.99999968E-21 : f32
    %558 = vector.broadcast %cst_185 : f32 to vector<10x1xf32>
    %559 = arith.maximumf %557, %558 : vector<10x1xf32>
    %560 = vector.broadcast %559 : vector<10x1xf32> to vector<10x10xf32>
    %561 = arith.divf %555, %560 : vector<10x10xf32>
    %562 = vector.extract_strided_slice %329 {offsets = [0, 7], sizes = [10, 1], strides = [1, 1]} : vector<10x8xf32> to vector<10x1xf32>
    %563 = vector.extract_strided_slice %330 {offsets = [7, 0], sizes = [1, 10], strides = [1, 1]} : vector<8x10xf32> to vector<1x10xf32>
    %564 = vector.broadcast %562 : vector<10x1xf32> to vector<10x10xf32>
    %565 = vector.broadcast %563 : vector<1x10xf32> to vector<10x10xf32>
    %566 = arith.addf %564, %565 : vector<10x10xf32>
    %c1_186 = arith.constant 1 : index
    %c7_187 = arith.constant 7 : index
    %567 = memref.load %arg0[%c1_186, %c7_187] : memref<3x8xf32, #tpu.memory_space<smem>>
    %568 = vector.broadcast %567 : f32 to vector<10x10xf32>
    %569 = arith.mulf %322, %568 : vector<10x10xf32>
    %570 = arith.addf %566, %569 : vector<10x10xf32>
    %cst_188 = arith.constant 0.000000e+00 : f32
    %571 = vector.broadcast %cst_188 : f32 to vector<10x10xf32>
    %572 = arith.cmpf ogt, %570, %571 : vector<10x10xf32>
    %cst_189 = arith.constant 2.000000e-01 : f32
    %573 = vector.broadcast %cst_189 : f32 to vector<10x10xf32>
    %574 = arith.mulf %573, %570 : vector<10x10xf32>
    %575 = arith.select %572, %570, %574 : vector<10x10xi1>, vector<10x10xf32>
    %cst_190 = arith.constant 0.000000e+00 : f32
    %576 = vector.broadcast %cst_190 : f32 to vector<10x10xf32>
    %577 = arith.cmpf ogt, %321, %576 : vector<10x10xf32>
    %cst_191 = arith.constant -1.000000e+30 : f32
    %578 = vector.broadcast %cst_191 : f32 to vector<10x10xf32>
    %579 = arith.select %577, %575, %578 : vector<10x10xi1>, vector<10x10xf32>
    %cst_192 = arith.constant dense<0xFF800000> : vector<10xf32>
    %580 = vector.multi_reduction <maximumf>, %579, %cst_192 [1] : vector<10x10xf32> to vector<10xf32>
    %581 = vector.shape_cast %580 : vector<10xf32> to vector<10x1xf32>
    %cst_193 = arith.constant 0.000000e+00 : f32
    %582 = vector.broadcast %cst_193 : f32 to vector<10x10xf32>
    %583 = arith.cmpf ogt, %321, %582 : vector<10x10xf32>
    %584 = vector.broadcast %581 : vector<10x1xf32> to vector<10x10xf32>
    %585 = arith.subf %579, %584 : vector<10x10xf32>
    %586 = math.exp %585 : vector<10x10xf32>
    %cst_194 = arith.constant 0.000000e+00 : f32
    %587 = vector.broadcast %cst_194 : f32 to vector<10x10xf32>
    %588 = arith.select %583, %586, %587 : vector<10x10xi1>, vector<10x10xf32>
    %cst_195 = arith.constant dense<0.000000e+00> : vector<10xf32>
    %589 = vector.multi_reduction <add>, %588, %cst_195 [1] : vector<10x10xf32> to vector<10xf32>
    %590 = vector.shape_cast %589 : vector<10xf32> to vector<10x1xf32>
    %cst_196 = arith.constant 9.99999968E-21 : f32
    %591 = vector.broadcast %cst_196 : f32 to vector<10x1xf32>
    %592 = arith.maximumf %590, %591 : vector<10x1xf32>
    %593 = vector.broadcast %592 : vector<10x1xf32> to vector<10x10xf32>
    %594 = arith.divf %588, %593 : vector<10x10xf32>
    %595 = tpu.concatenate %363, %396, %429, %462, %495, %528, %561, %594 in 0 : vector<10x10xf32>, vector<10x10xf32>, vector<10x10xf32>, vector<10x10xf32>, vector<10x10xf32>, vector<10x10xf32>, vector<10x10xf32>, vector<10x10xf32> -> vector<80x10xf32>
    %cst_197 = arith.constant dense<0.000000e+00> : vector<80x64xf32>
    %596 = tpu.matmul %595, %326, %cst_197 {dimension_numbers = #tpu.dot_dimension_numbers<[1], [0], [0], [1], [0, 0, 1, 1], [], []>} : vector<80x10xf32>, vector<10x64xf32>, vector<80x64xf32> -> vector<80x64xf32>
    %597 = vector.extract_strided_slice %596 {offsets = [0, 0], sizes = [10, 64], strides = [1, 1]} : vector<80x64xf32> to vector<10x64xf32>
    %598 = vector.extract_strided_slice %0 {offsets = [0, 0], sizes = [1, 64], strides = [1, 1]} : vector<8x64xf32> to vector<1x64xf32>
    %599 = vector.broadcast %598 : vector<1x64xf32> to vector<10x64xf32>
    %600 = arith.mulf %597, %599 : vector<10x64xf32>
    %601 = vector.broadcast %325 : vector<1x64xf32> to vector<10x64xf32>
    %602 = arith.addf %601, %600 : vector<10x64xf32>
    %603 = vector.extract_strided_slice %596 {offsets = [10, 0], sizes = [10, 64], strides = [1, 1]} : vector<80x64xf32> to vector<10x64xf32>
    %604 = vector.extract_strided_slice %0 {offsets = [1, 0], sizes = [1, 64], strides = [1, 1]} : vector<8x64xf32> to vector<1x64xf32>
    %605 = vector.broadcast %604 : vector<1x64xf32> to vector<10x64xf32>
    %606 = arith.mulf %603, %605 : vector<10x64xf32>
    %607 = arith.addf %602, %606 : vector<10x64xf32>
    %608 = vector.extract_strided_slice %596 {offsets = [20, 0], sizes = [10, 64], strides = [1, 1]} : vector<80x64xf32> to vector<10x64xf32>
    %609 = vector.extract_strided_slice %0 {offsets = [2, 0], sizes = [1, 64], strides = [1, 1]} : vector<8x64xf32> to vector<1x64xf32>
    %610 = vector.broadcast %609 : vector<1x64xf32> to vector<10x64xf32>
    %611 = arith.mulf %608, %610 : vector<10x64xf32>
    %612 = arith.addf %607, %611 : vector<10x64xf32>
    %613 = vector.extract_strided_slice %596 {offsets = [30, 0], sizes = [10, 64], strides = [1, 1]} : vector<80x64xf32> to vector<10x64xf32>
    %614 = vector.extract_strided_slice %0 {offsets = [3, 0], sizes = [1, 64], strides = [1, 1]} : vector<8x64xf32> to vector<1x64xf32>
    %615 = vector.broadcast %614 : vector<1x64xf32> to vector<10x64xf32>
    %616 = arith.mulf %613, %615 : vector<10x64xf32>
    %617 = arith.addf %612, %616 : vector<10x64xf32>
    %618 = vector.extract_strided_slice %596 {offsets = [40, 0], sizes = [10, 64], strides = [1, 1]} : vector<80x64xf32> to vector<10x64xf32>
    %619 = vector.extract_strided_slice %0 {offsets = [4, 0], sizes = [1, 64], strides = [1, 1]} : vector<8x64xf32> to vector<1x64xf32>
    %620 = vector.broadcast %619 : vector<1x64xf32> to vector<10x64xf32>
    %621 = arith.mulf %618, %620 : vector<10x64xf32>
    %622 = arith.addf %617, %621 : vector<10x64xf32>
    %623 = vector.extract_strided_slice %596 {offsets = [50, 0], sizes = [10, 64], strides = [1, 1]} : vector<80x64xf32> to vector<10x64xf32>
    %624 = vector.extract_strided_slice %0 {offsets = [5, 0], sizes = [1, 64], strides = [1, 1]} : vector<8x64xf32> to vector<1x64xf32>
    %625 = vector.broadcast %624 : vector<1x64xf32> to vector<10x64xf32>
    %626 = arith.mulf %623, %625 : vector<10x64xf32>
    %627 = arith.addf %622, %626 : vector<10x64xf32>
    %628 = vector.extract_strided_slice %596 {offsets = [60, 0], sizes = [10, 64], strides = [1, 1]} : vector<80x64xf32> to vector<10x64xf32>
    %629 = vector.extract_strided_slice %0 {offsets = [6, 0], sizes = [1, 64], strides = [1, 1]} : vector<8x64xf32> to vector<1x64xf32>
    %630 = vector.broadcast %629 : vector<1x64xf32> to vector<10x64xf32>
    %631 = arith.mulf %628, %630 : vector<10x64xf32>
    %632 = arith.addf %627, %631 : vector<10x64xf32>
    %633 = vector.extract_strided_slice %596 {offsets = [70, 0], sizes = [10, 64], strides = [1, 1]} : vector<80x64xf32> to vector<10x64xf32>
    %634 = vector.extract_strided_slice %0 {offsets = [7, 0], sizes = [1, 64], strides = [1, 1]} : vector<8x64xf32> to vector<1x64xf32>
    %635 = vector.broadcast %634 : vector<1x64xf32> to vector<10x64xf32>
    %636 = arith.mulf %633, %635 : vector<10x64xf32>
    %637 = arith.addf %632, %636 : vector<10x64xf32>
    %cst_198 = arith.constant 0.000000e+00 : f32
    %638 = vector.broadcast %cst_198 : f32 to vector<10x64xf32>
    %639 = arith.maximumf %637, %638 : vector<10x64xf32>
    %c0_199 = arith.constant 0 : index
    %c0_200 = arith.constant 0 : index
    %640 = vector.load %arg4[%c0_199, %c0_200] : memref<10x10xf32, #tpu.memory_space<vmem>>, vector<10x10xf32>
    %c0_201 = arith.constant 0 : index
    %c0_202 = arith.constant 0 : index
    %641 = vector.load %arg5[%c0_201, %c0_202] : memref<10x10xf32, #tpu.memory_space<vmem>>, vector<10x10xf32>
    %c0_203 = arith.constant 0 : index
    %c0_204 = arith.constant 0 : index
    %642 = vector.load %arg14[%c0_203, %c0_204] : memref<64x64xf32, #tpu.memory_space<vmem>>, vector<64x64xf32>
    %c0_205 = arith.constant 0 : index
    %c0_206 = arith.constant 0 : index
    %643 = vector.load %arg15[%c0_205, %c0_206] : memref<64x16xf32, #tpu.memory_space<vmem>>, vector<64x16xf32>
    %c0_207 = arith.constant 0 : index
    %c0_208 = arith.constant 0 : index
    %644 = vector.load %arg16[%c0_207, %c0_208] : memref<1x64xf32, #tpu.memory_space<vmem>>, vector<1x64xf32>
    %cst_209 = arith.constant dense<0.000000e+00> : vector<10x64xf32>
    %645 = tpu.matmul %639, %642, %cst_209 {dimension_numbers = #tpu.dot_dimension_numbers<[1], [0], [0], [1], [0, 0, 1, 1], [], []>} : vector<10x64xf32>, vector<64x64xf32>, vector<10x64xf32> -> vector<10x64xf32>
    %cst_210 = arith.constant dense<0.000000e+00> : vector<10x16xf32>
    %646 = tpu.matmul %645, %643, %cst_210 {dimension_numbers = #tpu.dot_dimension_numbers<[1], [0], [0], [1], [0, 0, 1, 1], [], []>} : vector<10x64xf32>, vector<64x16xf32>, vector<10x16xf32> -> vector<10x16xf32>
    %647 = vector.extract_strided_slice %646 {offsets = [0, 0], sizes = [10, 8], strides = [1, 1]} : vector<10x16xf32> to vector<10x8xf32>
    %648 = vector.extract_strided_slice %646 {offsets = [0, 8], sizes = [10, 8], strides = [1, 1]} : vector<10x16xf32> to vector<10x8xf32>
    %649 = tpu.transpose %647, [1, 0] : vector<10x8xf32> -> vector<8x10xf32>
    %650 = vector.extract_strided_slice %648 {offsets = [0, 0], sizes = [10, 1], strides = [1, 1]} : vector<10x8xf32> to vector<10x1xf32>
    %651 = vector.extract_strided_slice %649 {offsets = [0, 0], sizes = [1, 10], strides = [1, 1]} : vector<8x10xf32> to vector<1x10xf32>
    %652 = vector.broadcast %650 : vector<10x1xf32> to vector<10x10xf32>
    %653 = vector.broadcast %651 : vector<1x10xf32> to vector<10x10xf32>
    %654 = arith.addf %652, %653 : vector<10x10xf32>
    %c2_211 = arith.constant 2 : index
    %c0_212 = arith.constant 0 : index
    %655 = memref.load %arg0[%c2_211, %c0_212] : memref<3x8xf32, #tpu.memory_space<smem>>
    %656 = vector.broadcast %655 : f32 to vector<10x10xf32>
    %657 = arith.mulf %641, %656 : vector<10x10xf32>
    %658 = arith.addf %654, %657 : vector<10x10xf32>
    %cst_213 = arith.constant 0.000000e+00 : f32
    %659 = vector.broadcast %cst_213 : f32 to vector<10x10xf32>
    %660 = arith.cmpf ogt, %658, %659 : vector<10x10xf32>
    %cst_214 = arith.constant 2.000000e-01 : f32
    %661 = vector.broadcast %cst_214 : f32 to vector<10x10xf32>
    %662 = arith.mulf %661, %658 : vector<10x10xf32>
    %663 = arith.select %660, %658, %662 : vector<10x10xi1>, vector<10x10xf32>
    %cst_215 = arith.constant 0.000000e+00 : f32
    %664 = vector.broadcast %cst_215 : f32 to vector<10x10xf32>
    %665 = arith.cmpf ogt, %640, %664 : vector<10x10xf32>
    %cst_216 = arith.constant -1.000000e+30 : f32
    %666 = vector.broadcast %cst_216 : f32 to vector<10x10xf32>
    %667 = arith.select %665, %663, %666 : vector<10x10xi1>, vector<10x10xf32>
    %cst_217 = arith.constant dense<0xFF800000> : vector<10xf32>
    %668 = vector.multi_reduction <maximumf>, %667, %cst_217 [1] : vector<10x10xf32> to vector<10xf32>
    %669 = vector.shape_cast %668 : vector<10xf32> to vector<10x1xf32>
    %cst_218 = arith.constant 0.000000e+00 : f32
    %670 = vector.broadcast %cst_218 : f32 to vector<10x10xf32>
    %671 = arith.cmpf ogt, %640, %670 : vector<10x10xf32>
    %672 = vector.broadcast %669 : vector<10x1xf32> to vector<10x10xf32>
    %673 = arith.subf %667, %672 : vector<10x10xf32>
    %674 = math.exp %673 : vector<10x10xf32>
    %cst_219 = arith.constant 0.000000e+00 : f32
    %675 = vector.broadcast %cst_219 : f32 to vector<10x10xf32>
    %676 = arith.select %671, %674, %675 : vector<10x10xi1>, vector<10x10xf32>
    %cst_220 = arith.constant dense<0.000000e+00> : vector<10xf32>
    %677 = vector.multi_reduction <add>, %676, %cst_220 [1] : vector<10x10xf32> to vector<10xf32>
    %678 = vector.shape_cast %677 : vector<10xf32> to vector<10x1xf32>
    %cst_221 = arith.constant 9.99999968E-21 : f32
    %679 = vector.broadcast %cst_221 : f32 to vector<10x1xf32>
    %680 = arith.maximumf %678, %679 : vector<10x1xf32>
    %681 = vector.broadcast %680 : vector<10x1xf32> to vector<10x10xf32>
    %682 = arith.divf %676, %681 : vector<10x10xf32>
    %683 = vector.extract_strided_slice %648 {offsets = [0, 1], sizes = [10, 1], strides = [1, 1]} : vector<10x8xf32> to vector<10x1xf32>
    %684 = vector.extract_strided_slice %649 {offsets = [1, 0], sizes = [1, 10], strides = [1, 1]} : vector<8x10xf32> to vector<1x10xf32>
    %685 = vector.broadcast %683 : vector<10x1xf32> to vector<10x10xf32>
    %686 = vector.broadcast %684 : vector<1x10xf32> to vector<10x10xf32>
    %687 = arith.addf %685, %686 : vector<10x10xf32>
    %c2_222 = arith.constant 2 : index
    %c1_223 = arith.constant 1 : index
    %688 = memref.load %arg0[%c2_222, %c1_223] : memref<3x8xf32, #tpu.memory_space<smem>>
    %689 = vector.broadcast %688 : f32 to vector<10x10xf32>
    %690 = arith.mulf %641, %689 : vector<10x10xf32>
    %691 = arith.addf %687, %690 : vector<10x10xf32>
    %cst_224 = arith.constant 0.000000e+00 : f32
    %692 = vector.broadcast %cst_224 : f32 to vector<10x10xf32>
    %693 = arith.cmpf ogt, %691, %692 : vector<10x10xf32>
    %cst_225 = arith.constant 2.000000e-01 : f32
    %694 = vector.broadcast %cst_225 : f32 to vector<10x10xf32>
    %695 = arith.mulf %694, %691 : vector<10x10xf32>
    %696 = arith.select %693, %691, %695 : vector<10x10xi1>, vector<10x10xf32>
    %cst_226 = arith.constant 0.000000e+00 : f32
    %697 = vector.broadcast %cst_226 : f32 to vector<10x10xf32>
    %698 = arith.cmpf ogt, %640, %697 : vector<10x10xf32>
    %cst_227 = arith.constant -1.000000e+30 : f32
    %699 = vector.broadcast %cst_227 : f32 to vector<10x10xf32>
    %700 = arith.select %698, %696, %699 : vector<10x10xi1>, vector<10x10xf32>
    %cst_228 = arith.constant dense<0xFF800000> : vector<10xf32>
    %701 = vector.multi_reduction <maximumf>, %700, %cst_228 [1] : vector<10x10xf32> to vector<10xf32>
    %702 = vector.shape_cast %701 : vector<10xf32> to vector<10x1xf32>
    %cst_229 = arith.constant 0.000000e+00 : f32
    %703 = vector.broadcast %cst_229 : f32 to vector<10x10xf32>
    %704 = arith.cmpf ogt, %640, %703 : vector<10x10xf32>
    %705 = vector.broadcast %702 : vector<10x1xf32> to vector<10x10xf32>
    %706 = arith.subf %700, %705 : vector<10x10xf32>
    %707 = math.exp %706 : vector<10x10xf32>
    %cst_230 = arith.constant 0.000000e+00 : f32
    %708 = vector.broadcast %cst_230 : f32 to vector<10x10xf32>
    %709 = arith.select %704, %707, %708 : vector<10x10xi1>, vector<10x10xf32>
    %cst_231 = arith.constant dense<0.000000e+00> : vector<10xf32>
    %710 = vector.multi_reduction <add>, %709, %cst_231 [1] : vector<10x10xf32> to vector<10xf32>
    %711 = vector.shape_cast %710 : vector<10xf32> to vector<10x1xf32>
    %cst_232 = arith.constant 9.99999968E-21 : f32
    %712 = vector.broadcast %cst_232 : f32 to vector<10x1xf32>
    %713 = arith.maximumf %711, %712 : vector<10x1xf32>
    %714 = vector.broadcast %713 : vector<10x1xf32> to vector<10x10xf32>
    %715 = arith.divf %709, %714 : vector<10x10xf32>
    %716 = vector.extract_strided_slice %648 {offsets = [0, 2], sizes = [10, 1], strides = [1, 1]} : vector<10x8xf32> to vector<10x1xf32>
    %717 = vector.extract_strided_slice %649 {offsets = [2, 0], sizes = [1, 10], strides = [1, 1]} : vector<8x10xf32> to vector<1x10xf32>
    %718 = vector.broadcast %716 : vector<10x1xf32> to vector<10x10xf32>
    %719 = vector.broadcast %717 : vector<1x10xf32> to vector<10x10xf32>
    %720 = arith.addf %718, %719 : vector<10x10xf32>
    %c2_233 = arith.constant 2 : index
    %c2_234 = arith.constant 2 : index
    %721 = memref.load %arg0[%c2_233, %c2_234] : memref<3x8xf32, #tpu.memory_space<smem>>
    %722 = vector.broadcast %721 : f32 to vector<10x10xf32>
    %723 = arith.mulf %641, %722 : vector<10x10xf32>
    %724 = arith.addf %720, %723 : vector<10x10xf32>
    %cst_235 = arith.constant 0.000000e+00 : f32
    %725 = vector.broadcast %cst_235 : f32 to vector<10x10xf32>
    %726 = arith.cmpf ogt, %724, %725 : vector<10x10xf32>
    %cst_236 = arith.constant 2.000000e-01 : f32
    %727 = vector.broadcast %cst_236 : f32 to vector<10x10xf32>
    %728 = arith.mulf %727, %724 : vector<10x10xf32>
    %729 = arith.select %726, %724, %728 : vector<10x10xi1>, vector<10x10xf32>
    %cst_237 = arith.constant 0.000000e+00 : f32
    %730 = vector.broadcast %cst_237 : f32 to vector<10x10xf32>
    %731 = arith.cmpf ogt, %640, %730 : vector<10x10xf32>
    %cst_238 = arith.constant -1.000000e+30 : f32
    %732 = vector.broadcast %cst_238 : f32 to vector<10x10xf32>
    %733 = arith.select %731, %729, %732 : vector<10x10xi1>, vector<10x10xf32>
    %cst_239 = arith.constant dense<0xFF800000> : vector<10xf32>
    %734 = vector.multi_reduction <maximumf>, %733, %cst_239 [1] : vector<10x10xf32> to vector<10xf32>
    %735 = vector.shape_cast %734 : vector<10xf32> to vector<10x1xf32>
    %cst_240 = arith.constant 0.000000e+00 : f32
    %736 = vector.broadcast %cst_240 : f32 to vector<10x10xf32>
    %737 = arith.cmpf ogt, %640, %736 : vector<10x10xf32>
    %738 = vector.broadcast %735 : vector<10x1xf32> to vector<10x10xf32>
    %739 = arith.subf %733, %738 : vector<10x10xf32>
    %740 = math.exp %739 : vector<10x10xf32>
    %cst_241 = arith.constant 0.000000e+00 : f32
    %741 = vector.broadcast %cst_241 : f32 to vector<10x10xf32>
    %742 = arith.select %737, %740, %741 : vector<10x10xi1>, vector<10x10xf32>
    %cst_242 = arith.constant dense<0.000000e+00> : vector<10xf32>
    %743 = vector.multi_reduction <add>, %742, %cst_242 [1] : vector<10x10xf32> to vector<10xf32>
    %744 = vector.shape_cast %743 : vector<10xf32> to vector<10x1xf32>
    %cst_243 = arith.constant 9.99999968E-21 : f32
    %745 = vector.broadcast %cst_243 : f32 to vector<10x1xf32>
    %746 = arith.maximumf %744, %745 : vector<10x1xf32>
    %747 = vector.broadcast %746 : vector<10x1xf32> to vector<10x10xf32>
    %748 = arith.divf %742, %747 : vector<10x10xf32>
    %749 = vector.extract_strided_slice %648 {offsets = [0, 3], sizes = [10, 1], strides = [1, 1]} : vector<10x8xf32> to vector<10x1xf32>
    %750 = vector.extract_strided_slice %649 {offsets = [3, 0], sizes = [1, 10], strides = [1, 1]} : vector<8x10xf32> to vector<1x10xf32>
    %751 = vector.broadcast %749 : vector<10x1xf32> to vector<10x10xf32>
    %752 = vector.broadcast %750 : vector<1x10xf32> to vector<10x10xf32>
    %753 = arith.addf %751, %752 : vector<10x10xf32>
    %c2_244 = arith.constant 2 : index
    %c3_245 = arith.constant 3 : index
    %754 = memref.load %arg0[%c2_244, %c3_245] : memref<3x8xf32, #tpu.memory_space<smem>>
    %755 = vector.broadcast %754 : f32 to vector<10x10xf32>
    %756 = arith.mulf %641, %755 : vector<10x10xf32>
    %757 = arith.addf %753, %756 : vector<10x10xf32>
    %cst_246 = arith.constant 0.000000e+00 : f32
    %758 = vector.broadcast %cst_246 : f32 to vector<10x10xf32>
    %759 = arith.cmpf ogt, %757, %758 : vector<10x10xf32>
    %cst_247 = arith.constant 2.000000e-01 : f32
    %760 = vector.broadcast %cst_247 : f32 to vector<10x10xf32>
    %761 = arith.mulf %760, %757 : vector<10x10xf32>
    %762 = arith.select %759, %757, %761 : vector<10x10xi1>, vector<10x10xf32>
    %cst_248 = arith.constant 0.000000e+00 : f32
    %763 = vector.broadcast %cst_248 : f32 to vector<10x10xf32>
    %764 = arith.cmpf ogt, %640, %763 : vector<10x10xf32>
    %cst_249 = arith.constant -1.000000e+30 : f32
    %765 = vector.broadcast %cst_249 : f32 to vector<10x10xf32>
    %766 = arith.select %764, %762, %765 : vector<10x10xi1>, vector<10x10xf32>
    %cst_250 = arith.constant dense<0xFF800000> : vector<10xf32>
    %767 = vector.multi_reduction <maximumf>, %766, %cst_250 [1] : vector<10x10xf32> to vector<10xf32>
    %768 = vector.shape_cast %767 : vector<10xf32> to vector<10x1xf32>
    %cst_251 = arith.constant 0.000000e+00 : f32
    %769 = vector.broadcast %cst_251 : f32 to vector<10x10xf32>
    %770 = arith.cmpf ogt, %640, %769 : vector<10x10xf32>
    %771 = vector.broadcast %768 : vector<10x1xf32> to vector<10x10xf32>
    %772 = arith.subf %766, %771 : vector<10x10xf32>
    %773 = math.exp %772 : vector<10x10xf32>
    %cst_252 = arith.constant 0.000000e+00 : f32
    %774 = vector.broadcast %cst_252 : f32 to vector<10x10xf32>
    %775 = arith.select %770, %773, %774 : vector<10x10xi1>, vector<10x10xf32>
    %cst_253 = arith.constant dense<0.000000e+00> : vector<10xf32>
    %776 = vector.multi_reduction <add>, %775, %cst_253 [1] : vector<10x10xf32> to vector<10xf32>
    %777 = vector.shape_cast %776 : vector<10xf32> to vector<10x1xf32>
    %cst_254 = arith.constant 9.99999968E-21 : f32
    %778 = vector.broadcast %cst_254 : f32 to vector<10x1xf32>
    %779 = arith.maximumf %777, %778 : vector<10x1xf32>
    %780 = vector.broadcast %779 : vector<10x1xf32> to vector<10x10xf32>
    %781 = arith.divf %775, %780 : vector<10x10xf32>
    %782 = vector.extract_strided_slice %648 {offsets = [0, 4], sizes = [10, 1], strides = [1, 1]} : vector<10x8xf32> to vector<10x1xf32>
    %783 = vector.extract_strided_slice %649 {offsets = [4, 0], sizes = [1, 10], strides = [1, 1]} : vector<8x10xf32> to vector<1x10xf32>
    %784 = vector.broadcast %782 : vector<10x1xf32> to vector<10x10xf32>
    %785 = vector.broadcast %783 : vector<1x10xf32> to vector<10x10xf32>
    %786 = arith.addf %784, %785 : vector<10x10xf32>
    %c2_255 = arith.constant 2 : index
    %c4_256 = arith.constant 4 : index
    %787 = memref.load %arg0[%c2_255, %c4_256] : memref<3x8xf32, #tpu.memory_space<smem>>
    %788 = vector.broadcast %787 : f32 to vector<10x10xf32>
    %789 = arith.mulf %641, %788 : vector<10x10xf32>
    %790 = arith.addf %786, %789 : vector<10x10xf32>
    %cst_257 = arith.constant 0.000000e+00 : f32
    %791 = vector.broadcast %cst_257 : f32 to vector<10x10xf32>
    %792 = arith.cmpf ogt, %790, %791 : vector<10x10xf32>
    %cst_258 = arith.constant 2.000000e-01 : f32
    %793 = vector.broadcast %cst_258 : f32 to vector<10x10xf32>
    %794 = arith.mulf %793, %790 : vector<10x10xf32>
    %795 = arith.select %792, %790, %794 : vector<10x10xi1>, vector<10x10xf32>
    %cst_259 = arith.constant 0.000000e+00 : f32
    %796 = vector.broadcast %cst_259 : f32 to vector<10x10xf32>
    %797 = arith.cmpf ogt, %640, %796 : vector<10x10xf32>
    %cst_260 = arith.constant -1.000000e+30 : f32
    %798 = vector.broadcast %cst_260 : f32 to vector<10x10xf32>
    %799 = arith.select %797, %795, %798 : vector<10x10xi1>, vector<10x10xf32>
    %cst_261 = arith.constant dense<0xFF800000> : vector<10xf32>
    %800 = vector.multi_reduction <maximumf>, %799, %cst_261 [1] : vector<10x10xf32> to vector<10xf32>
    %801 = vector.shape_cast %800 : vector<10xf32> to vector<10x1xf32>
    %cst_262 = arith.constant 0.000000e+00 : f32
    %802 = vector.broadcast %cst_262 : f32 to vector<10x10xf32>
    %803 = arith.cmpf ogt, %640, %802 : vector<10x10xf32>
    %804 = vector.broadcast %801 : vector<10x1xf32> to vector<10x10xf32>
    %805 = arith.subf %799, %804 : vector<10x10xf32>
    %806 = math.exp %805 : vector<10x10xf32>
    %cst_263 = arith.constant 0.000000e+00 : f32
    %807 = vector.broadcast %cst_263 : f32 to vector<10x10xf32>
    %808 = arith.select %803, %806, %807 : vector<10x10xi1>, vector<10x10xf32>
    %cst_264 = arith.constant dense<0.000000e+00> : vector<10xf32>
    %809 = vector.multi_reduction <add>, %808, %cst_264 [1] : vector<10x10xf32> to vector<10xf32>
    %810 = vector.shape_cast %809 : vector<10xf32> to vector<10x1xf32>
    %cst_265 = arith.constant 9.99999968E-21 : f32
    %811 = vector.broadcast %cst_265 : f32 to vector<10x1xf32>
    %812 = arith.maximumf %810, %811 : vector<10x1xf32>
    %813 = vector.broadcast %812 : vector<10x1xf32> to vector<10x10xf32>
    %814 = arith.divf %808, %813 : vector<10x10xf32>
    %815 = vector.extract_strided_slice %648 {offsets = [0, 5], sizes = [10, 1], strides = [1, 1]} : vector<10x8xf32> to vector<10x1xf32>
    %816 = vector.extract_strided_slice %649 {offsets = [5, 0], sizes = [1, 10], strides = [1, 1]} : vector<8x10xf32> to vector<1x10xf32>
    %817 = vector.broadcast %815 : vector<10x1xf32> to vector<10x10xf32>
    %818 = vector.broadcast %816 : vector<1x10xf32> to vector<10x10xf32>
    %819 = arith.addf %817, %818 : vector<10x10xf32>
    %c2_266 = arith.constant 2 : index
    %c5_267 = arith.constant 5 : index
    %820 = memref.load %arg0[%c2_266, %c5_267] : memref<3x8xf32, #tpu.memory_space<smem>>
    %821 = vector.broadcast %820 : f32 to vector<10x10xf32>
    %822 = arith.mulf %641, %821 : vector<10x10xf32>
    %823 = arith.addf %819, %822 : vector<10x10xf32>
    %cst_268 = arith.constant 0.000000e+00 : f32
    %824 = vector.broadcast %cst_268 : f32 to vector<10x10xf32>
    %825 = arith.cmpf ogt, %823, %824 : vector<10x10xf32>
    %cst_269 = arith.constant 2.000000e-01 : f32
    %826 = vector.broadcast %cst_269 : f32 to vector<10x10xf32>
    %827 = arith.mulf %826, %823 : vector<10x10xf32>
    %828 = arith.select %825, %823, %827 : vector<10x10xi1>, vector<10x10xf32>
    %cst_270 = arith.constant 0.000000e+00 : f32
    %829 = vector.broadcast %cst_270 : f32 to vector<10x10xf32>
    %830 = arith.cmpf ogt, %640, %829 : vector<10x10xf32>
    %cst_271 = arith.constant -1.000000e+30 : f32
    %831 = vector.broadcast %cst_271 : f32 to vector<10x10xf32>
    %832 = arith.select %830, %828, %831 : vector<10x10xi1>, vector<10x10xf32>
    %cst_272 = arith.constant dense<0xFF800000> : vector<10xf32>
    %833 = vector.multi_reduction <maximumf>, %832, %cst_272 [1] : vector<10x10xf32> to vector<10xf32>
    %834 = vector.shape_cast %833 : vector<10xf32> to vector<10x1xf32>
    %cst_273 = arith.constant 0.000000e+00 : f32
    %835 = vector.broadcast %cst_273 : f32 to vector<10x10xf32>
    %836 = arith.cmpf ogt, %640, %835 : vector<10x10xf32>
    %837 = vector.broadcast %834 : vector<10x1xf32> to vector<10x10xf32>
    %838 = arith.subf %832, %837 : vector<10x10xf32>
    %839 = math.exp %838 : vector<10x10xf32>
    %cst_274 = arith.constant 0.000000e+00 : f32
    %840 = vector.broadcast %cst_274 : f32 to vector<10x10xf32>
    %841 = arith.select %836, %839, %840 : vector<10x10xi1>, vector<10x10xf32>
    %cst_275 = arith.constant dense<0.000000e+00> : vector<10xf32>
    %842 = vector.multi_reduction <add>, %841, %cst_275 [1] : vector<10x10xf32> to vector<10xf32>
    %843 = vector.shape_cast %842 : vector<10xf32> to vector<10x1xf32>
    %cst_276 = arith.constant 9.99999968E-21 : f32
    %844 = vector.broadcast %cst_276 : f32 to vector<10x1xf32>
    %845 = arith.maximumf %843, %844 : vector<10x1xf32>
    %846 = vector.broadcast %845 : vector<10x1xf32> to vector<10x10xf32>
    %847 = arith.divf %841, %846 : vector<10x10xf32>
    %848 = vector.extract_strided_slice %648 {offsets = [0, 6], sizes = [10, 1], strides = [1, 1]} : vector<10x8xf32> to vector<10x1xf32>
    %849 = vector.extract_strided_slice %649 {offsets = [6, 0], sizes = [1, 10], strides = [1, 1]} : vector<8x10xf32> to vector<1x10xf32>
    %850 = vector.broadcast %848 : vector<10x1xf32> to vector<10x10xf32>
    %851 = vector.broadcast %849 : vector<1x10xf32> to vector<10x10xf32>
    %852 = arith.addf %850, %851 : vector<10x10xf32>
    %c2_277 = arith.constant 2 : index
    %c6_278 = arith.constant 6 : index
    %853 = memref.load %arg0[%c2_277, %c6_278] : memref<3x8xf32, #tpu.memory_space<smem>>
    %854 = vector.broadcast %853 : f32 to vector<10x10xf32>
    %855 = arith.mulf %641, %854 : vector<10x10xf32>
    %856 = arith.addf %852, %855 : vector<10x10xf32>
    %cst_279 = arith.constant 0.000000e+00 : f32
    %857 = vector.broadcast %cst_279 : f32 to vector<10x10xf32>
    %858 = arith.cmpf ogt, %856, %857 : vector<10x10xf32>
    %cst_280 = arith.constant 2.000000e-01 : f32
    %859 = vector.broadcast %cst_280 : f32 to vector<10x10xf32>
    %860 = arith.mulf %859, %856 : vector<10x10xf32>
    %861 = arith.select %858, %856, %860 : vector<10x10xi1>, vector<10x10xf32>
    %cst_281 = arith.constant 0.000000e+00 : f32
    %862 = vector.broadcast %cst_281 : f32 to vector<10x10xf32>
    %863 = arith.cmpf ogt, %640, %862 : vector<10x10xf32>
    %cst_282 = arith.constant -1.000000e+30 : f32
    %864 = vector.broadcast %cst_282 : f32 to vector<10x10xf32>
    %865 = arith.select %863, %861, %864 : vector<10x10xi1>, vector<10x10xf32>
    %cst_283 = arith.constant dense<0xFF800000> : vector<10xf32>
    %866 = vector.multi_reduction <maximumf>, %865, %cst_283 [1] : vector<10x10xf32> to vector<10xf32>
    %867 = vector.shape_cast %866 : vector<10xf32> to vector<10x1xf32>
    %cst_284 = arith.constant 0.000000e+00 : f32
    %868 = vector.broadcast %cst_284 : f32 to vector<10x10xf32>
    %869 = arith.cmpf ogt, %640, %868 : vector<10x10xf32>
    %870 = vector.broadcast %867 : vector<10x1xf32> to vector<10x10xf32>
    %871 = arith.subf %865, %870 : vector<10x10xf32>
    %872 = math.exp %871 : vector<10x10xf32>
    %cst_285 = arith.constant 0.000000e+00 : f32
    %873 = vector.broadcast %cst_285 : f32 to vector<10x10xf32>
    %874 = arith.select %869, %872, %873 : vector<10x10xi1>, vector<10x10xf32>
    %cst_286 = arith.constant dense<0.000000e+00> : vector<10xf32>
    %875 = vector.multi_reduction <add>, %874, %cst_286 [1] : vector<10x10xf32> to vector<10xf32>
    %876 = vector.shape_cast %875 : vector<10xf32> to vector<10x1xf32>
    %cst_287 = arith.constant 9.99999968E-21 : f32
    %877 = vector.broadcast %cst_287 : f32 to vector<10x1xf32>
    %878 = arith.maximumf %876, %877 : vector<10x1xf32>
    %879 = vector.broadcast %878 : vector<10x1xf32> to vector<10x10xf32>
    %880 = arith.divf %874, %879 : vector<10x10xf32>
    %881 = vector.extract_strided_slice %648 {offsets = [0, 7], sizes = [10, 1], strides = [1, 1]} : vector<10x8xf32> to vector<10x1xf32>
    %882 = vector.extract_strided_slice %649 {offsets = [7, 0], sizes = [1, 10], strides = [1, 1]} : vector<8x10xf32> to vector<1x10xf32>
    %883 = vector.broadcast %881 : vector<10x1xf32> to vector<10x10xf32>
    %884 = vector.broadcast %882 : vector<1x10xf32> to vector<10x10xf32>
    %885 = arith.addf %883, %884 : vector<10x10xf32>
    %c2_288 = arith.constant 2 : index
    %c7_289 = arith.constant 7 : index
    %886 = memref.load %arg0[%c2_288, %c7_289] : memref<3x8xf32, #tpu.memory_space<smem>>
    %887 = vector.broadcast %886 : f32 to vector<10x10xf32>
    %888 = arith.mulf %641, %887 : vector<10x10xf32>
    %889 = arith.addf %885, %888 : vector<10x10xf32>
    %cst_290 = arith.constant 0.000000e+00 : f32
    %890 = vector.broadcast %cst_290 : f32 to vector<10x10xf32>
    %891 = arith.cmpf ogt, %889, %890 : vector<10x10xf32>
    %cst_291 = arith.constant 2.000000e-01 : f32
    %892 = vector.broadcast %cst_291 : f32 to vector<10x10xf32>
    %893 = arith.mulf %892, %889 : vector<10x10xf32>
    %894 = arith.select %891, %889, %893 : vector<10x10xi1>, vector<10x10xf32>
    %cst_292 = arith.constant 0.000000e+00 : f32
    %895 = vector.broadcast %cst_292 : f32 to vector<10x10xf32>
    %896 = arith.cmpf ogt, %640, %895 : vector<10x10xf32>
    %cst_293 = arith.constant -1.000000e+30 : f32
    %897 = vector.broadcast %cst_293 : f32 to vector<10x10xf32>
    %898 = arith.select %896, %894, %897 : vector<10x10xi1>, vector<10x10xf32>
    %cst_294 = arith.constant dense<0xFF800000> : vector<10xf32>
    %899 = vector.multi_reduction <maximumf>, %898, %cst_294 [1] : vector<10x10xf32> to vector<10xf32>
    %900 = vector.shape_cast %899 : vector<10xf32> to vector<10x1xf32>
    %cst_295 = arith.constant 0.000000e+00 : f32
    %901 = vector.broadcast %cst_295 : f32 to vector<10x10xf32>
    %902 = arith.cmpf ogt, %640, %901 : vector<10x10xf32>
    %903 = vector.broadcast %900 : vector<10x1xf32> to vector<10x10xf32>
    %904 = arith.subf %898, %903 : vector<10x10xf32>
    %905 = math.exp %904 : vector<10x10xf32>
    %cst_296 = arith.constant 0.000000e+00 : f32
    %906 = vector.broadcast %cst_296 : f32 to vector<10x10xf32>
    %907 = arith.select %902, %905, %906 : vector<10x10xi1>, vector<10x10xf32>
    %cst_297 = arith.constant dense<0.000000e+00> : vector<10xf32>
    %908 = vector.multi_reduction <add>, %907, %cst_297 [1] : vector<10x10xf32> to vector<10xf32>
    %909 = vector.shape_cast %908 : vector<10xf32> to vector<10x1xf32>
    %cst_298 = arith.constant 9.99999968E-21 : f32
    %910 = vector.broadcast %cst_298 : f32 to vector<10x1xf32>
    %911 = arith.maximumf %909, %910 : vector<10x1xf32>
    %912 = vector.broadcast %911 : vector<10x1xf32> to vector<10x10xf32>
    %913 = arith.divf %907, %912 : vector<10x10xf32>
    %914 = tpu.concatenate %682, %715, %748, %781, %814, %847, %880, %913 in 0 : vector<10x10xf32>, vector<10x10xf32>, vector<10x10xf32>, vector<10x10xf32>, vector<10x10xf32>, vector<10x10xf32>, vector<10x10xf32>, vector<10x10xf32> -> vector<80x10xf32>
    %cst_299 = arith.constant dense<0.000000e+00> : vector<80x64xf32>
    %915 = tpu.matmul %914, %645, %cst_299 {dimension_numbers = #tpu.dot_dimension_numbers<[1], [0], [0], [1], [0, 0, 1, 1], [], []>} : vector<80x10xf32>, vector<10x64xf32>, vector<80x64xf32> -> vector<80x64xf32>
    %916 = vector.extract_strided_slice %915 {offsets = [0, 0], sizes = [10, 64], strides = [1, 1]} : vector<80x64xf32> to vector<10x64xf32>
    %917 = vector.extract_strided_slice %0 {offsets = [0, 0], sizes = [1, 64], strides = [1, 1]} : vector<8x64xf32> to vector<1x64xf32>
    %918 = vector.broadcast %917 : vector<1x64xf32> to vector<10x64xf32>
    %919 = arith.mulf %916, %918 : vector<10x64xf32>
    %920 = vector.broadcast %644 : vector<1x64xf32> to vector<10x64xf32>
    %921 = arith.addf %920, %919 : vector<10x64xf32>
    %922 = vector.extract_strided_slice %915 {offsets = [10, 0], sizes = [10, 64], strides = [1, 1]} : vector<80x64xf32> to vector<10x64xf32>
    %923 = vector.extract_strided_slice %0 {offsets = [1, 0], sizes = [1, 64], strides = [1, 1]} : vector<8x64xf32> to vector<1x64xf32>
    %924 = vector.broadcast %923 : vector<1x64xf32> to vector<10x64xf32>
    %925 = arith.mulf %922, %924 : vector<10x64xf32>
    %926 = arith.addf %921, %925 : vector<10x64xf32>
    %927 = vector.extract_strided_slice %915 {offsets = [20, 0], sizes = [10, 64], strides = [1, 1]} : vector<80x64xf32> to vector<10x64xf32>
    %928 = vector.extract_strided_slice %0 {offsets = [2, 0], sizes = [1, 64], strides = [1, 1]} : vector<8x64xf32> to vector<1x64xf32>
    %929 = vector.broadcast %928 : vector<1x64xf32> to vector<10x64xf32>
    %930 = arith.mulf %927, %929 : vector<10x64xf32>
    %931 = arith.addf %926, %930 : vector<10x64xf32>
    %932 = vector.extract_strided_slice %915 {offsets = [30, 0], sizes = [10, 64], strides = [1, 1]} : vector<80x64xf32> to vector<10x64xf32>
    %933 = vector.extract_strided_slice %0 {offsets = [3, 0], sizes = [1, 64], strides = [1, 1]} : vector<8x64xf32> to vector<1x64xf32>
    %934 = vector.broadcast %933 : vector<1x64xf32> to vector<10x64xf32>
    %935 = arith.mulf %932, %934 : vector<10x64xf32>
    %936 = arith.addf %931, %935 : vector<10x64xf32>
    %937 = vector.extract_strided_slice %915 {offsets = [40, 0], sizes = [10, 64], strides = [1, 1]} : vector<80x64xf32> to vector<10x64xf32>
    %938 = vector.extract_strided_slice %0 {offsets = [4, 0], sizes = [1, 64], strides = [1, 1]} : vector<8x64xf32> to vector<1x64xf32>
    %939 = vector.broadcast %938 : vector<1x64xf32> to vector<10x64xf32>
    %940 = arith.mulf %937, %939 : vector<10x64xf32>
    %941 = arith.addf %936, %940 : vector<10x64xf32>
    %942 = vector.extract_strided_slice %915 {offsets = [50, 0], sizes = [10, 64], strides = [1, 1]} : vector<80x64xf32> to vector<10x64xf32>
    %943 = vector.extract_strided_slice %0 {offsets = [5, 0], sizes = [1, 64], strides = [1, 1]} : vector<8x64xf32> to vector<1x64xf32>
    %944 = vector.broadcast %943 : vector<1x64xf32> to vector<10x64xf32>
    %945 = arith.mulf %942, %944 : vector<10x64xf32>
    %946 = arith.addf %941, %945 : vector<10x64xf32>
    %947 = vector.extract_strided_slice %915 {offsets = [60, 0], sizes = [10, 64], strides = [1, 1]} : vector<80x64xf32> to vector<10x64xf32>
    %948 = vector.extract_strided_slice %0 {offsets = [6, 0], sizes = [1, 64], strides = [1, 1]} : vector<8x64xf32> to vector<1x64xf32>
    %949 = vector.broadcast %948 : vector<1x64xf32> to vector<10x64xf32>
    %950 = arith.mulf %947, %949 : vector<10x64xf32>
    %951 = arith.addf %946, %950 : vector<10x64xf32>
    %952 = vector.extract_strided_slice %915 {offsets = [70, 0], sizes = [10, 64], strides = [1, 1]} : vector<80x64xf32> to vector<10x64xf32>
    %953 = vector.extract_strided_slice %0 {offsets = [7, 0], sizes = [1, 64], strides = [1, 1]} : vector<8x64xf32> to vector<1x64xf32>
    %954 = vector.broadcast %953 : vector<1x64xf32> to vector<10x64xf32>
    %955 = arith.mulf %952, %954 : vector<10x64xf32>
    %956 = arith.addf %951, %955 : vector<10x64xf32>
    %cst_300 = arith.constant 0.000000e+00 : f32
    %957 = vector.broadcast %cst_300 : f32 to vector<10x64xf32>
    %958 = arith.maximumf %956, %957 : vector<10x64xf32>
    %c0_301 = arith.constant 0 : index
    %c0_302 = arith.constant 0 : index
    %959 = vector.load %arg6[%c0_301, %c0_302] : memref<2x10xf32, #tpu.memory_space<vmem>>, vector<2x10xf32>
    %cst_303 = arith.constant dense<0.000000e+00> : vector<2x64xf32>
    %960 = tpu.matmul %959, %958, %cst_303 {dimension_numbers = #tpu.dot_dimension_numbers<[1], [0], [0], [1], [0, 0, 1, 1], [], []>} : vector<2x10xf32>, vector<10x64xf32>, vector<2x64xf32> -> vector<2x64xf32>
    %c0_304 = arith.constant 0 : index
    %c0_305 = arith.constant 0 : index
    %961 = vector.load %arg17[%c0_304, %c0_305] : memref<64x32xf32, #tpu.memory_space<vmem>>, vector<64x32xf32>
    %cst_306 = arith.constant dense<0.000000e+00> : vector<2x32xf32>
    %962 = tpu.matmul %960, %961, %cst_306 {dimension_numbers = #tpu.dot_dimension_numbers<[1], [0], [0], [1], [0, 0, 1, 1], [], []>} : vector<2x64xf32>, vector<64x32xf32>, vector<2x32xf32> -> vector<2x32xf32>
    %c0_307 = arith.constant 0 : index
    %c0_308 = arith.constant 0 : index
    %963 = vector.load %arg18[%c0_307, %c0_308] : memref<1x32xf32, #tpu.memory_space<vmem>>, vector<1x32xf32>
    %964 = vector.broadcast %963 : vector<1x32xf32> to vector<2x32xf32>
    %965 = arith.addf %962, %964 : vector<2x32xf32>
    %cst_309 = arith.constant 0.000000e+00 : f32
    %966 = vector.broadcast %cst_309 : f32 to vector<2x32xf32>
    %967 = arith.maximumf %965, %966 : vector<2x32xf32>
    %c0_310 = arith.constant 0 : index
    %c0_311 = arith.constant 0 : index
    %968 = vector.load %arg19[%c0_310, %c0_311] : memref<32x1xf32, #tpu.memory_space<vmem>>, vector<32x1xf32>
    %cst_312 = arith.constant dense<0.000000e+00> : vector<2x1xf32>
    %969 = tpu.matmul %967, %968, %cst_312 {dimension_numbers = #tpu.dot_dimension_numbers<[1], [0], [0], [1], [0, 0, 1, 1], [], []>} : vector<2x32xf32>, vector<32x1xf32>, vector<2x1xf32> -> vector<2x1xf32>
    %c0_313 = arith.constant 0 : index
    %c0_314 = arith.constant 0 : index
    %970 = vector.load %arg20[%c0_313, %c0_314] : memref<1x1xf32, #tpu.memory_space<vmem>>, vector<1x1xf32>
    %971 = vector.broadcast %970 : vector<1x1xf32> to vector<2x1xf32>
    %972 = arith.addf %969, %971 : vector<2x1xf32>
    %c0_315 = arith.constant 0 : index
    %c0_316 = arith.constant 0 : index
    %973 = vector.load %arg21[%c0_315, %c0_316] : memref<2x1xf32, #tpu.memory_space<vmem>>, vector<2x1xf32>
    tpu.vector_store %arg21[%c0_315, %c0_316], %972 {strides = array<i32>} : memref<2x1xf32, #tpu.memory_space<vmem>>, vector<2x1xf32>,
    return
  }
}

</mosaic_0001>

<bundles_post_ra>
// kernel: tpu_custom_call.1
= control target key start
LH: loop header
LB: loop body
LE: loop exit
PB: predicated region body
PF: predicated region fallthrough
CT: control target
= control target key end

     0   :  { %s5426_s0 = inlined_call_operand.vmem [shape: f32[3,8], index: 0, kind: input, shape index: {}]   ;;  %s5427_s1 = inlined_call_operand.vmem [shape: f32[10,7], index: 1, kind: input, shape index: {}]   ;;  %s5428_s2 = inlined_call_operand.vmem [shape: f32[10,10], index: 2, kind: input, shape index: {}]   ;;  %s5429_s3 = inlined_call_operand.vmem [shape: f32[10,10], index: 3, kind: input, shape index: {}]   ;;  %s5430_s4 = inlined_call_operand.vmem [shape: f32[10,10], index: 4, kind: input, shape index: {}]   ;;  %s5431_s5 = inlined_call_operand.vmem [shape: f32[10,10], index: 5, kind: input, shape index: {}]   ;;  %s5432_s6 = inlined_call_operand.vmem [shape: f32[2,10], index: 6, kind: input, shape index: {}]   ;;  %s5433_s7 = inlined_call_operand.vmem [shape: f32[8,64], index: 7, kind: input, shape index: {}]   ;;  %s5434_s8 = inlined_call_operand.vmem [shape: f32[7,64], index: 8, kind: input, shape index: {}]   ;;  %s5435_s9 = inlined_call_operand.vmem [shape: f32[64,16], index: 9, kind: input, shape index: {}]   ;;  %s5436_s10 = inlined_call_operand.vmem [shape: f32[1,64], index: 10, kind: input, shape index: {}]   ;;  %s5437_s11 = inlined_call_operand.vmem [shape: f32[64,64], index: 11, kind: input, shape index: {}]   ;;  %s5438_s12 = inlined_call_operand.vmem [shape: f32[64,16], index: 12, kind: input, shape index: {}]   ;;  %s5439_s13 = inlined_call_operand.vmem [shape: f32[1,64], index: 13, kind: input, shape index: {}]   ;;  %s5440_s14 = inlined_call_operand.vmem [shape: f32[64,64], index: 14, kind: input, shape index: {}]   ;;  %s5441_s15 = inlined_call_operand.vmem [shape: f32[64,16], index: 15, kind: input, shape index: {}]   ;;  %s5442_s16 = inlined_call_operand.vmem [shape: f32[1,64], index: 16, kind: input, shape index: {}]   ;;  %s5443_s17 = inlined_call_operand.vmem [shape: f32[64,32], index: 17, kind: input, shape index: {}]   ;;  %s5444_s18 = inlined_call_operand.vmem [shape: f32[1,32], index: 18, kind: input, shape index: {}]   ;;  %s5445_s19 = inlined_call_operand.vmem [shape: f32[32,1], index: 19, kind: input, shape index: {}]   ;;  %s5446_s20 = inlined_call_operand.<no memory space> [shape: f32[1,1], index: 20, kind: input, shape index: {}]   ;;  %s5447_s21 = inlined_call_operand.vmem [shape: f32[2,1], index: 21, kind: output, shape index: {}]  }
   0x1   :  { %5465 = sst [smem:[#allocation6_spill]] %s5426_s0  ;;  %v26_v0 = vstv %s5446_s20 }
   0x2   :  { %5466 = sst [smem:[#allocation7_spill]] %s5427_s1  ;;  %27 = vst [vmem:[#allocation2] sm:$0x1] %v26_v0 }
   0x3   :  { %5467 = sst [smem:[#allocation8_spill]] %s5428_s2 }
   0x4   :  { %5468 = sst [smem:[#allocation9_spill]] %s5429_s3 }
   0x5   :  { %5469 = sst [smem:[#allocation10_spill]] %s5430_s4 }
   0x6   :  { %5470 = sst [smem:[#allocation11_spill]] %s5431_s5 }
   0x7   :  { %28 = vsyncpa [#allocation4], 0  ;;  %s5471_s3 = sld [smem:[#allocation6_spill]] }
   0xd   :  { %s35_s28 = sshll.u32 %s5471_s3, 4  ;;  %s36_s28 = int_to_ptr.vmem [resolvable:$true] %s35_s28 }
   0xe   :  { %s3778_s29 = scalar_lea.vmem %s36_s28, 64  ;;  %p3783_p1 = scmp.lt.s32.totalorder %s36_s28, %s36_s28 }
   0xf   :  { %p3779_p0 = scmp.ne.s32.totalorder %s36_s28, %s3778_s29  ;;  %p3784_p2 = scmp.lt.s32.totalorder %s3778_s29, %s3778_s29 }
  0x11   :  { %p3785_p3 = por %p3784_p2, %p3783_p1 }
  0x13   :  { %p3786_p4 = pnand %p3785_p3, %p3779_p0 }
  0x15   :  { %3789 = shalt.err (!%p3786_p4)
}
  0x16   :  { %s3792_s0 = smov [#allocation3]  }
  0x17   :  { %38 = dma.vmem_to_smem %s36_s28, 64, %s3792_s0, [#allocation4]  }
  0x18   :  { %3790 = dma.done.wait [#allocation4], 64  }
  0x19   :  { %3791 = vsyncadd [#allocation4], 4294967232 }
  0x1a   :  { %82 = sfence }
  0x1b   :  { %v90_v1 = vld [vmem:[%s5434_s8] sm:$0x7f]  ;;  %vm107_vm0 = vcmask 1046528   ;;  %s5472_s22 = sld [smem:[#allocation7_spill]]  ;;  %vm100_vm1 = vcmask 56320   ;;  %v98_v3 = vld [vmem:[%s5435_s9 + $0x38] sm:$0xff]  ;;  %v310_v32 = vlaneseq }
  0x1c   :  { %3330 = vmatprep.subr.msk.mxu0 %vm107_vm0, %v90_v1  ;;  %v97_v5 = vld [vmem:[%s5435_s9 + $0x30] sm:$0xff]  ;;  %3335 = vmatprep.subr.mxu1 %v98_v3  ;;  %v96_v6 = vld [vmem:[%s5435_s9 + $0x28] sm:$0xff]  ;;  %v95_v7 = vld [vmem:[%s5435_s9 + $0x20] sm:$0xff]  ;;  %v5460_v12 = vmov 10   ;;  %v5462_v13 = vmov 8   ;;  %vm740_vm2 = vcmask 1041408  }
  0x1d   :  { %3331 = vmatpush3.msk.msra.mxu0 %vm107_vm0, %v90_v1  ;;  %3336 = vmatpush3.msra.mxu1 %v98_v3  ;;  %v94_v8 = vld [vmem:[%s5435_s9 + $0x18] sm:$0xff]  ;;  %v93_v9 = vld [vmem:[%s5435_s9 + $0x10] sm:$0xff]  ;;  %v92_v10 = vld [vmem:[%s5435_s9 + $0x8] sm:$0xff]  ;;  %vm186_vm3 = vcmask 523264   ;;  %v5463_v18 = vmov 9   ;;  %v5458_v19 = vmov 11  }
  0x1e   :  { %3337 = vmatprep.subr.mxu1 %v97_v5  ;;  %v91_v11 = vld [vmem:[%s5435_s9] sm:$0xff]  ;;  %3537 = vset.pattern.permute.xlu0 %v5460_v12  ;;  %v5456_v20 = vmov 13   ;;  %v5453_v21 = vmov 12   ;;  %v5454_v22 = vmov 14   ;;  %v3800_v23 = vmov 15   ;;  %s3982_s9 = sld [smem:[#allocation3 + $0x2]] }
  0x1f   :  { %3338 = vmatpush3.msra.mxu1 %v97_v5  ;;  %3535 = vset.pattern.permute.xlu1 %v5462_v13  ;;  %s316_s1 = sld [smem:[#allocation3]]  ;;  %v3988_v35 = vshrl.u32 %v310_v32, 7  ;;  %vm332_vm5 = vcmask 80896   ;;  %vm336_vm7 = vcmask 74752  }
  0x20   :  { %3339 = vmatprep.subr.mxu1 %v96_v6  ;;  %s3984_s24 = sld [smem:[#allocation3 + $0x7]] }
  0x21   :  { %v84_v2 = vld [vmem:[%s5472_s22] sm:$0xff]  ;;  %v85_v4 = vld [vmem:[%s5472_s22 + $0x8] sm:$0x3]  ;;  %3340 = vmatpush3.msra.mxu1 %v96_v6  ;;  %s3151_s2 = sld [smem:[#allocation3 + $0x1]]  ;;  %v3996_v37 = vsub.s32 2, %v3988_v35  ;;  %v4012_v42 = vsub.s32 0, %v3988_v35 }
  0x22   :  { %3332 = vmatprep.mubr.msk.f32.mxu0 %vm100_vm1, %v84_v2  ;;  %3341 = vmatprep.subr.mxu1 %v95_v7  ;;  %s5473_s8 = sld [smem:[#allocation8_spill]]  ;;  %v4017_v45 = vsub.s32 7, %v3988_v35  ;;  %v4021_v47 = vsub.s32 1, %v3988_v35  ;;  %v4052_v62 = vsub.s32 3, %v3988_v35  ;;  %v4055_v63 = vsub.s32 5, %v3988_v35 }
  0x23   :  { %3333 = vmatmul.mubr.msk.f32.vlgmr.msra.gmra.mxu0 %vm100_vm1, %v85_v4  ;;  %3342 = vmatpush3.msra.mxu1 %v95_v7  ;;  %s5474_s28 = sld [smem:[#allocation9_spill]] }
  0x24   :  { %3343 = vmatprep.subr.mxu1 %v94_v8  ;;  %v429_v40 = vstv %s3982_s9  ;;  %s4014_s20 = sld [smem:[#allocation3 + $0x3]] }
  0x25   :  { %3344 = vmatpush3.msra.mxu1 %v94_v8  ;;  %v317_v43 = vstv %s316_s1  ;;  %s4059_s5 = sld [smem:[#allocation3 + $0x5]] }
  0x26   :  { %3345 = vmatprep.subr.mxu1 %v93_v9  ;;  %v699_v46 = vstv %s3984_s24  ;;  %s4065_s22 = sld [smem:[#allocation3 + $0x4]] }
  0x27   :  { %3346 = vmatpush3.msra.mxu1 %v93_v9  ;;  %v375_v48 = vstv %s3151_s2  ;;  %s4098_s23 = sld [smem:[#allocation3 + $0x6]] }
  0x28   :  { %3347 = vmatprep.subr.mxu1 %v92_v10  ;;  %v3993_v36 = vld [vmem:[%s5473_s8] sm:$0xff]  ;;  %v4028_v50 = vld [vmem:[%s5473_s8 + $0x8] sm:$0x3]  ;;  %s5475_s24 = sld [smem:[#allocation11_spill]] }
  0x29   :  { %3348 = vmatpush3.msra.mxu1 %v92_v10  ;;  %v4003_v39 = vld [vmem:[%s5474_s28] sm:$0xff]  ;;  %v4009_v41 = vld [vmem:[%s5474_s28 + $0x8] sm:$0x3]  ;;  %vm328_vm4 = vcmp.gt.f32.partialorder %v3993_v36, 0.0  ;;  %vm329_vm6 = vcmp.gt.f32.partialorder %v4028_v50, 0.0  ;;  %s4509_s2 = sld [smem:[#allocation3 + $0x83]] }
  0x2a   :  { %3349 = vmatprep.subr.mxu1 %v91_v11  ;;  %v430_v49 = vmul.f32 %v429_v40, %v4003_v39  ;;  %v319_v51 = vmul.f32 %v317_v43, %v4009_v41  ;;  %v701_v53 = vmul.f32 %v699_v46, %v4009_v41  ;;  %v377_v54 = vmul.f32 %v375_v48, %v4009_v41  ;;  %s4554_s29 = sld [smem:[#allocation3 + $0x85]] }
  0x2b   :  { %3350 = vmatpush3.msra.mxu1 %v91_v11  ;;  %v376_v55 = vmul.f32 %v375_v48, %v4003_v39  ;;  %v318_v56 = vmul.f32 %v317_v43, %v4003_v39  ;;  %v431_v61 = vmul.f32 %v429_v40, %v4009_v41  ;;  %v483_v7 = vstv %s4014_s20  ;;  %s4590_s0 = sld [smem:[#allocation3 + $0x86]] }
  0x2c   :  { %s4956_s25 = sld [smem:[#allocation3 + $0x100]] }
  0x2d   :  { %s4958_s26 = sld [smem:[#allocation3 + $0x107]] }
  0x2e   :  { %s4960_s8 = sld [smem:[#allocation3 + $0x102]] }
  0x2f   :  { %s4962_s27 = sld [smem:[#allocation3 + $0x103]] }
  0x30   :  { %s4968_s3 = sld [smem:[#allocation3 + $0x104]] }
  0x31   :  { %s4972_s28 = sld [smem:[#allocation3 + $0x106]] }
  0xe3   :  { %v3334_v14 = vpop.f32.mrf.mxu0 }
  0xe4   :  { %3354 = vmatprep.subr.msk.mxu0 %vm740_vm2, %v3334_v14 }
  0xe5   :  { %v177_v15 = vpop.f32.mrf.mxu0  ;;  %3355 = vmatpush3.msk.msra.mxu0 %vm740_vm2, %v3334_v14 }
  0xe6   :  { %3351 = vmatprep.mubr.msk.f32.mxu1 %vm186_vm3, %v177_v15  ;;  %3356 = vmatprep.subr.mxu0 %v177_v15 }
  0xe7   :  { %3352 = vmatmul.mubr.msk.f32.vlgmr.msra.gmra.mxu1 %vm186_vm3, %v3334_v14  ;;  %3357 = vmatpush3.msra.mxu0 %v177_v15 }
 0x1a7   :  { %v3353_v16 = vpop.f32.mrf.mxu1 }
 0x1a8   :  { %419 = vperm.xlu0 %3537, %v3353_v16   ;;  %307 = vperm.xlu1 %3535, %v3353_v16  }
 0x1a9   :  { %v259_v17 = vpop.f32.mrf.mxu1 }
 0x1ac   :  { %3543 = vset.pattern.permute.xlu0 %v5463_v18  ;;  %3536 = vset.pattern.permute.xlu1 %v5463_v18 }
 0x1ad   :  { %365 = vperm.xlu1 %3536, %v3353_v16   ;;  %361 = vperm.xlu0 %3543, %v259_v17  }
 0x1b1   :  { %3538 = vset.pattern.permute.xlu1 %v5458_v19  ;;  %3544 = vset.pattern.permute.xlu0 %v5462_v13 }
 0x1b2   :  { %473 = vperm.xlu1 %3538, %v3353_v16   ;;  %302 = vperm.xlu0 %3544, %v259_v17  }
 0x1b6   :  { %3539 = vset.pattern.permute.xlu1 %v5456_v20  ;;  %3547 = vset.pattern.permute.xlu0 %v5453_v21 }
 0x1b7   :  { %581 = vperm.xlu1 %3539, %v3353_v16   ;;  %523 = vperm.xlu0 %3547, %v259_v17  }
 0x1bb   :  { %3540 = vset.pattern.permute.xlu1 %v5453_v21  ;;  %3549 = vset.pattern.permute.xlu0 %v5454_v22 }
 0x1bc   :  { %527 = vperm.xlu1 %3540, %v3353_v16   ;;  %631 = vperm.xlu0 %3549, %v259_v17  }
 0x1c0   :  { %3541 = vset.pattern.permute.xlu1 %v5454_v22  ;;  %3550 = vset.pattern.permute.xlu0 %v3800_v23 }
 0x1c1   :  { %635 = vperm.xlu1 %3541, %v3353_v16   ;;  %685 = vperm.xlu0 %3550, %v259_v17  }
 0x1c5   :  { %3542 = vset.pattern.permute.xlu1 %v3800_v23  ;;  %3556 = vset.pattern.permute.xlu0 %v5453_v21 }
 0x1c6   :  { %689 = vperm.xlu1 %3542, %v3353_v16  }
 0x1ca   :  { %3545 = vset.pattern.permute.xlu1 %v5460_v12 }
 0x1cb   :  { %415 = vperm.xlu1 %3545, %v259_v17  }
 0x1cf   :  { %3546 = vset.pattern.permute.xlu1 %v5458_v19 }
 0x1d0   :  { %469 = vperm.xlu1 %3546, %v259_v17  }
 0x1d4   :  { %3548 = vset.pattern.permute.xlu1 %v5456_v20 }
 0x1d5   :  { %577 = vperm.xlu1 %3548, %v259_v17  }
 0x1fe   :  { %268 = vxpose.xlu1.b32.start [1/2] (short) (narrow) %v259_v17, 8 }
 0x202   :  { %269 = vxpose.xlu1.b32.end [2/2] (short) (narrow) %v3353_v16, 8 }
 0x220   :  { %3551 = vset.pattern.permute.xlu1 %v5462_v13 }
 0x223   :  { %v308_v24 = vpop.permute.xlu1 %307  ;;  %v420_v34 = vpop.permute.xlu0 %419 }
 0x228   :  { %v366_v25 = vpop.permute.xlu1 %365  ;;  %v362_v44 = vpop.permute.xlu0 %361 }
 0x22d   :  { %v3974_v26 = vpop.permute.xlu1 %473  ;;  %v303_v0 = vpop.permute.xlu0 %302 }
 0x232   :  { %v3976_v27 = vpop.permute.xlu1 %581 }
 0x237   :  { %v3978_v28 = vpop.permute.xlu1 %527 }
 0x23c   :  { %v3980_v29 = vpop.permute.xlu1 %635 }
 0x241   :  { %v690_v30 = vpop.permute.xlu1 %689 }
 0x246   :  { %v416_v31 = vpop.permute.xlu1 %415 }
 0x24b   :  { %v3986_v33 = vpop.permute.xlu1 %469 }
 0x250   :  { %v3998_v38 = vpop.permute.xlu1 %577 }
 0x27a   :  { %v4031_v52 = vpop.trf.xlu1 }
 0x27b   :  { %v425_v57 = vrot.slane %v4031_v52, %v3996_v37  ;;  %v313_v58 = vrot.slane %v4031_v52, %v4012_v42  ;;  %v4045_v59 = vrot.slane %v4031_v52, %v4017_v45  ;;  %v371_v60 = vrot.slane %v4031_v52, %v4021_v47 }
 0x27c   :  { %v4063_v17 = vrot.slane %v4031_v52, %v4052_v62 }
 0x27d   :  { %v426_v1 = vadd.f32 %v425_v57, %v416_v31  ;;  %v315_v2 = vadd.f32 %v313_v58, %v308_v24  ;;  %v697_v3 = vadd.f32 %v4045_v59, %v690_v30  ;;  %v373_v4 = vadd.f32 %v371_v60, %v366_v25 }
 0x27e   :  { %v372_v5 = vadd.f32 %v371_v60, %v362_v44  ;;  %v314_v6 = vadd.f32 %v313_v58, %v303_v0  ;;  %v427_v16 = vadd.f32 %v425_v57, %v420_v34  ;;  %v4095_v58 = vrot.slane %v4031_v52, %v4055_v63 }
 0x27f   :  { %v432_v8 = vadd.f32 %v430_v49, %v426_v1  ;;  %v321_v9 = vadd.f32 %v319_v51, %v315_v2  ;;  %v703_v10 = vadd.f32 %v701_v53, %v697_v3  ;;  %v379_v11 = vadd.f32 %v377_v54, %v373_v4 }
 0x280   :  { %v378_v14 = vadd.f32 %v376_v55, %v372_v5  ;;  %v320_v15 = vadd.f32 %v318_v56, %v314_v6  ;;  %v485_v54 = vmul.f32 %v483_v7, %v4009_v41  ;;  %v4083_v55 = vsub.s32 4, %v3988_v35 }
 0x281   :  { %vm434_vm8 = vcmp.gt.f32.partialorder %v432_v8, 0.0  ;;  %v436_v24 = vmul.f32 0.2, %v432_v8  ;;  %vm323_vm9 = vcmp.gt.f32.partialorder %v321_v9, 0.0  ;;  %v325_v25 = vmul.f32 0.2, %v321_v9 }
 0x282   :  { %vm705_vm10 = vcmp.gt.f32.partialorder %v703_v10, 0.0  ;;  %v707_v30 = vmul.f32 0.2, %v703_v10  ;;  %vm381_vm11 = vcmp.gt.f32.partialorder %v379_v11, 0.0  ;;  %v383_v31 = vmul.f32 0.2, %v379_v11 }
 0x283   :  { %v438_v32 = vsel %vm434_vm8, %v432_v8, %v436_v24  ;;  %v327_v40 = vsel %vm323_vm9, %v321_v9, %v325_v25  ;;  %vm380_vm12 = vcmp.gt.f32.partialorder %v378_v14, 0.0  ;;  %v382_v34 = vmul.f32 0.2, %v378_v14 }
 0x284   :  { %v4069_v43 = vsel %vm328_vm4, %v438_v32, -1e+30  ;;  %v4073_v44 = vsel %vm329_vm6, %v327_v40, -1e+30  ;;  %v709_v48 = vsel %vm705_vm10, %v703_v10, %v707_v30  ;;  %v385_v49 = vsel %vm381_vm11, %v379_v11, %v383_v31 }
 0x285   :  { %v442_v51 = vsel %vm332_vm5, %v4069_v43, -inf  ;;  %v337_v53 = vsel %vm336_vm7, %v4073_v44, -inf  ;;  %v4087_v56 = vsel %vm329_vm6, %v709_v48, -1e+30  ;;  %v4091_v57 = vsel %vm329_vm6, %v385_v49, -1e+30 }
 0x286   :  { %443 = vmax.xlane.f32.xlu1 %v442_v51  ;;  %338 = vmax.xlane.f32.xlu0 %v337_v53  ;;  %v591_v60 = vstv %s4059_s5  ;;  %v384_v0 = vsel %vm380_vm12, %v378_v14, %v382_v34  ;;  %v324_v1 = vmul.f32 0.2, %v320_v15  ;;  %v433_v2 = vadd.f32 %v431_v61, %v427_v16  ;;  %s3174_s5 = sld [smem:[#allocation3 + $0x80]] }
 0x287   :  { %v481_v3 = vadd.f32 %v4063_v17, %v3974_v26  ;;  %vm322_vm13 = vcmp.gt.f32.partialorder %v320_v15, 0.0  ;;  %v715_v4 = vsel %vm336_vm7, %v4087_v56, -inf  ;;  %v391_v5 = vsel %vm336_vm7, %v4091_v57, -inf }
 0x288   :  { %v4108_v6 = vsub.s32 6, %v3988_v35  ;;  %v4112_v8 = vsel %vm328_vm4, %v384_v0, -1e+30  ;;  %v593_v26 = vmul.f32 %v591_v60, %v4009_v41  ;;  %v533_v61 = vrot.slane %v4031_v52, %v4083_v55 }
 0x289   :  { %v537_v9 = vstv %s4065_s22  ;;  %v326_v10 = vsel %vm322_vm13, %v320_v15, %v324_v1  ;;  %v437_v11 = vmul.f32 0.2, %v433_v2  ;;  %v487_v14 = vadd.f32 %v485_v54, %v481_v3  ;;  %s4497_s22 = sld [smem:[#allocation3 + $0x87]] }
 0x28a   :  { %716 = vmax.xlane.f32.xlu1 %v715_v4  ;;  %392 = vmax.xlane.f32.xlu0 %v391_v5  ;;  %v589_v35 = vadd.f32 %v4095_v58, %v3976_v27  ;;  %vm435_vm14 = vcmp.gt.f32.partialorder %v433_v2, 0.0  ;;  %v388_v16 = vsel %vm332_vm5, %v4112_v8, -inf  ;;  %v4126_v24 = vsel %vm328_vm4, %v326_v10, -1e+30  ;;  %v524_v5 = vpop.permute.xlu0 %523 }
 0x28b   :  { %v539_v25 = vmul.f32 %v537_v9, %v4009_v41  ;;  %v641_v30 = vrot.slane %v4031_v52, %v4108_v6  ;;  %v645_v15 = vstv %s4098_s23  ;;  %v439_v31 = vsel %vm435_vm14, %v433_v2, %v437_v11  ;;  %s3175_s23 = sld [smem:[#allocation3 + $0x81]] }
 0x28c   :  { %v491_v32 = vmul.f32 0.2, %v487_v14  ;;  %v595_v40 = vadd.f32 %v593_v26, %v589_v35  ;;  %v535_v27 = vadd.f32 %v533_v61, %v3978_v28  ;;  %vm489_vm15 = vcmp.gt.f32.partialorder %v487_v14, 0.0 }
 0x28d   :  { %v333_v34 = vsel %vm332_vm5, %v4126_v24, -inf  ;;  %v4137_v48 = vsel %vm329_vm6, %v439_v31, -1e+30  ;;  %v647_v49 = vmul.f32 %v645_v15, %v4009_v41  ;;  %v643_v54 = vadd.f32 %v641_v30, %v3980_v29 }
 0x28e   :  { %389 = vmax.xlane.f32.xlu0 %v388_v16  ;;  %v493_v51 = vsel %vm489_vm15, %v487_v14, %v491_v32  ;;  %v599_v52 = vmul.f32 0.2, %v595_v40  ;;  %v541_v53 = vadd.f32 %v539_v25, %v535_v27  ;;  %vm597_vm0 = vcmp.gt.f32.partialorder %v595_v40, 0.0 }
 0x28f   :  { %v445_v28 = vsel %vm336_vm7, %v4137_v48, -inf  ;;  %v4145_v0 = vsel %vm329_vm6, %v493_v51, -1e+30  ;;  %v484_v1 = vmul.f32 %v483_v7, %v4003_v39  ;;  %v649_v41 = vadd.f32 %v647_v49, %v643_v54 }
 0x290   :  { %v601_v2 = vsel %vm597_vm0, %v595_v40, %v599_v52  ;;  %v545_v3 = vmul.f32 0.2, %v541_v53  ;;  %v480_v4 = vadd.f32 %v4063_v17, %v3986_v33  ;;  %vm543_vm1 = vcmp.gt.f32.partialorder %v541_v53, 0.0 }
 0x291   :  { %v499_v29 = vsel %vm336_vm7, %v4145_v0, -inf  ;;  %v4156_v26 = vsel %vm329_vm6, %v601_v2, -1e+30  ;;  %v538_v10 = vmul.f32 %v537_v9, %v4003_v39  ;;  %v653_v11 = vmul.f32 0.2, %v649_v41 }
 0x292   :  { %334 = vmax.xlane.f32.xlu0 %v333_v34  ;;  %v547_v7 = vsel %vm543_vm1, %v541_v53, %v545_v3  ;;  %v486_v14 = vadd.f32 %v484_v1, %v480_v4  ;;  %v534_v35 = vadd.f32 %v533_v61, %v524_v5  ;;  %vm651_vm8 = vcmp.gt.f32.partialorder %v649_v41, 0.0  ;;  %v632_v61 = vpop.permute.xlu0 %631 }
 0x293   :  { %v607_v33 = vsel %vm336_vm7, %v4156_v26, -inf  ;;  %v4163_v17 = vsel %vm329_vm6, %v547_v7, -1e+30  ;;  %v592_v16 = vmul.f32 %v591_v60, %v4003_v39  ;;  %v655_v25 = vsel %vm651_vm8, %v649_v41, %v653_v11 }
 0x294   :  { %v490_v31 = vmul.f32 0.2, %v486_v14  ;;  %v540_v32 = vadd.f32 %v538_v10, %v534_v35  ;;  %v588_v9 = vadd.f32 %v4095_v58, %v3998_v38  ;;  %vm488_vm9 = vcmp.gt.f32.partialorder %v486_v14, 0.0 }
 0x295   :  { %v553_v40 = vsel %vm336_vm7, %v4163_v17, -inf  ;;  %v4174_v27 = vsel %vm329_vm6, %v655_v25, -1e+30  ;;  %v646_v34 = vmul.f32 %v645_v15, %v4003_v39  ;;  %v642_v52 = vadd.f32 %v641_v30, %v632_v61 }
 0x296   :  { %446 = vmax.xlane.f32.xlu0 %v445_v28  ;;  %v492_v60 = vsel %vm488_vm9, %v486_v14, %v490_v31  ;;  %v544_v49 = vmul.f32 0.2, %v540_v32  ;;  %v594_v51 = vadd.f32 %v592_v16, %v588_v9  ;;  %vm542_vm10 = vcmp.gt.f32.partialorder %v540_v32, 0.0  ;;  %v686_v58 = vpop.permute.xlu0 %685 }
 0x297   :  { %v661_v38 = vsel %vm336_vm7, %v4174_v27, -inf  ;;  %v4181_v53 = vsel %vm328_vm4, %v492_v60, -1e+30  ;;  %v700_v54 = vmul.f32 %v699_v46, %v4003_v39  ;;  %v648_v15 = vadd.f32 %v646_v34, %v642_v52 }
 0x298   :  { %v546_v28 = vsel %vm542_vm10, %v540_v32, %v544_v49  ;;  %v598_v1 = vmul.f32 0.2, %v594_v51  ;;  %v696_v2 = vadd.f32 %v4045_v59, %v686_v58  ;;  %vm596_vm11 = vcmp.gt.f32.partialorder %v594_v51, 0.0 }
 0x299   :  { %v496_v30 = vsel %vm332_vm5, %v4181_v53, -inf  ;;  %v4191_v3 = vsel %vm328_vm4, %v546_v28, -1e+30  ;;  %v652_v4 = vmul.f32 0.2, %v648_v15  ;;  %vm650_vm12 = vcmp.gt.f32.partialorder %v648_v15, 0.0 }
 0x29a   :  { %500 = vmax.xlane.f32.xlu0 %v499_v29  ;;  %v600_v41 = vsel %vm596_vm11, %v594_v51, %v598_v1  ;;  %v702_v29 = vadd.f32 %v700_v54, %v696_v2  ;;  %v550_v39 = vsel %vm332_vm5, %v4191_v3, -inf }
 0x29b   :  { %v4197_v46 = vsel %vm328_vm4, %v600_v41, -1e+30  ;;  %v654_v59 = vsel %vm650_vm12, %v648_v15, %v652_v4 }
 0x29c   :  { %v706_v5 = vmul.f32 0.2, %v702_v29  ;;  %vm704_vm13 = vcmp.gt.f32.partialorder %v702_v29, 0.0  ;;  %v604_v10 = vsel %vm332_vm5, %v4197_v46, -inf  ;;  %v4203_v7 = vsel %vm328_vm4, %v654_v59, -1e+30 }
 0x29d   :  { %v658_v14 = vsel %vm332_vm5, %v4203_v7, -inf }
 0x29e   :  { %608 = vmax.xlane.f32.xlu0 %v607_v33  ;;  %v708_v11 = vsel %vm704_vm13, %v702_v29, %v706_v5 }
 0x29f   :  { %v4209_v35 = vsel %vm328_vm4, %v708_v11, -1e+30 }
 0x2a0   :  { %v712_v33 = vsel %vm332_vm5, %v4209_v35, -inf }
 0x2a2   :  { %554 = vmax.xlane.f32.xlu0 %v553_v40 }
 0x2a6   :  { %662 = vmax.xlane.f32.xlu0 %v661_v38 }
 0x2aa   :  { %497 = vmax.xlane.f32.xlu0 %v496_v30 }
 0x2ae   :  { %551 = vmax.xlane.f32.xlu0 %v550_v39 }
 0x2b2   :  { %605 = vmax.xlane.f32.xlu0 %v604_v10 }
 0x2b6   :  { %659 = vmax.xlane.f32.xlu0 %v658_v14 }
 0x2ba   :  { %713 = vmax.xlane.f32.xlu0 %v712_v33 }
 0x30f   :  { %v339_v16 = vpop.xlane.xlu0 %338 }
 0x310   :  { %v341_v25 = vsub.f32 %v4073_v44, %v339_v16 }
 0x312   :  { %v344_v31 = vmul.f32 1.442695, %v341_v25 }
 0x313   :  { %v393_v32 = vpop.xlane.xlu0 %392 }
 0x314   :  { %v395_v9 = vsub.f32 %v4091_v57, %v393_v32  ;;  %3584 = vpow2.f32 %v344_v31 }
 0x316   :  { %v398_v61 = vmul.f32 1.442695, %v395_v9 }
 0x317   :  { %v390_v40 = vpop.xlane.xlu0 %389 }
 0x318   :  { %3586 = vpow2.f32 %v398_v61  ;;  %v394_v58 = vsub.f32 %v4112_v8, %v390_v40 }
 0x31a   :  { %v396_v2 = vmul.f32 1.442695, %v394_v58 }
 0x31b   :  { %v335_v34 = vpop.xlane.xlu0 %334 }
 0x31c   :  { %v340_v60 = vsub.f32 %v4126_v24, %v335_v34  ;;  %v444_v24 = vpop.xlane.xlu1 %443 }
 0x31d   :  { %v448_v41 = vsub.f32 %v4069_v43, %v444_v24 }
 0x31e   :  { %v342_v54 = vmul.f32 1.442695, %v340_v60 }
 0x31f   :  { %v447_v49 = vpop.xlane.xlu0 %446  ;;  %v450_v59 = vmul.f32 1.442695, %v448_v41 }
 0x320   :  { %v449_v51 = vsub.f32 %v4137_v48, %v447_v49  ;;  %v717_v60 = vpop.xlane.xlu1 %716 }
 0x321   :  { %v3585_v52 = vpop.eup %3584  ;;  %v719_v58 = vsub.f32 %v4087_v56, %v717_v60 }
 0x322   :  { %v452_v38 = vmul.f32 1.442695, %v449_v51  ;;  %v4220_v28 = vsel %vm329_vm6, %v3585_v52, 0.0 }
 0x323   :  { %v501_v44 = vpop.xlane.xlu0 %500  ;;  %v351_v1 = vsel %vm336_vm7, %v4220_v28, 0.0 }
 0x324   :  { %3588 = vpow2.f32 %v452_v38  ;;  %v503_v57 = vsub.f32 %v4145_v0, %v501_v44  ;;  %352 = vadd.xlane.f32.xlu0 %v351_v1 }
 0x325   :  { %v3587_v15 = vpop.eup %3586  ;;  %3590 = vpow2.f32 %v342_v54 }
 0x326   :  { %v506_v48 = vmul.f32 1.442695, %v503_v57  ;;  %v4227_v8 = vsel %vm329_vm6, %v3587_v15, 0.0 }
 0x327   :  { %v609_v30 = vpop.xlane.xlu0 %608  ;;  %v405_v0 = vsel %vm336_vm7, %v4227_v8, 0.0 }
 0x328   :  { %3592 = vpow2.f32 %v506_v48  ;;  %v611_v4 = vsub.f32 %v4156_v26, %v609_v30  ;;  %406 = vadd.xlane.f32.xlu1 %v405_v0  ;;  %v722_v48 = vmul.f32 1.442695, %v719_v58 }
 0x329   :  { %3594 = vpow2.f32 %v396_v2 }
 0x32a   :  { %v614_v29 = vmul.f32 1.442695, %v611_v4 }
 0x32b   :  { %v555_v39 = vpop.xlane.xlu0 %554 }
 0x32c   :  { %3596 = vpow2.f32 %v614_v29  ;;  %v557_v5 = vsub.f32 %v4163_v17, %v555_v39 }
 0x32d   :  { %3598 = vpow2.f32 %v450_v59 }
 0x32e   :  { %v560_v33 = vmul.f32 1.442695, %v557_v5 }
 0x32f   :  { %v663_v10 = vpop.xlane.xlu0 %662 }
 0x330   :  { %v665_v11 = vsub.f32 %v4174_v27, %v663_v10 }
 0x331   :  { %v3589_v14 = vpop.eup %3588 }
 0x332   :  { %v668_v43 = vmul.f32 1.442695, %v665_v11  ;;  %v4237_v26 = vsel %vm329_vm6, %v3589_v14, 0.0  ;;  %v3591_v31 = vpop.eup %3590 }
 0x333   :  { %v498_v16 = vpop.xlane.xlu0 %497  ;;  %v459_v25 = vsel %vm336_vm7, %v4237_v26, 0.0 }
 0x334   :  { %3600 = vpow2.f32 %v668_v43  ;;  %v502_v32 = vsub.f32 %v4181_v53, %v498_v16  ;;  %460 = vadd.xlane.f32.xlu1 %v459_v25  ;;  %v4251_v53 = vsel %vm328_vm4, %v3591_v31, 0.0 }
 0x335   :  { %v3593_v17 = vpop.eup %3592  ;;  %3602 = vpow2.f32 %v560_v33  ;;  %v348_v44 = vsel %vm332_vm5, %v4251_v53, 0.0 }
 0x336   :  { %v504_v9 = vmul.f32 1.442695, %v502_v32  ;;  %v4244_v27 = vsel %vm329_vm6, %v3593_v17, 0.0  ;;  %v3595_v34 = vpop.eup %3594 }
 0x337   :  { %v552_v61 = vpop.xlane.xlu0 %551  ;;  %v513_v40 = vsel %vm336_vm7, %v4244_v27, 0.0  ;;  %v4265_v1 = vsel %vm328_vm4, %v3595_v34, 0.0 }
 0x338   :  { %3604 = vpow2.f32 %v504_v9  ;;  %v556_v49 = vsub.f32 %v4191_v3, %v552_v61  ;;  %514 = vadd.xlane.f32.xlu1 %v513_v40  ;;  %v402_v2 = vsel %vm332_vm5, %v4265_v1, 0.0 }
 0x339   :  { %v3597_v51 = vpop.eup %3596 }
 0x33a   :  { %v558_v52 = vmul.f32 1.442695, %v556_v49  ;;  %v4255_v38 = vsel %vm329_vm6, %v3597_v51, 0.0  ;;  %v3599_v24 = vpop.eup %3598 }
 0x33b   :  { %v606_v54 = vpop.xlane.xlu0 %605  ;;  %v621_v3 = vsel %vm336_vm7, %v4255_v38, 0.0 }
 0x33c   :  { %3606 = vpow2.f32 %v558_v52  ;;  %v610_v57 = vsub.f32 %v4197_v46, %v606_v54  ;;  %349 = vadd.xlane.f32.xlu1 %v348_v44  ;;  %622 = vadd.xlane.f32.xlu0 %v621_v3  ;;  %v4272_v46 = vsel %vm328_vm4, %v3599_v24, 0.0 }
 0x33d   :  { %v456_v39 = vsel %vm332_vm5, %v4272_v46, 0.0 }
 0x33e   :  { %v612_v15 = vmul.f32 1.442695, %v610_v57 }
 0x33f   :  { %v660_v56 = vpop.xlane.xlu0 %659 }
 0x340   :  { %3608 = vpow2.f32 %v612_v15  ;;  %v664_v30 = vsub.f32 %v4203_v7, %v660_v56  ;;  %403 = vadd.xlane.f32.xlu0 %v402_v2 }
 0x341   :  { %v3601_v41 = vpop.eup %3600  ;;  %3610 = vpow2.f32 %v722_v48 }
 0x342   :  { %v666_v4 = vmul.f32 1.442695, %v664_v30  ;;  %v4276_v0 = vsel %vm329_vm6, %v3601_v41, 0.0  ;;  %v3603_v7 = vpop.eup %3602 }
 0x343   :  { %v714_v29 = vpop.xlane.xlu0 %713  ;;  %v675_v59 = vsel %vm336_vm7, %v4276_v0, 0.0  ;;  %v4291_v33 = vsel %vm329_vm6, %v3603_v7, 0.0 }
 0x344   :  { %3612 = vpow2.f32 %v666_v4  ;;  %v718_v5 = vsub.f32 %v4209_v35, %v714_v29  ;;  %457 = vadd.xlane.f32.xlu0 %v456_v39  ;;  %676 = vadd.xlane.f32.xlu1 %v675_v59  ;;  %v567_v35 = vsel %vm336_vm7, %v4291_v33, 0.0 }
 0x345   :  { %v3605_v10 = vpop.eup %3604 }
 0x346   :  { %v720_v11 = vmul.f32 1.442695, %v718_v5  ;;  %v4285_v14 = vsel %vm328_vm4, %v3605_v10, 0.0 }
 0x347   :  { %v510_v43 = vsel %vm332_vm5, %v4285_v14, 0.0 }
 0x348   :  { %3614 = vpow2.f32 %v720_v11  ;;  %511 = vadd.xlane.f32.xlu0 %v510_v43 }
 0x349   :  { %v3607_v16 = vpop.eup %3606 }
 0x34a   :  { %v4297_v25 = vsel %vm328_vm4, %v3607_v16, 0.0 }
 0x34b   :  { %v564_v17 = vsel %vm332_vm5, %v4297_v25, 0.0 }
 0x34c   :  { %568 = vadd.xlane.f32.xlu0 %v567_v35 }
 0x34d   :  { %v3609_v31 = vpop.eup %3608 }
 0x34e   :  { %v4301_v32 = vsel %vm328_vm4, %v3609_v31, 0.0  ;;  %v3611_v61 = vpop.eup %3610 }
 0x34f   :  { %v618_v9 = vsel %vm332_vm5, %v4301_v32, 0.0  ;;  %v4315_v49 = vsel %vm329_vm6, %v3611_v61, 0.0  ;;  %vm756_vm6 = vcmask 1045504  }
 0x350   :  { %565 = vadd.xlane.f32.xlu0 %v564_v17  ;;  %619 = vadd.xlane.f32.xlu1 %v618_v9  ;;  %v729_v58 = vsel %vm336_vm7, %v4315_v49, 0.0 }
 0x351   :  { %v3613_v40 = vpop.eup %3612 }
 0x352   :  { %v4309_v34 = vsel %vm328_vm4, %v3613_v40, 0.0 }
 0x353   :  { %v672_v60 = vsel %vm332_vm5, %v4309_v34, 0.0 }
 0x354   :  { %673 = vadd.xlane.f32.xlu1 %v672_v60 }
 0x355   :  { %v3615_v51 = vpop.eup %3614 }
 0x356   :  { %v4319_v52 = vsel %vm328_vm4, %v3615_v51, 0.0  ;;  %vm748_vm4 = vcmask 1043456  }
 0x357   :  { %v726_v54 = vsel %vm332_vm5, %v4319_v52, 0.0 }
 0x358   :  { %730 = vadd.xlane.f32.xlu1 %v729_v58  ;;  %727 = vadd.xlane.f32.xlu0 %v726_v54 }
 0x3ad   :  { %v353_v57 = vpop.xlane.xlu0 %352 }
 0x3ae   :  { %v355_v48 = vmax.f32 %v353_v57, 1e-20 }
 0x3b1   :  { %v407_v44 = vpop.xlane.xlu1 %406 }
 0x3b2   :  { %v409_v2 = vmax.f32 %v407_v44, 1e-20 }
 0x3bd   :  { %v461_v3 = vpop.xlane.xlu1 %460 }
 0x3be   :  { %v463_v41 = vmax.f32 %v461_v3, 1e-20 }
 0x3c1   :  { %v515_v24 = vpop.xlane.xlu1 %514 }
 0x3c2   :  { %v517_v4 = vmax.f32 %v515_v24, 1e-20 }
 0x3c5   :  { %v350_v50 = vpop.xlane.xlu1 %349  ;;  %v623_v15 = vpop.xlane.xlu0 %622 }
 0x3c6   :  { %v354_v56 = vmax.f32 %v350_v50, 1e-20  ;;  %v625_v43 = vmax.f32 %v623_v15, 1e-20 }
 0x3c8   :  { %3616 = vrcp.f32 %v354_v56 }
 0x3c9   :  { %v404_v36 = vpop.xlane.xlu0 %403  ;;  %3618 = vrcp.f32 %v355_v48 }
 0x3ca   :  { %v408_v30 = vmax.f32 %v404_v36, 1e-20  ;;  %3620 = vrcp.f32 %v409_v2 }
 0x3cc   :  { %3622 = vrcp.f32 %v408_v30 }
 0x3cd   :  { %v458_v29 = vpop.xlane.xlu0 %457  ;;  %3624 = vrcp.f32 %v463_v41  ;;  %v677_v10 = vpop.xlane.xlu1 %676 }
 0x3ce   :  { %v462_v39 = vmax.f32 %v458_v29, 1e-20  ;;  %3626 = vrcp.f32 %v517_v4  ;;  %v679_v54 = vmax.f32 %v677_v10, 1e-20 }
 0x3d0   :  { %3628 = vrcp.f32 %v462_v39 }
 0x3d1   :  { %v512_v59 = vpop.xlane.xlu0 %511 }
 0x3d2   :  { %v516_v7 = vmax.f32 %v512_v59, 1e-20 }
 0x3d4   :  { %3630 = vrcp.f32 %v516_v7 }
 0x3d5   :  { %v3617_v5 = vpop.eup %3616  ;;  %v569_v11 = vpop.xlane.xlu0 %568  ;;  %3632 = vrcp.f32 %v625_v43 }
 0x3d6   :  { %v357_v16 = vmul.f32 %v3617_v5, %v4251_v53  ;;  %v3619_v35 = vpop.eup %3618  ;;  %v571_v31 = vmax.f32 %v569_v11, 1e-20 }
 0x3d7   :  { %v3621_v17 = vpop.eup %3620  ;;  %v359_v3 = vmul.f32 %v3619_v35, %v4220_v28 }
 0x3d8   :  { %3358 = vmatprep.mubr.msk.f32.mxu0 %vm332_vm5, %v357_v16  ;;  %3634 = vrcp.f32 %v571_v31  ;;  %v413_v57 = vmul.f32 %v3621_v17, %v4227_v8 }
 0x3d9   :  { %v3623_v9 = vpop.eup %3622  ;;  %v620_v61 = vpop.xlane.xlu1 %619 }
 0x3da   :  { %v566_v40 = vpop.xlane.xlu0 %565  ;;  %v624_v60 = vmax.f32 %v620_v61, 1e-20  ;;  %v411_v58 = vmul.f32 %v3623_v9, %v4265_v1  ;;  %v3625_v44 = vpop.eup %3624  ;;  %v742_v36 = vrot.slane %v413_v57, 6 }
 0x3db   :  { %v570_v51 = vmax.f32 %v566_v40, 1e-20  ;;  %v3627_v24 = vpop.eup %3626  ;;  %v467_v2 = vmul.f32 %v3625_v44, %v4237_v26 }
 0x3dc   :  { %3636 = vrcp.f32 %v624_v60  ;;  %v741_v53 = vrot.slane %v411_v58, 6  ;;  %v521_v28 = vmul.f32 %v3627_v24, %v4244_v27 }
 0x3dd   :  { %3638 = vrcp.f32 %v570_v51  ;;  %v674_v50 = vpop.xlane.xlu1 %673  ;;  %v3629_v15 = vpop.eup %3628 }
 0x3de   :  { %v678_v48 = vmax.f32 %v674_v50, 1e-20  ;;  %v781_v56 = vsel %vm740_vm2, %v359_v3, %v741_v53  ;;  %3640 = vrcp.f32 %v679_v54  ;;  %v465_v1 = vmul.f32 %v3629_v15, %v4272_v46 }
 0x3df   :  { %3359 = vmatmul.mubr.msk.f32.vlgmr.msra.gmra.mxu0 %vm332_vm5, %v781_v56  ;;  %v743_v59 = vsel %vm740_vm2, %v741_v53, %v742_v36  ;;  %v750_v46 = vrot.slane %v467_v2, 4  ;;  %v758_v10 = vrot.slane %v521_v28, 2  ;;  %v1055_v2 = vld [vmem:[%s5437_s11 + $0x28] sm:$0xff]  ;;  %v1054_v36 = vld [vmem:[%s5437_s11 + $0x20] sm:$0xff]  ;;  %v1053_v28 = vld [vmem:[%s5437_s11 + $0x18] sm:$0xff] }
 0x3e0   :  { %3642 = vrcp.f32 %v678_v48  ;;  %v749_v4 = vrot.slane %v465_v1, 4 }
 0x3e1   :  { %v3631_v8 = vpop.eup %3630  ;;  %v731_v30 = vpop.xlane.xlu1 %730 }
 0x3e2   :  { %v728_v41 = vpop.xlane.xlu0 %727  ;;  %v733_v29 = vmax.f32 %v731_v30, 1e-20  ;;  %v519_v7 = vmul.f32 %v3631_v8, %v4285_v14  ;;  %v782_v5 = vsel %vm748_vm4, %v743_v59, %v749_v4  ;;  %v751_v27 = vsel %vm748_vm4, %v749_v4, %v750_v46  ;;  %v3633_v16 = vpop.eup %3632  ;;  %v1052_v8 = vld [vmem:[%s5437_s11 + $0x10] sm:$0xff]  ;;  %v1051_v30 = vld [vmem:[%s5437_s11 + $0x8] sm:$0xff]  ;;  %v1062_v59 = vld [vmem:[%s5438_s12 + $0x20] sm:$0xff] }
 0x3e3   :  { %v732_v39 = vmax.f32 %v728_v41, 1e-20  ;;  %3361 = vmatprep.mubr.msk.f32.mxu0 %vm332_vm5, %v782_v5  ;;  %v629_v61 = vmul.f32 %v3633_v16, %v4255_v38  ;;  %v1065_v41 = vld [vmem:[%s5438_s12 + $0x38] sm:$0xff]  ;;  %v1064_v4 = vld [vmem:[%s5438_s12 + $0x30] sm:$0xff]  ;;  %v83_v46 = vld [vmem:[%s5433_s7] sm:$0xff]  ;;  %s4560_s7 = sld [smem:[#allocation3 + $0x84]] }
 0x3e4   :  { %3644 = vrcp.f32 %v733_v29  ;;  %v757_v26 = vrot.slane %v519_v7, 2  ;;  %3392 = vmatprep.subr.mxu1 %v1065_v41  ;;  %v1050_v29 = vld [vmem:[%s5437_s11] sm:$0xff]  ;;  %v1061_v7 = vld [vmem:[%s5438_s12 + $0x18] sm:$0xff]  ;;  %v1060_v5 = vld [vmem:[%s5438_s12 + $0x10] sm:$0xff] }
 0x3e5   :  { %3646 = vrcp.f32 %v732_v39  ;;  %v3635_v14 = vpop.eup %3634  ;;  %v764_v3 = vrot.slane %v629_v61, 6  ;;  %3393 = vmatpush3.msra.mxu1 %v1065_v41  ;;  %v1063_v39 = vld [vmem:[%s5438_s12 + $0x28] sm:$0xff] }
 0x3e6   :  { %v783_v11 = vsel %vm756_vm6, %v751_v27, %v757_v26  ;;  %v759_v43 = vsel %vm756_vm6, %v757_v26, %v758_v10  ;;  %v575_v60 = vmul.f32 %v3635_v14, %v4291_v33  ;;  %3394 = vmatprep.subr.mxu1 %v1064_v4  ;;  %v4409_v10 = vrot.slane %v83_v46, %v4021_v47 }
 0x3e7   :  { %3362 = vmatmul.mubr.msk.f32.gmra.mxu0 %vm332_vm5, %v783_v11  ;;  %3395 = vmatpush3.msra.mxu1 %v1064_v4  ;;  %v4412_v11 = vrot.slane %v83_v46, %v4012_v42 }
 0x3e8   :  { %3364 = vmatprep.mubr.msk.f32.mxu0 %vm332_vm5, %v759_v43  ;;  %3396 = vmatprep.subr.mxu1 %v1063_v39 }
 0x3e9   :  { %v3637_v35 = vpop.eup %3636  ;;  %3397 = vmatpush3.msra.mxu1 %v1063_v39 }
 0x3ea   :  { %v3639_v31 = vpop.eup %3638  ;;  %v627_v17 = vmul.f32 %v3637_v35, %v4301_v32  ;;  %3398 = vmatprep.subr.mxu1 %v1062_v59 }
 0x3eb   :  { %v573_v9 = vmul.f32 %v3639_v31, %v4297_v25  ;;  %v3641_v40 = vpop.eup %3640  ;;  %3399 = vmatpush3.msra.mxu1 %v1062_v59  ;;  %v4417_v31 = vrot.slane %v83_v46, %v3996_v37  ;;  %v4447_v59 = vrot.slane %v83_v46, %v4017_v45 }
 0x3ec   :  { %v763_v51 = vrot.slane %v627_v17, 6  ;;  %v683_v32 = vmul.f32 %v3641_v40, %v4276_v0  ;;  %3400 = vmatprep.subr.mxu1 %v1061_v7 }
 0x3ed   :  { %v3643_v58 = vpop.eup %3642  ;;  %3365 = vmatmul.mubr.msk.f32.gmra.mxu0 %vm332_vm5, %v573_v9  ;;  %3401 = vmatpush3.msra.mxu1 %v1061_v7  ;;  %v3169_v9 = vld [vmem:[%s5436_s10] ss:$0 sm:$0xff] }
 0x3ee   :  { %v784_v54 = vsel %vm740_vm2, %v575_v60, %v763_v51  ;;  %v681_v44 = vmul.f32 %v3643_v58, %v4309_v34  ;;  %v765_v38 = vsel %vm740_vm2, %v763_v51, %v764_v3  ;;  %v771_v15 = vrot.slane %v683_v32, 4  ;;  %3402 = vmatprep.subr.mxu1 %v1060_v5 }
 0x3ef   :  { %3367 = vmatprep.mubr.msk.f32.mxu0 %vm332_vm5, %v784_v54  ;;  %3403 = vmatpush3.msra.mxu1 %v1060_v5  ;;  %v4425_v60 = vrot.slane %v83_v46, %v4052_v62 }
 0x3f0   :  { %v770_v53 = vrot.slane %v681_v44, 4 }
 0x3f1   :  { %v3645_v25 = vpop.eup %3644 }
 0x3f2   :  { %v3647_v57 = vpop.eup %3646  ;;  %v785_v33 = vsel %vm748_vm4, %v765_v38, %v770_v53  ;;  %v737_v24 = vmul.f32 %v3645_v25, %v4315_v49  ;;  %v772_v56 = vsel %vm748_vm4, %v770_v53, %v771_v15  ;;  %v1057_v49 = vld [vmem:[%s5437_s11 + $0x38] sm:$0xff] }
 0x3f3   :  { %3368 = vmatmul.mubr.msk.f32.gmra.mxu0 %vm332_vm5, %v785_v33  ;;  %v735_v50 = vmul.f32 %v3647_v57, %v4319_v52  ;;  %3373 = vmatprep.subr.mxu0 %v1057_v49  ;;  %v1056_v52 = vld [vmem:[%s5437_s11 + $0x30] sm:$0xff]  ;;  %s5476_s11 = sld [smem:[#allocation10_spill]] }
 0x3f4   :  { %v778_v34 = vrot.slane %v737_v24, 2  ;;  %3374 = vmatpush3.msra.mxu0 %v1057_v49  ;;  %v4437_v49 = vrot.slane %v83_v46, %v4083_v55 }
 0x3f5   :  { %v777_v48 = vrot.slane %v735_v50, 2  ;;  %3375 = vmatprep.subr.mxu0 %v1056_v52 }
 0x3f6   :  { %3376 = vmatpush3.msra.mxu0 %v1056_v52 }
 0x3f7   :  { %v786_v1 = vsel %vm756_vm6, %v772_v56, %v777_v48  ;;  %v779_v0 = vsel %vm756_vm6, %v777_v48, %v778_v34  ;;  %3377 = vmatprep.subr.mxu0 %v1055_v2  ;;  %v4433_v48 = vrot.slane %v83_v46, %v4055_v63 }
 0x3f8   :  { %3370 = vmatprep.mubr.msk.f32.mxu0 %vm332_vm5, %v786_v1  ;;  %3378 = vmatpush3.msra.mxu0 %v1055_v2 }
 0x3f9   :  { %3371 = vmatmul.mubr.msk.f32.gmra.mxu0 %vm332_vm5, %v779_v0  ;;  %3379 = vmatprep.subr.mxu0 %v1054_v36 }
 0x3fa   :  { %3380 = vmatpush3.msra.mxu0 %v1054_v36  ;;  %v4440_v36 = vrot.slane %v83_v46, %v4108_v6 }
 0x3fb   :  { %3381 = vmatprep.subr.mxu0 %v1053_v28 }
 0x3fc   :  { %3382 = vmatpush3.msra.mxu0 %v1053_v28 }
 0x3fd   :  { %3383 = vmatprep.subr.mxu0 %v1052_v8 }
 0x3fe   :  { %3384 = vmatpush3.msra.mxu0 %v1052_v8 }
 0x3ff   :  { %3385 = vmatprep.subr.mxu0 %v1051_v30 }
 0x400   :  { %3386 = vmatpush3.msra.mxu0 %v1051_v30 }
 0x401   :  { %3387 = vmatprep.subr.mxu0 %v1050_v29 }
 0x402   :  { %3388 = vmatpush3.msra.mxu0 %v1050_v29 }
 0x49f   :  { %v3360_v26 = vpop.f32.mrf.mxu0 }
 0x4a0   :  { %v950_v16 = vmul.f32 %v3360_v26, %v4409_v10  ;;  %v937_v35 = vmul.f32 %v3360_v26, %v4412_v11 }
 0x4a1   :  { %v883_v27 = vpop.f32.mrf.mxu0 }
 0x4a2   :  { %v936_v61 = vmul.f32 %v4412_v11, %v883_v27  ;;  %v954_v40 = vrot.slane %v950_v16, 2  ;;  %v945_v44 = vadd.f32 %v3169_v9, %v937_v35 }
 0x4a4   :  { %v944_v32 = vadd.f32 %v3169_v9, %v936_v61 }
 0x4a7   :  { %v3363_v43 = vpop.f32.mrf.mxu0 }
 0x4a8   :  { %v966_v3 = vmul.f32 %v3363_v43, %v4417_v31  ;;  %v980_v38 = vmul.f32 %v3363_v43, %v4425_v60 }
 0x4a9   :  { %v893_v14 = vpop.f32.mrf.mxu0 }
 0x4aa   :  { %v951_v17 = vmul.f32 %v4409_v10, %v893_v14  ;;  %v965_v58 = vmul.f32 %v4417_v31, %v893_v14  ;;  %v970_v15 = vrot.slane %v966_v3, 4  ;;  %v984_v1 = vrot.slane %v980_v38, 6 }
 0x4ac   :  { %v955_v51 = vrot.slane %v951_v17, 2  ;;  %v969_v33 = vrot.slane %v965_v58, 4 }
 0x4ad   :  { %v3366_v54 = vpop.f32.mrf.mxu0 }
 0x4ae   :  { %v956_v53 = vsel %vm756_vm6, %v954_v40, %v955_v51  ;;  %v960_v57 = vadd.f32 %v955_v51, %v945_v44  ;;  %v971_v0 = vsel %vm748_vm4, %v969_v33, %v970_v15  ;;  %v995_v16 = vmul.f32 %v3366_v54, %v4437_v49 }
 0x4af   :  { %v903_v25 = vpop.f32.mrf.mxu0  ;;  %v959_v50 = vadd.f32 %v956_v53, %v944_v32 }
 0x4b0   :  { %v981_v24 = vmul.f32 %v4425_v60, %v903_v25  ;;  %v975_v52 = vadd.f32 %v970_v15, %v960_v57  ;;  %v1059_v15 = vld [vmem:[%s5438_s12 + $0x8] sm:$0xff] }
 0x4b1   :  { %v974_v2 = vadd.f32 %v971_v0, %v959_v50  ;;  %3404 = vmatprep.subr.mxu1 %v1059_v15 }
 0x4b2   :  { %v985_v34 = vrot.slane %v981_v24, 6  ;;  %3405 = vmatpush3.msra.mxu1 %v1059_v15 }
 0x4b3   :  { %v3369_v56 = vpop.f32.mrf.mxu0 }
 0x4b4   :  { %v986_v8 = vsel %vm740_vm2, %v984_v1, %v985_v34  ;;  %v1004_v30 = vmul.f32 %v3369_v56, %v4433_v48  ;;  %v990_v29 = vadd.f32 %v985_v34, %v975_v52  ;;  %v1018_v27 = vmul.f32 %v3369_v56, %v4440_v36  ;;  %v1058_v34 = vld [vmem:[%s5438_s12] sm:$0xff]  ;;  %s4495_s12 = sld [smem:[#allocation3 + $0x82]] }
 0x4b5   :  { %v913_v28 = vpop.f32.mrf.mxu0  ;;  %v989_v7 = vadd.f32 %v986_v8, %v974_v2  ;;  %3406 = vmatprep.subr.mxu1 %v1058_v34 }
 0x4b6   :  { %v996_v41 = vmul.f32 %v4437_v49, %v913_v28  ;;  %v1003_v4 = vmul.f32 %v4433_v48, %v913_v28  ;;  %v1008_v26 = vrot.slane %v1004_v30, 2  ;;  %v1022_v46 = vrot.slane %v1018_v27, 4  ;;  %3407 = vmatpush3.msra.mxu1 %v1058_v34 }
 0x4b7   :  { %v997_v40 = vadd.f32 %v995_v16, %v989_v7  ;;  %v4506_v16 = vld [vmem:[%s5475_s24] sm:$0xff] }
 0x4b8   :  { %v1007_v39 = vrot.slane %v1003_v4, 2  ;;  %v998_v43 = vadd.f32 %v996_v41, %v990_v29 }
 0x4b9   :  { %v3372_v5 = vpop.f32.mrf.mxu0 }
 0x4ba   :  { %v1009_v35 = vsel %vm756_vm6, %v1007_v39, %v1008_v26  ;;  %v1034_v17 = vmul.f32 %v3372_v5, %v4447_v59  ;;  %v1013_v51 = vadd.f32 %v1008_v26, %v998_v43 }
 0x4bb   :  { %v923_v14 = vpop.f32.mrf.mxu0  ;;  %v1012_v3 = vadd.f32 %v1009_v35, %v997_v40  ;;  %v1334_v40 = vstv %s3175_s23 }
 0x4bc   :  { %v1019_v9 = vmul.f32 %v4440_v36, %v923_v14  ;;  %v1033_v61 = vmul.f32 %v4447_v59, %v923_v14  ;;  %v1038_v53 = vrot.slane %v1034_v17, 6  ;;  %v1388_v14 = vstv %s4495_s12  ;;  %v4516_v17 = vld [vmem:[%s5475_s24 + $0x8] sm:$0x3] }
 0x4be   :  { %v1023_v58 = vrot.slane %v1019_v9, 4  ;;  %v1037_v44 = vrot.slane %v1033_v61, 6  ;;  %v1278_v9 = vstv %s3174_s5  ;;  %v1658_v61 = vstv %s4497_s22 }
 0x4c0   :  { %v1024_v32 = vsel %vm748_vm4, %v1022_v46, %v1023_v58  ;;  %v1028_v25 = vadd.f32 %v1023_v58, %v1013_v51  ;;  %v1039_v38 = vsel %vm740_vm2, %v1037_v44, %v1038_v53  ;;  %v4522_v46 = vld [vmem:[%s5476_s11] sm:$0xff]  ;;  %v4527_v51 = vld [vmem:[%s5476_s11 + $0x8] sm:$0x3]  ;;  %v1389_v44 = vmul.f32 %v1388_v14, %v4506_v16  ;;  %s4966_s11 = sld [smem:[#allocation3 + $0x105]] }
 0x4c1   :  { %v1027_v54 = vadd.f32 %v1024_v32, %v1012_v3  ;;  %v1280_v3 = vmul.f32 %v1278_v9, %v4516_v17  ;;  %v1336_v32 = vmul.f32 %v1334_v40, %v4516_v17  ;;  %vm1289_vm14 = vcmp.gt.f32.partialorder %v4522_v46, 0.0 }
 0x4c2   :  { %v1043_v57 = vadd.f32 %v1038_v53, %v1028_v25  ;;  %v1659_v53 = vmul.f32 %v1658_v61, %v4506_v16  ;;  %vm1290_vm15 = vcmp.gt.f32.partialorder %v4527_v51, 0.0 }
 0x4c3   :  { %v1042_v33 = vadd.f32 %v1039_v38, %v1027_v54 }
 0x4c4   :  { %v1045_v50 = vmax.f32 %v1043_v57, 0.0 }
 0x4c5   :  { %v1044_v24 = vmax.f32 %v1042_v33, 0.0  ;;  %v1335_v33 = vmul.f32 %v1334_v40, %v4506_v16 }
 0x4c7   :  { %3389 = vmatprep.mubr.msk.f32.mxu0 %vm186_vm3, %v1044_v24  ;;  %v1279_v24 = vmul.f32 %v1278_v9, %v4506_v16 }
 0x4c8   :  { %3390 = vmatmul.mubr.msk.f32.vlgmr.msra.gmra.mxu0 %vm186_vm3, %v1045_v50 }
 0x588   :  { %v3391_v56 = vpop.f32.mrf.mxu0 }
 0x589   :  { %3411 = vmatprep.subr.msk.mxu0 %vm740_vm2, %v3391_v56 }
 0x58a   :  { %v1139_v1 = vpop.f32.mrf.mxu0  ;;  %3412 = vmatpush3.msk.msra.mxu0 %vm740_vm2, %v3391_v56 }
 0x58b   :  { %3408 = vmatprep.mubr.msk.f32.mxu1 %vm186_vm3, %v1139_v1  ;;  %3413 = vmatprep.subr.mxu0 %v1139_v1 }
 0x58c   :  { %3409 = vmatmul.mubr.msk.f32.vlgmr.msra.gmra.mxu1 %vm186_vm3, %v3391_v56  ;;  %3414 = vmatpush3.msra.mxu0 %v1139_v1 }
 0x64c   :  { %v3410_v0 = vpop.f32.mrf.mxu1 }
 0x64d   :  { %1486 = vperm.xlu0 %3556, %v3410_v0   ;;  %1268 = vperm.xlu1 %3551, %v3410_v0  }
 0x64e   :  { %v1220_v52 = vpop.f32.mrf.mxu1 }
 0x651   :  { %3558 = vset.pattern.permute.xlu0 %v3800_v23  ;;  %3552 = vset.pattern.permute.xlu1 %v5463_v18 }
 0x652   :  { %1648 = vperm.xlu0 %3558, %v3410_v0   ;;  %1324 = vperm.xlu1 %3552, %v3410_v0  }
 0x656   :  { %3559 = vset.pattern.permute.xlu0 %v5463_v18  ;;  %3553 = vset.pattern.permute.xlu1 %v5460_v12 }
 0x657   :  { %1378 = vperm.xlu1 %3553, %v3410_v0   ;;  %1320 = vperm.xlu0 %3559, %v1220_v52  }
 0x65b   :  { %3554 = vset.pattern.permute.xlu1 %v5458_v19  ;;  %3564 = vset.pattern.permute.xlu0 %v5456_v20 }
 0x65c   :  { %1432 = vperm.xlu1 %3554, %v3410_v0   ;;  %1536 = vperm.xlu0 %3564, %v1220_v52  }
 0x660   :  { %3555 = vset.pattern.permute.xlu1 %v5456_v20  ;;  %3572 = vset.pattern.permute.xlu0 %v5453_v21 }
 0x661   :  { %1540 = vperm.xlu1 %3555, %v3410_v0  }
 0x665   :  { %3557 = vset.pattern.permute.xlu1 %v5454_v22 }
 0x666   :  { %1594 = vperm.xlu1 %3557, %v3410_v0  }
 0x66a   :  { %3560 = vset.pattern.permute.xlu1 %v5462_v13 }
 0x66b   :  { %1263 = vperm.xlu1 %3560, %v1220_v52  }
 0x66f   :  { %3561 = vset.pattern.permute.xlu1 %v5460_v12 }
 0x670   :  { %1374 = vperm.xlu1 %3561, %v1220_v52  }
 0x674   :  { %3562 = vset.pattern.permute.xlu1 %v5458_v19 }
 0x675   :  { %1428 = vperm.xlu1 %3562, %v1220_v52  }
 0x679   :  { %3563 = vset.pattern.permute.xlu1 %v5453_v21  ;;  %v1390_v21 = vmul.f32 %v1388_v14, %v4516_v17 }
 0x67a   :  { %1482 = vperm.xlu1 %3563, %v1220_v52  }
 0x67e   :  { %3565 = vset.pattern.permute.xlu1 %v5454_v22  ;;  %v1442_v22 = vstv %s4509_s2 }
 0x67f   :  { %1590 = vperm.xlu1 %3565, %v1220_v52  }
 0x683   :  { %3566 = vset.pattern.permute.xlu1 %v3800_v23 }
 0x684   :  { %1644 = vperm.xlu1 %3566, %v1220_v52  }
 0x6ad   :  { %1229 = vxpose.xlu1.b32.start [1/2] (short) (narrow) %v1220_v52, 8 }
 0x6b1   :  { %1230 = vxpose.xlu1.b32.end [2/2] (short) (narrow) %v3410_v0, 8 }
 0x6c8   :  { %v1269_v2 = vpop.permute.xlu1 %1268  ;;  %v4501_v27 = vpop.permute.xlu0 %1486 }
 0x6cd   :  { %v1325_v28 = vpop.permute.xlu1 %1324  ;;  %v4511_v35 = vpop.permute.xlu0 %1648 }
 0x6cf   :  { %3567 = vset.pattern.permute.xlu1 %v5462_v13 }
 0x6d2   :  { %v1379_v8 = vpop.permute.xlu1 %1378  ;;  %v1321_v50 = vpop.permute.xlu0 %1320 }
 0x6d7   :  { %v4485_v30 = vpop.permute.xlu1 %1432 }
 0x6dc   :  { %v4487_v41 = vpop.permute.xlu1 %1540 }
 0x6e1   :  { %v4489_v4 = vpop.permute.xlu1 %1594 }
 0x6e6   :  { %v1264_v29 = vpop.permute.xlu1 %1263 }
 0x6eb   :  { %v1375_v39 = vpop.permute.xlu1 %1374 }
 0x6f0   :  { %v4491_v7 = vpop.permute.xlu1 %1428 }
 0x6f5   :  { %v4493_v5 = vpop.permute.xlu1 %1482 }
 0x6fa   :  { %v4499_v26 = vpop.permute.xlu1 %1590 }
 0x6ff   :  { %v1645_v43 = vpop.permute.xlu1 %1644 }
 0x729   :  { %v4529_v58 = vpop.trf.xlu1 }
 0x72a   :  { %v1384_v25 = vrot.slane %v4529_v58, %v3996_v37  ;;  %v1274_v54 = vrot.slane %v4529_v58, %v4012_v42  ;;  %v4543_v38 = vrot.slane %v4529_v58, %v4017_v45  ;;  %v1330_v57 = vrot.slane %v4529_v58, %v4021_v47 }
 0x72c   :  { %v1385_v15 = vadd.f32 %v1384_v25, %v1375_v39  ;;  %v1276_v34 = vadd.f32 %v1274_v54, %v1269_v2  ;;  %v1655_v56 = vadd.f32 %v4543_v38, %v1645_v43  ;;  %v1332_v1 = vadd.f32 %v1330_v57, %v1325_v28 }
 0x72d   :  { %v1331_v0 = vadd.f32 %v1330_v57, %v1321_v50  ;;  %v1275_v52 = vadd.f32 %v1274_v54, %v1264_v29  ;;  %v1386_v9 = vadd.f32 %v1384_v25, %v1379_v8  ;;  %v4558_v2 = vrot.slane %v4529_v58, %v4052_v62 }
 0x72e   :  { %v1391_v20 = vadd.f32 %v1389_v44, %v1385_v15  ;;  %v1282_v19 = vadd.f32 %v1280_v3, %v1276_v34  ;;  %v1661_v12 = vadd.f32 %v1659_v53, %v1655_v56  ;;  %v1338_v13 = vadd.f32 %v1336_v32, %v1332_v1 }
 0x72f   :  { %v1337_v40 = vadd.f32 %v1335_v33, %v1331_v0  ;;  %v1281_v18 = vadd.f32 %v1279_v24, %v1275_v52  ;;  %v1392_v15 = vadd.f32 %v1390_v21, %v1386_v9  ;;  %v1440_v34 = vadd.f32 %v4558_v2, %v4485_v30 }
 0x730   :  { %vm1393_vm0 = vcmp.gt.f32.partialorder %v1391_v20, 0.0  ;;  %v1395_v28 = vmul.f32 0.2, %v1391_v20  ;;  %vm1284_vm1 = vcmp.gt.f32.partialorder %v1282_v19, 0.0  ;;  %v1286_v29 = vmul.f32 0.2, %v1282_v19 }
 0x731   :  { %vm1663_vm8 = vcmp.gt.f32.partialorder %v1661_v12, 0.0  ;;  %v1665_v39 = vmul.f32 0.2, %v1661_v12  ;;  %vm1340_vm9 = vcmp.gt.f32.partialorder %v1338_v13, 0.0  ;;  %v1342_v43 = vmul.f32 0.2, %v1338_v13 }
 0x732   :  { %v1397_v14 = vsel %vm1393_vm0, %v1391_v20, %v1395_v28  ;;  %v1288_v44 = vsel %vm1284_vm1, %v1282_v19, %v1286_v29  ;;  %vm1339_vm10 = vcmp.gt.f32.partialorder %v1337_v40, 0.0  ;;  %v1341_v8 = vmul.f32 0.2, %v1337_v40 }
 0x733   :  { %v4564_v3 = vsel %vm1289_vm14, %v1397_v14, -1e+30  ;;  %v4568_v53 = vsel %vm1290_vm15, %v1288_v44, -1e+30  ;;  %v1667_v32 = vsel %vm1663_vm8, %v1661_v12, %v1665_v39  ;;  %v1344_v25 = vsel %vm1340_vm9, %v1338_v13, %v1342_v43 }
 0x734   :  { %v1401_v54 = vsel %vm332_vm5, %v4564_v3, -inf  ;;  %v1296_v20 = vsel %vm336_vm7, %v4568_v53, -inf  ;;  %v1444_v19 = vmul.f32 %v1442_v22, %v4516_v17  ;;  %v4579_v57 = vsel %vm1289_vm14, %v1667_v32, -1e+30 }
 0x735   :  { %1402 = vmax.xlane.f32.xlu1 %v1401_v54  ;;  %1297 = vmax.xlane.f32.xlu0 %v1296_v20  ;;  %v4583_v33 = vsel %vm1290_vm15, %v1344_v25, -1e+30  ;;  %v4587_v12 = vrot.slane %v4529_v58, %v4055_v63  ;;  %v1550_v13 = vstv %s4554_s29  ;;  %v1343_v24 = vsel %vm1339_vm10, %v1337_v40, %v1341_v8 }
 0x736   :  { %v1285_v50 = vmul.f32 0.2, %v1281_v18  ;;  %vm1283_vm11 = vcmp.gt.f32.partialorder %v1281_v18, 0.0  ;;  %v1671_v56 = vsel %vm332_vm5, %v4579_v57, -inf  ;;  %v1350_v1 = vsel %vm336_vm7, %v4583_v33, -inf }
 0x737   :  { %v4601_v0 = vsel %vm1289_vm14, %v1343_v24, -1e+30  ;;  %v1552_v52 = vmul.f32 %v1550_v13, %v4516_v17  ;;  %v1492_v21 = vrot.slane %v4529_v58, %v4083_v55  ;;  %v1496_v30 = vstv %s4560_s7 }
 0x738   :  { %v1287_v40 = vsel %vm1283_vm11, %v1281_v18, %v1285_v50  ;;  %v1396_v9 = vmul.f32 0.2, %v1392_v15  ;;  %v1446_v28 = vadd.f32 %v1444_v19, %v1440_v34  ;;  %v1548_v29 = vadd.f32 %v4587_v12, %v4487_v41 }
 0x739   :  { %1672 = vmax.xlane.f32.xlu1 %v1671_v56  ;;  %1351 = vmax.xlane.f32.xlu0 %v1350_v1  ;;  %vm1394_vm12 = vcmp.gt.f32.partialorder %v1392_v15, 0.0  ;;  %v1347_v39 = vsel %vm332_vm5, %v4601_v0, -inf  ;;  %v4613_v43 = vsel %vm1289_vm14, %v1287_v40, -1e+30  ;;  %v1498_v14 = vmul.f32 %v1496_v30, %v4516_v17 }
 0x73a   :  { %v1600_v44 = vrot.slane %v4529_v58, %v4108_v6  ;;  %v1604_v18 = vstv %s4590_s0  ;;  %v1398_v8 = vsel %vm1394_vm12, %v1392_v15, %v1396_v9  ;;  %v1450_v32 = vmul.f32 0.2, %v1446_v28 }
 0x73b   :  { %v1554_v25 = vadd.f32 %v1552_v52, %v1548_v29  ;;  %v1494_v41 = vadd.f32 %v1492_v21, %v4501_v27  ;;  %vm1448_vm13 = vcmp.gt.f32.partialorder %v1446_v28, 0.0  ;;  %v1293_v54 = vsel %vm332_vm5, %v4613_v43, -inf }
 0x73c   :  { %v4624_v20 = vsel %vm1290_vm15, %v1398_v8, -1e+30  ;;  %v1606_v19 = vmul.f32 %v1604_v18, %v4516_v17  ;;  %v1452_v24 = vsel %vm1448_vm13, %v1446_v28, %v1450_v32  ;;  %v1602_v15 = vadd.f32 %v1600_v44, %v4489_v4 }
 0x73d   :  { %1348 = vmax.xlane.f32.xlu0 %v1347_v39  ;;  %v1558_v58 = vmul.f32 0.2, %v1554_v25  ;;  %v1500_v50 = vadd.f32 %v1498_v14, %v1494_v41  ;;  %vm1556_vm0 = vcmp.gt.f32.partialorder %v1554_v25, 0.0  ;;  %v1404_v27 = vsel %vm336_vm7, %v4624_v20, -inf }
 0x73e   :  { %v4632_v34 = vsel %vm1290_vm15, %v1452_v24, -1e+30  ;;  %v1443_v56 = vmul.f32 %v1442_v22, %v4506_v16  ;;  %v1608_v40 = vadd.f32 %v1606_v19, %v1602_v15  ;;  %v1439_v9 = vadd.f32 %v4558_v2, %v4491_v7  ;;  %v1537_v2 = vpop.permute.xlu0 %1536 }
 0x73f   :  { %v1560_v1 = vsel %vm1556_vm0, %v1554_v25, %v1558_v58  ;;  %v1504_v52 = vmul.f32 0.2, %v1500_v50  ;;  %vm1502_vm1 = vcmp.gt.f32.partialorder %v1500_v50, 0.0  ;;  %v1458_v4 = vsel %vm336_vm7, %v4632_v34, -inf }
 0x740   :  { %v4643_v28 = vsel %vm1290_vm15, %v1560_v1, -1e+30  ;;  %v1497_v29 = vmul.f32 %v1496_v30, %v4506_v16  ;;  %v1612_v14 = vmul.f32 0.2, %v1608_v40  ;;  %v1445_v22 = vadd.f32 %v1443_v56, %v1439_v9 }
 0x741   :  { %1294 = vmax.xlane.f32.xlu0 %v1293_v54  ;;  %v1506_v39 = vsel %vm1502_vm1, %v1500_v50, %v1504_v52  ;;  %v1493_v8 = vadd.f32 %v1492_v21, %v4493_v5  ;;  %vm1610_vm8 = vcmp.gt.f32.partialorder %v1608_v40, 0.0  ;;  %v1566_v7 = vsel %vm336_vm7, %v4643_v28, -inf }
 0x742   :  { %v4651_v32 = vsel %vm1290_vm15, %v1506_v39, -1e+30  ;;  %v1551_v25 = vmul.f32 %v1550_v13, %v4506_v16  ;;  %v1614_v41 = vsel %vm1610_vm8, %v1608_v40, %v1612_v14  ;;  %v1449_v54 = vmul.f32 0.2, %v1445_v22 }
 0x743   :  { %v1499_v30 = vadd.f32 %v1497_v29, %v1493_v8  ;;  %v1547_v19 = vadd.f32 %v4587_v12, %v1537_v2  ;;  %vm1447_vm9 = vcmp.gt.f32.partialorder %v1445_v22, 0.0  ;;  %v1512_v5 = vsel %vm336_vm7, %v4651_v32, -inf }
 0x744   :  { %v4659_v21 = vsel %vm1290_vm15, %v1614_v41, -1e+30  ;;  %v1605_v24 = vmul.f32 %v1604_v18, %v4506_v16  ;;  %v1451_v58 = vsel %vm1447_vm9, %v1445_v22, %v1449_v54  ;;  %v1601_v15 = vadd.f32 %v1600_v44, %v4499_v26 }
 0x745   :  { %1405 = vmax.xlane.f32.xlu0 %v1404_v27  ;;  %v1503_v50 = vmul.f32 0.2, %v1499_v30  ;;  %v1553_v13 = vadd.f32 %v1551_v25, %v1547_v19  ;;  %vm1501_vm10 = vcmp.gt.f32.partialorder %v1499_v30, 0.0  ;;  %v1620_v12 = vsel %vm336_vm7, %v4659_v21, -inf }
 0x746   :  { %v4667_v27 = vsel %vm1289_vm14, %v1451_v58, -1e+30  ;;  %v1660_v56 = vmul.f32 %v1658_v61, %v4516_v17  ;;  %v1607_v16 = vadd.f32 %v1605_v24, %v1601_v15  ;;  %v1656_v18 = vadd.f32 %v4543_v38, %v4511_v35 }
 0x747   :  { %v1505_v1 = vsel %vm1501_vm10, %v1499_v30, %v1503_v50  ;;  %v1557_v52 = vmul.f32 0.2, %v1553_v13  ;;  %vm1555_vm11 = vcmp.gt.f32.partialorder %v1553_v13, 0.0  ;;  %v1455_v26 = vsel %vm332_vm5, %v4667_v27, -inf }
 0x748   :  { %v4678_v44 = vsel %vm1289_vm14, %v1505_v1, -1e+30  ;;  %v1611_v9 = vmul.f32 0.2, %v1607_v16  ;;  %vm1609_vm12 = vcmp.gt.f32.partialorder %v1607_v16, 0.0 }
 0x749   :  { %1459 = vmax.xlane.f32.xlu0 %v1458_v4  ;;  %v1559_v40 = vsel %vm1555_vm11, %v1553_v13, %v1557_v52  ;;  %v1662_v4 = vadd.f32 %v1660_v56, %v1656_v18  ;;  %v1509_v17 = vsel %vm332_vm5, %v4678_v44, -inf }
 0x74a   :  { %v4684_v35 = vsel %vm1289_vm14, %v1559_v40, -1e+30  ;;  %v1613_v61 = vsel %vm1609_vm12, %v1607_v16, %v1611_v9 }
 0x74b   :  { %v1666_v38 = vmul.f32 0.2, %v1662_v4  ;;  %vm1664_vm13 = vcmp.gt.f32.partialorder %v1662_v4, 0.0  ;;  %v1563_v29 = vsel %vm332_vm5, %v4684_v35, -inf  ;;  %v4690_v39 = vsel %vm1289_vm14, %v1613_v61, -1e+30 }
 0x74c   :  { %v1617_v22 = vsel %vm332_vm5, %v4690_v39, -inf }
 0x74d   :  { %1567 = vmax.xlane.f32.xlu0 %v1566_v7  ;;  %v1668_v14 = vsel %vm1664_vm13, %v1662_v4, %v1666_v38 }
 0x74e   :  { %v4696_v8 = vsel %vm1290_vm15, %v1668_v14, -1e+30 }
 0x74f   :  { %v1674_v7 = vsel %vm336_vm7, %v4696_v8, -inf }
 0x751   :  { %1513 = vmax.xlane.f32.xlu0 %v1512_v5 }
 0x755   :  { %1621 = vmax.xlane.f32.xlu0 %v1620_v12 }
 0x759   :  { %1456 = vmax.xlane.f32.xlu0 %v1455_v26 }
 0x75d   :  { %1510 = vmax.xlane.f32.xlu0 %v1509_v17 }
 0x761   :  { %1564 = vmax.xlane.f32.xlu0 %v1563_v29 }
 0x765   :  { %1618 = vmax.xlane.f32.xlu0 %v1617_v22 }
 0x769   :  { %1675 = vmax.xlane.f32.xlu0 %v1674_v7 }
 0x7be   :  { %v1298_v2 = vpop.xlane.xlu0 %1297 }
 0x7bf   :  { %v1300_v25 = vsub.f32 %v4568_v53, %v1298_v2 }
 0x7c1   :  { %v1303_v41 = vmul.f32 1.442695, %v1300_v25 }
 0x7c2   :  { %v1352_v54 = vpop.xlane.xlu0 %1351 }
 0x7c3   :  { %v1354_v30 = vsub.f32 %v4583_v33, %v1352_v54  ;;  %3648 = vpow2.f32 %v1303_v41 }
 0x7c5   :  { %v1357_v19 = vmul.f32 1.442695, %v1354_v30 }
 0x7c6   :  { %v1349_v5 = vpop.xlane.xlu0 %1348 }
 0x7c7   :  { %3650 = vpow2.f32 %v1357_v19  ;;  %v1353_v56 = vsub.f32 %v4601_v0, %v1349_v5 }
 0x7c9   :  { %v1355_v26 = vmul.f32 1.442695, %v1353_v56 }
 0x7ca   :  { %v1295_v24 = vpop.xlane.xlu0 %1294 }
 0x7cb   :  { %v1299_v58 = vsub.f32 %v4613_v43, %v1295_v24  ;;  %v1403_v43 = vpop.xlane.xlu1 %1402 }
 0x7cc   :  { %v1407_v9 = vsub.f32 %v4564_v3, %v1403_v43 }
 0x7cd   :  { %v1301_v1 = vmul.f32 1.442695, %v1299_v58 }
 0x7ce   :  { %v1406_v50 = vpop.xlane.xlu0 %1405  ;;  %v1409_v38 = vmul.f32 1.442695, %v1407_v9 }
 0x7cf   :  { %v1408_v13 = vsub.f32 %v4624_v20, %v1406_v50  ;;  %v1673_v30 = vpop.xlane.xlu1 %1672 }
 0x7d0   :  { %v3649_v15 = vpop.eup %3648  ;;  %v1677_v24 = vsub.f32 %v4579_v57, %v1673_v30 }
 0x7d1   :  { %v1411_v12 = vmul.f32 1.442695, %v1408_v13  ;;  %v4707_v52 = vsel %vm1290_vm15, %v3649_v15, 0.0 }
 0x7d2   :  { %v1460_v53 = vpop.xlane.xlu0 %1459  ;;  %v1310_v16 = vsel %vm336_vm7, %v4707_v52, 0.0  ;;  %v1679_v57 = vmul.f32 1.442695, %v1677_v24 }
 0x7d3   :  { %3652 = vpow2.f32 %v1411_v12  ;;  %v1462_v33 = vsub.f32 %v4632_v34, %v1460_v53  ;;  %1311 = vadd.xlane.f32.xlu1 %v1310_v16 }
 0x7d4   :  { %v3651_v18 = vpop.eup %3650  ;;  %3654 = vpow2.f32 %v1301_v1 }
 0x7d5   :  { %v1465_v20 = vmul.f32 1.442695, %v1462_v33  ;;  %v4714_v0 = vsel %vm1290_vm15, %v3651_v18, 0.0 }
 0x7d6   :  { %v1568_v40 = vpop.xlane.xlu0 %1567  ;;  %v1364_v34 = vsel %vm336_vm7, %v4714_v0, 0.0 }
 0x7d7   :  { %3656 = vpow2.f32 %v1465_v20  ;;  %v1570_v4 = vsub.f32 %v4643_v28, %v1568_v40  ;;  %1365 = vadd.xlane.f32.xlu0 %v1364_v34 }
 0x7d8   :  { %3658 = vpow2.f32 %v1355_v26 }
 0x7d9   :  { %v1573_v17 = vmul.f32 1.442695, %v1570_v4 }
 0x7da   :  { %v1514_v61 = vpop.xlane.xlu0 %1513 }
 0x7db   :  { %3660 = vpow2.f32 %v1573_v17  ;;  %v1516_v29 = vsub.f32 %v4651_v32, %v1514_v61 }
 0x7dc   :  { %3662 = vpow2.f32 %v1409_v38 }
 0x7dd   :  { %v1519_v2 = vmul.f32 1.442695, %v1516_v29 }
 0x7de   :  { %v1622_v14 = vpop.xlane.xlu0 %1621 }
 0x7df   :  { %v1624_v22 = vsub.f32 %v4659_v21, %v1622_v14 }
 0x7e0   :  { %v3653_v7 = vpop.eup %3652 }
 0x7e1   :  { %v1627_v3 = vmul.f32 1.442695, %v1624_v22  ;;  %v4724_v28 = vsel %vm1290_vm15, %v3653_v7, 0.0  ;;  %v3655_v54 = vpop.eup %3654 }
 0x7e2   :  { %v1457_v25 = vpop.xlane.xlu0 %1456  ;;  %v1418_v41 = vsel %vm336_vm7, %v4724_v28, 0.0 }
 0x7e3   :  { %3664 = vpow2.f32 %v1627_v3  ;;  %v1461_v32 = vsub.f32 %v4667_v27, %v1457_v25  ;;  %1419 = vadd.xlane.f32.xlu0 %v1418_v41  ;;  %v4739_v27 = vsel %vm1289_vm14, %v3655_v54, 0.0 }
 0x7e4   :  { %v3657_v19 = vpop.eup %3656  ;;  %3666 = vpow2.f32 %v1519_v2  ;;  %v1307_v33 = vsel %vm332_vm5, %v4739_v27, 0.0 }
 0x7e5   :  { %v1463_v5 = vmul.f32 1.442695, %v1461_v32  ;;  %v4731_v21 = vsel %vm1290_vm15, %v3657_v19, 0.0  ;;  %v3659_v13 = vpop.eup %3658 }
 0x7e6   :  { %v1511_v58 = vpop.xlane.xlu0 %1510  ;;  %v1472_v50 = vsel %vm336_vm7, %v4731_v21, 0.0  ;;  %v4752_v43 = vsel %vm1289_vm14, %v3659_v13, 0.0 }
 0x7e7   :  { %3668 = vpow2.f32 %v1463_v5  ;;  %v1515_v15 = vsub.f32 %v4678_v44, %v1511_v58  ;;  %1473 = vadd.xlane.f32.xlu0 %v1472_v50  ;;  %v1361_v40 = vsel %vm332_vm5, %v4752_v43, 0.0 }
 0x7e8   :  { %v3661_v12 = vpop.eup %3660 }
 0x7e9   :  { %v1517_v56 = vmul.f32 1.442695, %v1515_v15  ;;  %v4743_v1 = vsel %vm1290_vm15, %v3661_v12, 0.0  ;;  %v3663_v18 = vpop.eup %3662 }
 0x7ea   :  { %v1565_v53 = vpop.xlane.xlu0 %1564  ;;  %v1580_v16 = vsel %vm336_vm7, %v4743_v1, 0.0 }
 0x7eb   :  { %3670 = vpow2.f32 %v1517_v56  ;;  %v1569_v44 = vsub.f32 %v4684_v35, %v1565_v53  ;;  %1308 = vadd.xlane.f32.xlu0 %v1307_v33  ;;  %1581 = vadd.xlane.f32.xlu1 %v1580_v16  ;;  %v4759_v35 = vsel %vm1289_vm14, %v3663_v18, 0.0 }
 0x7ec   :  { %3672 = vpow2.f32 %v1679_v57  ;;  %v1415_v38 = vsel %vm332_vm5, %v4759_v35, 0.0 }
 0x7ed   :  { %v1571_v20 = vmul.f32 1.442695, %v1569_v44 }
 0x7ee   :  { %v1619_v26 = vpop.xlane.xlu0 %1618 }
 0x7ef   :  { %3674 = vpow2.f32 %v1571_v20  ;;  %v1623_v9 = vsub.f32 %v4690_v39, %v1619_v26  ;;  %1362 = vadd.xlane.f32.xlu1 %v1361_v40 }
 0x7f0   :  { %v3665_v4 = vpop.eup %3664 }
 0x7f1   :  { %v1625_v34 = vmul.f32 1.442695, %v1623_v9  ;;  %v4763_v17 = vsel %vm1290_vm15, %v3665_v4, 0.0  ;;  %v3667_v14 = vpop.eup %3666 }
 0x7f2   :  { %v1676_v61 = vpop.xlane.xlu0 %1675  ;;  %v1634_v29 = vsel %vm336_vm7, %v4763_v17, 0.0  ;;  %v4778_v25 = vsel %vm1290_vm15, %v3667_v14, 0.0 }
 0x7f3   :  { %3676 = vpow2.f32 %v1625_v34  ;;  %v1678_v39 = vsub.f32 %v4696_v8, %v1676_v61  ;;  %1416 = vadd.xlane.f32.xlu1 %v1415_v38  ;;  %1635 = vadd.xlane.f32.xlu0 %v1634_v29  ;;  %v1526_v8 = vsel %vm336_vm7, %v4778_v25, 0.0 }
 0x7f4   :  { %v3669_v22 = vpop.eup %3668 }
 0x7f5   :  { %v1681_v7 = vmul.f32 1.442695, %v1678_v39  ;;  %v4772_v3 = vsel %vm1289_vm14, %v3669_v22, 0.0 }
 0x7f6   :  { %v1469_v2 = vsel %vm332_vm5, %v4772_v3, 0.0 }
 0x7f7   :  { %3678 = vpow2.f32 %v1681_v7  ;;  %1470 = vadd.xlane.f32.xlu1 %v1469_v2 }
 0x7f8   :  { %v3671_v41 = vpop.eup %3670 }
 0x7f9   :  { %v3673_v54 = vpop.eup %3672  ;;  %v4784_v30 = vsel %vm1289_vm14, %v3671_v41, 0.0 }
 0x7fa   :  { %v1523_v5 = vsel %vm332_vm5, %v4784_v30, 0.0  ;;  %v4796_v58 = vsel %vm1289_vm14, %v3673_v54, 0.0 }
 0x7fb   :  { %1527 = vadd.xlane.f32.xlu1 %v1526_v8  ;;  %v1685_v15 = vsel %vm332_vm5, %v4796_v58, 0.0 }
 0x7fc   :  { %v3675_v32 = vpop.eup %3674 }
 0x7fd   :  { %v4788_v19 = vsel %vm1289_vm14, %v3675_v32, 0.0 }
 0x7fe   :  { %v1577_v24 = vsel %vm332_vm5, %v4788_v19, 0.0 }
 0x7ff   :  { %1524 = vadd.xlane.f32.xlu1 %v1523_v5  ;;  %1578 = vadd.xlane.f32.xlu0 %v1577_v24 }
 0x800   :  { %v3677_v50 = vpop.eup %3676 }
 0x801   :  { %v4800_v13 = vsel %vm1289_vm14, %v3677_v50, 0.0 }
 0x802   :  { %v1631_v12 = vsel %vm332_vm5, %v4800_v13, 0.0 }
 0x803   :  { %1686 = vadd.xlane.f32.xlu1 %v1685_v15  ;;  %1632 = vadd.xlane.f32.xlu0 %v1631_v12 }
 0x804   :  { %v3679_v56 = vpop.eup %3678 }
 0x805   :  { %v4808_v57 = vsel %vm1290_vm15, %v3679_v56, 0.0 }
 0x806   :  { %v1688_v53 = vsel %vm336_vm7, %v4808_v57, 0.0 }
 0x807   :  { %1689 = vadd.xlane.f32.xlu0 %v1688_v53 }
 0x85c   :  { %v1312_v44 = vpop.xlane.xlu1 %1311 }
 0x85d   :  { %v1314_v40 = vmax.f32 %v1312_v44, 1e-20 }
 0x860   :  { %v1366_v33 = vpop.xlane.xlu0 %1365 }
 0x861   :  { %v1368_v4 = vmax.f32 %v1366_v33, 1e-20 }
 0x86c   :  { %v1420_v16 = vpop.xlane.xlu0 %1419 }
 0x86d   :  { %v1422_v61 = vmax.f32 %v1420_v16, 1e-20 }
 0x870   :  { %v1474_v18 = vpop.xlane.xlu0 %1473 }
 0x871   :  { %v1476_v29 = vmax.f32 %v1474_v18, 1e-20 }
 0x874   :  { %v1582_v20 = vpop.xlane.xlu1 %1581  ;;  %v1309_v26 = vpop.xlane.xlu0 %1308 }
 0x875   :  { %v1313_v9 = vmax.f32 %v1309_v26, 1e-20  ;;  %v1584_v41 = vmax.f32 %v1582_v20, 1e-20 }
 0x877   :  { %3680 = vrcp.f32 %v1313_v9 }
 0x878   :  { %v1363_v34 = vpop.xlane.xlu1 %1362  ;;  %3682 = vrcp.f32 %v1314_v40 }
 0x879   :  { %v1367_v38 = vmax.f32 %v1363_v34, 1e-20  ;;  %3684 = vrcp.f32 %v1368_v4 }
 0x87b   :  { %3686 = vrcp.f32 %v1367_v38 }
 0x87c   :  { %v1417_v14 = vpop.xlane.xlu1 %1416  ;;  %3688 = vrcp.f32 %v1422_v61  ;;  %v1636_v2 = vpop.xlane.xlu0 %1635 }
 0x87d   :  { %v1421_v39 = vmax.f32 %v1417_v14, 1e-20  ;;  %3690 = vrcp.f32 %v1476_v29  ;;  %v1638_v32 = vmax.f32 %v1636_v2, 1e-20 }
 0x87f   :  { %3692 = vrcp.f32 %v1421_v39 }
 0x880   :  { %v1471_v22 = vpop.xlane.xlu1 %1470 }
 0x881   :  { %v1475_v7 = vmax.f32 %v1471_v22, 1e-20 }
 0x883   :  { %3694 = vrcp.f32 %v1475_v7 }
 0x884   :  { %v1528_v8 = vpop.xlane.xlu1 %1527  ;;  %v3681_v54 = vpop.eup %3680  ;;  %3696 = vrcp.f32 %v1584_v41 }
 0x885   :  { %v3683_v5 = vpop.eup %3682  ;;  %v1530_v24 = vmax.f32 %v1528_v8, 1e-20  ;;  %v1316_v50 = vmul.f32 %v3681_v54, %v4739_v27  ;;  %3698 = vrcp.f32 %v1638_v32 }
 0x886   :  { %v3685_v15 = vpop.eup %3684  ;;  %v1318_v27 = vmul.f32 %v3683_v5, %v4707_v52 }
 0x887   :  { %3415 = vmatprep.mubr.msk.f32.mxu0 %vm332_vm5, %v1316_v50  ;;  %3700 = vrcp.f32 %v1530_v24  ;;  %v1372_v20 = vmul.f32 %v3685_v15, %v4714_v0 }
 0x888   :  { %v3687_v12 = vpop.eup %3686  ;;  %v1525_v56 = vpop.xlane.xlu1 %1524 }
 0x889   :  { %v1579_v53 = vpop.xlane.xlu0 %1578  ;;  %v1529_v33 = vmax.f32 %v1525_v56, 1e-20  ;;  %v1370_v44 = vmul.f32 %v3687_v12, %v4752_v43  ;;  %v3689_v18 = vpop.eup %3688  ;;  %v1700_v43 = vrot.slane %v1372_v20, 6 }
 0x88a   :  { %v1583_v16 = vmax.f32 %v1579_v53, 1e-20  ;;  %v3691_v26 = vpop.eup %3690  ;;  %v1426_v0 = vmul.f32 %v3689_v18, %v4724_v28 }
 0x88b   :  { %3702 = vrcp.f32 %v1529_v33  ;;  %v1699_v40 = vrot.slane %v1370_v44, 6  ;;  %v1480_v52 = vmul.f32 %v3691_v26, %v4731_v21 }
 0x88c   :  { %v3693_v9 = vpop.eup %3692  ;;  %3704 = vrcp.f32 %v1583_v16  ;;  %v1687_v4 = vpop.xlane.xlu1 %1686 }
 0x88d   :  { %v1633_v34 = vpop.xlane.xlu0 %1632  ;;  %v1691_v61 = vmax.f32 %v1687_v4, 1e-20  ;;  %v1737_v29 = vsel %vm740_vm2, %v1318_v27, %v1699_v40  ;;  %v1424_v14 = vmul.f32 %v3693_v9, %v4759_v35  ;;  %v1701_v2 = vsel %vm740_vm2, %v1699_v40, %v1700_v43  ;;  %v1977_v43 = vld [vmem:[%s5440_s14 + $0x38] sm:$0xff] }
 0x88e   :  { %v1637_v38 = vmax.f32 %v1633_v34, 1e-20  ;;  %3416 = vmatmul.mubr.msk.f32.vlgmr.msra.gmra.mxu0 %vm332_vm5, %v1737_v29  ;;  %v1707_v35 = vrot.slane %v1426_v0, 4  ;;  %v1714_v28 = vrot.slane %v1480_v52, 2  ;;  %3430 = vmatprep.subr.mxu1 %v1977_v43  ;;  %v1975_v0 = vld [vmem:[%s5440_s14 + $0x28] sm:$0xff]  ;;  %v1973_v52 = vld [vmem:[%s5440_s14 + $0x18] sm:$0xff] }
 0x88f   :  { %3706 = vrcp.f32 %v1691_v61  ;;  %v1706_v39 = vrot.slane %v1424_v14, 4  ;;  %3431 = vmatpush3.msra.mxu1 %v1977_v43 }
 0x890   :  { %v3695_v22 = vpop.eup %3694  ;;  %3708 = vrcp.f32 %v1637_v38 }
 0x891   :  { %v1690_v7 = vpop.xlane.xlu0 %1689  ;;  %v1738_v8 = vsel %vm748_vm4, %v1701_v2, %v1706_v39  ;;  %v1478_v54 = vmul.f32 %v3695_v22, %v4772_v3  ;;  %v1708_v5 = vsel %vm748_vm4, %v1706_v39, %v1707_v35  ;;  %v3697_v24 = vpop.eup %3696  ;;  %v1974_v39 = vld [vmem:[%s5440_s14 + $0x20] sm:$0xff]  ;;  %v1972_v22 = vld [vmem:[%s5440_s14 + $0x10] sm:$0xff] }
 0x892   :  { %v1692_v41 = vmax.f32 %v1690_v7, 1e-20  ;;  %3418 = vmatprep.mubr.msk.f32.mxu0 %vm332_vm5, %v1738_v8  ;;  %v3699_v15 = vpop.eup %3698  ;;  %v1588_v16 = vmul.f32 %v3697_v24, %v4743_v1  ;;  %v1985_v7 = vld [vmem:[%s5441_s15 + $0x38] sm:$0xff]  ;;  %v1984_v2 = vld [vmem:[%s5441_s15 + $0x30] sm:$0xff]  ;;  %v1983_v8 = vld [vmem:[%s5441_s15 + $0x28] sm:$0xff] }
 0x893   :  { %v1713_v32 = vrot.slane %v1478_v54, 2  ;;  %v1642_v26 = vmul.f32 %v3699_v15, %v4763_v17  ;;  %3449 = vmatprep.subr.mxu0 %v1985_v7  ;;  %v1970_v54 = vld [vmem:[%s5440_s14] sm:$0xff] }
 0x894   :  { %3710 = vrcp.f32 %v1692_v41  ;;  %v3701_v12 = vpop.eup %3700  ;;  %v1971_v41 = vld [vmem:[%s5440_s14 + $0x8] sm:$0xff]  ;;  %3450 = vmatpush3.msra.mxu0 %v1985_v7  ;;  %v1982_v35 = vld [vmem:[%s5441_s15 + $0x20] sm:$0xff] }
 0x895   :  { %v1739_v21 = vsel %vm756_vm6, %v1708_v5, %v1713_v32  ;;  %v1715_v50 = vsel %vm756_vm6, %v1713_v32, %v1714_v28  ;;  %v1534_v18 = vmul.f32 %v3701_v12, %v4778_v25  ;;  %v1727_v1 = vrot.slane %v1642_v26, 4  ;;  %3451 = vmatprep.subr.mxu0 %v1984_v2  ;;  %v1981_v32 = vld [vmem:[%s5441_s15 + $0x18] sm:$0xff]  ;;  %v1980_v28 = vld [vmem:[%s5441_s15 + $0x10] sm:$0xff]  ;;  %v1979_v5 = vld [vmem:[%s5441_s15 + $0x8] sm:$0xff] }
 0x896   :  { %3419 = vmatmul.mubr.msk.f32.gmra.mxu0 %vm332_vm5, %v1739_v21 }
 0x897   :  { %3421 = vmatprep.mubr.msk.f32.mxu0 %vm332_vm5, %v1715_v50  ;;  %3452 = vmatpush3.msra.mxu0 %v1984_v2 }
 0x898   :  { %v3703_v3 = vpop.eup %3702  ;;  %3453 = vmatprep.subr.mxu0 %v1983_v8 }
 0x899   :  { %v3705_v56 = vpop.eup %3704  ;;  %v1532_v53 = vmul.f32 %v3703_v3, %v4784_v30  ;;  %v1720_v30 = vrot.slane %v1588_v16, 6  ;;  %3454 = vmatpush3.msra.mxu0 %v1983_v8 }
 0x89a   :  { %v1586_v33 = vmul.f32 %v3705_v56, %v4788_v19  ;;  %3455 = vmatprep.subr.mxu0 %v1982_v35  ;;  %v3193_v56 = vld [vmem:[%s5439_s13] ss:$0 sm:$0xff] }
 0x89b   :  { %3422 = vmatmul.mubr.msk.f32.gmra.mxu0 %vm332_vm5, %v1532_v53 }
 0x89c   :  { %v3707_v44 = vpop.eup %3706  ;;  %v1719_v20 = vrot.slane %v1586_v33, 6  ;;  %3456 = vmatpush3.msra.mxu0 %v1982_v35 }
 0x89d   :  { %v3709_v27 = vpop.eup %3708  ;;  %v1694_v40 = vmul.f32 %v3707_v44, %v4796_v58  ;;  %3457 = vmatprep.subr.mxu0 %v1981_v32 }
 0x89e   :  { %v1740_v9 = vsel %vm740_vm2, %v1534_v18, %v1719_v20  ;;  %v1640_v4 = vmul.f32 %v3709_v27, %v4800_v13  ;;  %v1721_v38 = vsel %vm740_vm2, %v1719_v20, %v1720_v30  ;;  %3458 = vmatpush3.msra.mxu0 %v1981_v32 }
 0x89f   :  { %3424 = vmatprep.mubr.msk.f32.mxu0 %vm332_vm5, %v1740_v9  ;;  %v1733_v19 = vrot.slane %v1694_v40, 2  ;;  %3459 = vmatprep.subr.mxu0 %v1980_v28 }
 0x8a0   :  { %v1726_v61 = vrot.slane %v1640_v4, 4  ;;  %3460 = vmatpush3.msra.mxu0 %v1980_v28 }
 0x8a1   :  { %v3711_v34 = vpop.eup %3710  ;;  %3461 = vmatprep.subr.mxu0 %v1979_v5 }
 0x8a2   :  { %v1696_v25 = vmul.f32 %v3711_v34, %v4808_v57  ;;  %v1741_v17 = vsel %vm748_vm4, %v1721_v38, %v1726_v61  ;;  %v1728_v29 = vsel %vm748_vm4, %v1726_v61, %v1727_v1  ;;  %v1976_v57 = vld [vmem:[%s5440_s14 + $0x30] sm:$0xff]  ;;  %3462 = vmatpush3.msra.mxu0 %v1979_v5 }
 0x8a3   :  { %3425 = vmatmul.mubr.msk.f32.gmra.mxu0 %vm332_vm5, %v1741_v17  ;;  %v1742_v58 = vsel %vm756_vm6, %v1728_v29, %v1733_v19  ;;  %3432 = vmatprep.subr.mxu1 %v1976_v57 }
 0x8a4   :  { %v1734_v13 = vrot.slane %v1696_v25, 2  ;;  %3427 = vmatprep.mubr.msk.f32.mxu0 %vm332_vm5, %v1742_v58  ;;  %3433 = vmatpush3.msra.mxu1 %v1976_v57 }
 0x8a5   :  { %3434 = vmatprep.subr.mxu1 %v1975_v0 }
 0x8a6   :  { %v1735_v14 = vsel %vm756_vm6, %v1733_v19, %v1734_v13  ;;  %3435 = vmatpush3.msra.mxu1 %v1975_v0 }
 0x8a7   :  { %3428 = vmatmul.mubr.msk.f32.gmra.mxu0 %vm332_vm5, %v1735_v14  ;;  %3436 = vmatprep.subr.mxu1 %v1974_v39 }
 0x8a8   :  { %3437 = vmatpush3.msra.mxu1 %v1974_v39 }
 0x8a9   :  { %3438 = vmatprep.subr.mxu1 %v1973_v52 }
 0x8aa   :  { %3439 = vmatpush3.msra.mxu1 %v1973_v52 }
 0x8ab   :  { %3440 = vmatprep.subr.mxu1 %v1972_v22 }
 0x8ac   :  { %3441 = vmatpush3.msra.mxu1 %v1972_v22 }
 0x8ad   :  { %3442 = vmatprep.subr.mxu1 %v1971_v41 }
 0x8ae   :  { %3443 = vmatpush3.msra.mxu1 %v1971_v41 }
 0x8af   :  { %3444 = vmatprep.subr.mxu1 %v1970_v54 }
 0x8b0   :  { %3445 = vmatpush3.msra.mxu1 %v1970_v54 }
 0x94e   :  { %v3417_v24 = vpop.f32.mrf.mxu0 }
 0x94f   :  { %v1898_v15 = vmul.f32 %v3417_v24, %v4409_v10  ;;  %v1889_v12 = vmul.f32 %v3417_v24, %v4412_v11 }
 0x950   :  { %v1839_v21 = vpop.f32.mrf.mxu0 }
 0x951   :  { %v1888_v53 = vmul.f32 %v1839_v21, %v4412_v11  ;;  %v1902_v44 = vrot.slane %v1898_v15, 2  ;;  %v1897_v26 = vadd.f32 %v3193_v56, %v1889_v12 }
 0x953   :  { %v1896_v40 = vadd.f32 %v3193_v56, %v1888_v53 }
 0x956   :  { %v3420_v50 = vpop.f32.mrf.mxu0 }
 0x957   :  { %v1910_v27 = vmul.f32 %v3420_v50, %v4417_v31  ;;  %v1920_v30 = vmul.f32 %v3420_v50, %v4425_v60 }
 0x958   :  { %v1849_v3 = vpop.f32.mrf.mxu0 }
 0x959   :  { %v1899_v33 = vmul.f32 %v1849_v3, %v4409_v10  ;;  %v1909_v16 = vmul.f32 %v1849_v3, %v4417_v31  ;;  %v1914_v38 = vrot.slane %v1910_v27, 4  ;;  %v1924_v17 = vrot.slane %v1920_v30, 6  ;;  %v1978_v30 = vld [vmem:[%s5441_s15] sm:$0xff]  ;;  %s4954_s15 = sld [smem:[#allocation3 + $0x101]] }
 0x95a   :  { %3463 = vmatprep.subr.mxu0 %v1978_v30 }
 0x95b   :  { %v1903_v18 = vrot.slane %v1899_v33, 2  ;;  %v3423_v20 = vpop.f32.mrf.mxu0  ;;  %v1913_v34 = vrot.slane %v1909_v16, 4  ;;  %3464 = vmatpush3.msra.mxu0 %v1978_v30 }
 0x95c   :  { %v1931_v32 = vmul.f32 %v3423_v20, %v4437_v49 }
 0x95d   :  { %v1904_v9 = vsel %vm756_vm6, %v1902_v44, %v1903_v18  ;;  %v1859_v4 = vpop.f32.mrf.mxu0  ;;  %v1908_v19 = vadd.f32 %v1903_v18, %v1897_v26  ;;  %v1915_v29 = vsel %vm748_vm4, %v1913_v34, %v1914_v38 }
 0x95e   :  { %v1921_v61 = vmul.f32 %v1859_v4, %v4425_v60  ;;  %v1907_v1 = vadd.f32 %v1904_v9, %v1896_v40 }
 0x95f   :  { %v1919_v58 = vadd.f32 %v1914_v38, %v1908_v19 }
 0x960   :  { %v1925_v25 = vrot.slane %v1921_v61, 6  ;;  %v1918_v13 = vadd.f32 %v1915_v29, %v1907_v1  ;;  %v5477_v1 = vmov 9   ;;  %v5480_v29 = vmov 11  }
 0x962   :  { %v1926_v43 = vsel %vm740_vm2, %v1924_v17, %v1925_v25  ;;  %v1930_v39 = vadd.f32 %v1925_v25, %v1919_v58  ;;  %v5478_v25 = vmov 8   ;;  %v5479_v17 = vmov 10  }
 0x963   :  { %v3426_v14 = vpop.f32.mrf.mxu0  ;;  %v1929_v7 = vadd.f32 %v1926_v43, %v1918_v13  ;;  %v5481_v58 = vmov 13   ;;  %v5482_v13 = vmov 14  }
 0x964   :  { %v1936_v57 = vmul.f32 %v3426_v14, %v4433_v48  ;;  %v1946_v8 = vmul.f32 %v3426_v14, %v4440_v36  ;;  %v5483_v14 = vmov 12  }
 0x965   :  { %v1869_v0 = vpop.f32.mrf.mxu0  ;;  %v1933_v50 = vadd.f32 %v1931_v32, %v1929_v7  ;;  %v2198_v32 = vstv %s4956_s25 }
 0x966   :  { %v1932_v52 = vmul.f32 %v1869_v0, %v4437_v49  ;;  %v1935_v22 = vmul.f32 %v1869_v0, %v4433_v48  ;;  %v1940_v41 = vrot.slane %v1936_v57, 2  ;;  %v1950_v12 = vrot.slane %v1946_v8, 4 }
 0x967   :  { %v3429_v2 = vpop.f32.mrf.mxu0 }
 0x968   :  { %v1934_v54 = vadd.f32 %v1932_v52, %v1930_v39  ;;  %v1939_v35 = vrot.slane %v1935_v22, 2  ;;  %v1958_v24 = vmul.f32 %v3429_v2, %v4447_v59 }
 0x969   :  { %v1879_v28 = vpop.f32.mrf.mxu0 }
 0x96a   :  { %v1941_v5 = vsel %vm756_vm6, %v1939_v35, %v1940_v41  ;;  %v1947_v21 = vmul.f32 %v1879_v28, %v4440_v36  ;;  %v1957_v15 = vmul.f32 %v1879_v28, %v4447_v59  ;;  %v1945_v3 = vadd.f32 %v1940_v41, %v1934_v54 }
 0x96b   :  { %v1944_v53 = vadd.f32 %v1941_v5, %v1933_v50  ;;  %v1962_v16 = vrot.slane %v1958_v24, 6  ;;  %v2252_v35 = vstv %s4954_s15  ;;  %v2576_v28 = vstv %s4958_s26 }
 0x96c   :  { %v1951_v56 = vrot.slane %v1947_v21, 4  ;;  %v1961_v33 = vrot.slane %v1957_v15, 6  ;;  %v2306_v5 = vstv %s4960_s8  ;;  %v2360_v24 = vstv %s4962_s27  ;;  %v4980_v21 = vld [vmem:[%s5475_s24 + $0x8] sm:$0x3] }
 0x96d   :  { %v2254_v50 = vmul.f32 %v4980_v21, %v2252_v35  ;;  %v2200_v15 = vmul.f32 %v4980_v21, %v2198_v32 }
 0x96e   :  { %v1952_v44 = vsel %vm748_vm4, %v1950_v12, %v1951_v56  ;;  %v1956_v18 = vadd.f32 %v1951_v56, %v1945_v3  ;;  %v1963_v26 = vsel %vm740_vm2, %v1961_v33, %v1962_v16  ;;  %v2468_v12 = vstv %s4966_s11  ;;  %v4992_v56 = vld [vmem:[%s5475_s24] sm:$0xff] }
 0x96f   :  { %v1955_v20 = vadd.f32 %v1952_v44, %v1944_v53  ;;  %v2577_v53 = vmul.f32 %v4992_v56, %v2576_v28  ;;  %v2308_v33 = vmul.f32 %v4980_v21, %v2306_v5  ;;  %v2414_v44 = vstv %s4968_s3 }
 0x970   :  { %v1967_v27 = vadd.f32 %v1962_v16, %v1956_v18  ;;  %v2362_v16 = vmul.f32 %v4980_v21, %v2360_v24 }
 0x971   :  { %v1966_v40 = vadd.f32 %v1963_v26, %v1955_v20 }
 0x972   :  { %v1969_v4 = vmax.f32 %v1967_v27, 0.0 }
 0x973   :  { %v1968_v9 = vmax.f32 %v1966_v40, 0.0 }
 0x975   :  { %3446 = vmatprep.mubr.msk.f32.mxu1 %vm186_vm3, %v1968_v9 }
 0x976   :  { %3447 = vmatmul.mubr.msk.f32.vlgmr.msra.gmra.mxu1 %vm186_vm3, %v1969_v4  ;;  %v2470_v4 = vmul.f32 %v4980_v21, %v2468_v12 }
 0xa36   :  { %v3448_v19 = vpop.f32.mrf.mxu1 }
 0xa37   :  { %3468 = vmatprep.subr.msk.mxu1 %vm740_vm2, %v3448_v19 }
 0xa38   :  { %v2059_v34 = vpop.f32.mrf.mxu1  ;;  %3469 = vmatpush3.msk.msra.mxu1 %vm740_vm2, %v3448_v19 }
 0xa39   :  { %3465 = vmatprep.mubr.msk.f32.mxu0 %vm186_vm3, %v2059_v34  ;;  %3470 = vmatprep.subr.mxu1 %v2059_v34 }
 0xa3a   :  { %3466 = vmatmul.mubr.msk.f32.vlgmr.msra.gmra.mxu0 %vm186_vm3, %v3448_v19  ;;  %3471 = vmatpush3.msra.mxu1 %v2059_v34  ;;  %v2522_v34 = vstv %s4972_s28 }
 0xafa   :  { %v3467_v61 = vpop.f32.mrf.mxu0 }
 0xafb   :  { %2404 = vperm.xlu0 %3572, %v3467_v61   ;;  %2188 = vperm.xlu1 %3567, %v3467_v61  }
 0xafc   :  { %v2140_v38 = vpop.f32.mrf.mxu0 }
 0xaff   :  { %3574 = vset.pattern.permute.xlu0 %v3800_v23  ;;  %3568 = vset.pattern.permute.xlu1 %v5477_v1 }
 0xb00   :  { %2566 = vperm.xlu0 %3574, %v3467_v61   ;;  %2242 = vperm.xlu1 %3568, %v3467_v61  }
 0xb04   :  { %3576 = vset.pattern.permute.xlu0 %v5478_v25  ;;  %3569 = vset.pattern.permute.xlu1 %v5479_v17 }
 0xb05   :  { %2296 = vperm.xlu1 %3569, %v3467_v61   ;;  %2183 = vperm.xlu0 %3576, %v2140_v38  }
 0xb09   :  { %3570 = vset.pattern.permute.xlu1 %v5480_v29  ;;  %3580 = vset.pattern.permute.xlu0 %v5481_v58 }
 0xb0a   :  { %2350 = vperm.xlu1 %3570, %v3467_v61   ;;  %2454 = vperm.xlu0 %3580, %v2140_v38  }
 0xb0e   :  { %3571 = vset.pattern.permute.xlu1 %v5481_v58  ;;  %3583 = vset.pattern.permute.xlu0 %v3800_v23 }
 0xb0f   :  { %2458 = vperm.xlu1 %3571, %v3467_v61  }
 0xb13   :  { %3573 = vset.pattern.permute.xlu1 %v5482_v13 }
 0xb14   :  { %2512 = vperm.xlu1 %3573, %v3467_v61  }
 0xb18   :  { %3575 = vset.pattern.permute.xlu1 %v5477_v1 }
 0xb19   :  { %2238 = vperm.xlu1 %3575, %v2140_v38  }
 0xb1d   :  { %3577 = vset.pattern.permute.xlu1 %v5479_v17 }
 0xb1e   :  { %2292 = vperm.xlu1 %3577, %v2140_v38  }
 0xb22   :  { %3578 = vset.pattern.permute.xlu1 %v5480_v29 }
 0xb23   :  { %2346 = vperm.xlu1 %3578, %v2140_v38  }
 0xb27   :  { %3579 = vset.pattern.permute.xlu1 %v5483_v14 }
 0xb28   :  { %2400 = vperm.xlu1 %3579, %v2140_v38  }
 0xb2c   :  { %3581 = vset.pattern.permute.xlu1 %v5482_v13 }
 0xb2d   :  { %2508 = vperm.xlu1 %3581, %v2140_v38  }
 0xb31   :  { %3582 = vset.pattern.permute.xlu1 %v3800_v23 }
 0xb32   :  { %2562 = vperm.xlu1 %3582, %v2140_v38  }
 0xb5b   :  { %2149 = vxpose.xlu1.b32.start [1/2] (short) (narrow) %v2140_v38, 8 }
 0xb5f   :  { %2150 = vxpose.xlu1.b32.end [2/2] (short) (narrow) %v3467_v61, 8 }
 0xb76   :  { %v2189_v43 = vpop.permute.xlu1 %2188  ;;  %v2405_v61 = vpop.permute.xlu0 %2404 }
 0xb7b   :  { %v2243_v57 = vpop.permute.xlu1 %2242 }
 0xb80   :  { %v2297_v0 = vpop.permute.xlu1 %2296 }
 0xb85   :  { %v2351_v39 = vpop.permute.xlu1 %2350 }
 0xb8a   :  { %v2459_v52 = vpop.permute.xlu1 %2458 }
 0xb8f   :  { %v4944_v22 = vpop.permute.xlu1 %2512 }
 0xb94   :  { %v4946_v7 = vpop.permute.xlu1 %2238 }
 0xb99   :  { %v4948_v2 = vpop.permute.xlu1 %2292 }
 0xb9e   :  { %v4950_v41 = vpop.permute.xlu1 %2346 }
 0xba3   :  { %v4952_v8 = vpop.permute.xlu1 %2400 }
 0xba8   :  { %v4964_v23 = vpop.permute.xlu1 %2508 }
 0xbad   :  { %v2563_v54 = vpop.permute.xlu1 %2562 }
 0xbd7   :  { %v2165_v3 = vpop.trf.xlu1 }
 0xbd8   :  { %v5005_v18 = vrot.slane %v2165_v3, %v4021_v47  ;;  %v5008_v20 = vrot.slane %v2165_v3, %v4012_v42  ;;  %v5011_v26 = vrot.slane %v2165_v3, %v4017_v45  ;;  %v5014_v27 = vrot.slane %v2165_v3, %v3996_v37 }
 0xbd9   :  { %v5017_v40 = vrot.slane %v2165_v3, %v4052_v62  ;;  %v5020_v9 = vrot.slane %v2165_v3, %v4055_v63  ;;  %v5026_v47 = vrot.slane %v2165_v3, %v4083_v55  ;;  %v2416_v63 = vmul.f32 %v4980_v21, %v2414_v44 }
 0xbda   :  { %v2250_v42 = vadd.f32 %v5005_v18, %v2243_v57  ;;  %v2196_v45 = vadd.f32 %v5008_v20, %v2189_v43  ;;  %v2573_v30 = vadd.f32 %v5011_v26, %v2563_v54  ;;  %v2304_v37 = vadd.f32 %v5014_v27, %v2297_v0 }
 0xbdb   :  { %v2358_v62 = vadd.f32 %v5017_v40, %v2351_v39  ;;  %v2466_v19 = vadd.f32 %v5020_v9, %v2459_v52  ;;  %v2412_v58 = vadd.f32 %v5026_v47, %v2405_v61  ;;  %v5040_v13 = vrot.slane %v2165_v3, %v4108_v6 }
 0xbdc   :  { %v2256_v1 = vadd.f32 %v2254_v50, %v2250_v42  ;;  %v2202_v55 = vadd.f32 %v2200_v15, %v2196_v45  ;;  %v2579_v38 = vadd.f32 %v2577_v53, %v2573_v30  ;;  %v2310_v25 = vadd.f32 %v2308_v33, %v2304_v37 }
 0xbdd   :  { %v2364_v17 = vadd.f32 %v2362_v16, %v2358_v62  ;;  %v2472_v29 = vadd.f32 %v2470_v4, %v2466_v19  ;;  %v2524_v42 = vmul.f32 %v4980_v21, %v2522_v34  ;;  %v2418_v37 = vadd.f32 %v2416_v63, %v2412_v58  ;;  %v5067_v19 = vpop.permute.xlu0 %2566 }
 0xbde   :  { %vm2258_vm0 = vcmp.gt.f32.partialorder %v2256_v1, 0.0  ;;  %v2260_v14 = vmul.f32 0.2, %v2256_v1  ;;  %vm2204_vm1 = vcmp.gt.f32.partialorder %v2202_v55, 0.0  ;;  %v2206_v43 = vmul.f32 0.2, %v2202_v55 }
 0xbdf   :  { %vm2581_vm8 = vcmp.gt.f32.partialorder %v2579_v38, 0.0  ;;  %v2583_v57 = vmul.f32 0.2, %v2579_v38  ;;  %vm2312_vm9 = vcmp.gt.f32.partialorder %v2310_v25, 0.0  ;;  %v2314_v0 = vmul.f32 0.2, %v2310_v25 }
 0xbe0   :  { %v2262_v39 = vsel %vm2258_vm0, %v2256_v1, %v2260_v14  ;;  %v2208_v52 = vsel %vm2204_vm1, %v2202_v55, %v2206_v43  ;;  %vm2366_vm10 = vcmp.gt.f32.partialorder %v2364_v17, 0.0  ;;  %v2368_v54 = vmul.f32 0.2, %v2364_v17 }
 0xbe1   :  { %v5044_v50 = vsel %vm1290_vm15, %v2262_v39, -1e+30  ;;  %v5048_v6 = vsel %vm1290_vm15, %v2208_v52, -1e+30  ;;  %v2585_v15 = vsel %vm2581_vm8, %v2579_v38, %v2583_v57  ;;  %v2316_v3 = vsel %vm2312_vm9, %v2310_v25, %v2314_v0  ;;  %v2184_v14 = vpop.permute.xlu0 %2183 }
 0xbe2   :  { %v2268_v53 = vsel %vm336_vm7, %v5044_v50, -inf  ;;  %v2214_v33 = vsel %vm336_vm7, %v5048_v6, -inf  ;;  %v5056_v16 = vsel %vm1289_vm14, %v2585_v15, -1e+30  ;;  %v5060_v4 = vsel %vm1290_vm15, %v2316_v3, -1e+30 }
 0xbe3   :  { %2269 = vmax.xlane.f32.xlu1 %v2268_v53  ;;  %2215 = vmax.xlane.f32.xlu0 %v2214_v33  ;;  %v2370_v45 = vsel %vm2366_vm10, %v2364_v17, %v2368_v54  ;;  %v2476_v30 = vmul.f32 0.2, %v2472_v29  ;;  %v2520_v62 = vadd.f32 %v5040_v13, %v4944_v22  ;;  %vm2474_vm11 = vcmp.gt.f32.partialorder %v2472_v29, 0.0 }
 0xbe4   :  { %v2589_v61 = vsel %vm332_vm5, %v5056_v16, -inf  ;;  %v2322_v1 = vsel %vm336_vm7, %v5060_v4, -inf  ;;  %v5075_v55 = vsel %vm1290_vm15, %v2370_v45, -1e+30  ;;  %v2253_v63 = vmul.f32 %v4992_v56, %v2252_v35 }
 0xbe5   :  { %v2478_v22 = vsel %vm2474_vm11, %v2472_v29, %v2476_v30  ;;  %v2422_v38 = vmul.f32 0.2, %v2418_v37  ;;  %v2526_v25 = vadd.f32 %v2524_v42, %v2520_v62  ;;  %v2249_v17 = vadd.f32 %v5005_v18, %v4946_v7 }
 0xbe6   :  { %vm2420_vm12 = vcmp.gt.f32.partialorder %v2418_v37, 0.0  ;;  %v2376_v58 = vsel %vm336_vm7, %v5075_v55, -inf  ;;  %v5086_v43 = vsel %vm1290_vm15, %v2478_v22, -1e+30  ;;  %v2199_v35 = vmul.f32 %v4992_v56, %v2198_v32 }
 0xbe7   :  { %2590 = vmax.xlane.f32.xlu1 %v2589_v61  ;;  %2323 = vmax.xlane.f32.xlu0 %v2322_v1  ;;  %v2424_v29 = vsel %vm2420_vm12, %v2418_v37, %v2422_v38  ;;  %v2530_v57 = vmul.f32 0.2, %v2526_v25  ;;  %v2255_v0 = vadd.f32 %v2253_v63, %v2249_v17  ;;  %v2195_v39 = vadd.f32 %v5008_v20, %v2184_v14 }
 0xbe8   :  { %vm2528_vm13 = vcmp.gt.f32.partialorder %v2526_v25, 0.0  ;;  %v2484_v7 = vsel %vm336_vm7, %v5086_v43, -inf  ;;  %v5096_v18 = vsel %vm1290_vm15, %v2424_v29, -1e+30  ;;  %v2307_v52 = vmul.f32 %v4992_v56, %v2306_v5 }
 0xbe9   :  { %v2532_v54 = vsel %vm2528_vm13, %v2526_v25, %v2530_v57  ;;  %v2259_v32 = vmul.f32 0.2, %v2255_v0  ;;  %v2201_v15 = vadd.f32 %v2199_v35, %v2195_v39  ;;  %v2303_v3 = vadd.f32 %v5014_v27, %v4948_v2 }
 0xbea   :  { %vm2257_vm0 = vcmp.gt.f32.partialorder %v2255_v0, 0.0  ;;  %v2430_v20 = vsel %vm336_vm7, %v5096_v18, -inf  ;;  %v5107_v53 = vsel %vm1290_vm15, %v2532_v54, -1e+30  ;;  %v2361_v33 = vmul.f32 %v4992_v56, %v2360_v24 }
 0xbeb   :  { %2377 = vmax.xlane.f32.xlu0 %v2376_v58  ;;  %v2261_v5 = vsel %vm2257_vm0, %v2255_v0, %v2259_v32  ;;  %v2205_v42 = vmul.f32 0.2, %v2201_v15  ;;  %v2309_v45 = vadd.f32 %v2307_v52, %v2303_v3  ;;  %v2357_v30 = vadd.f32 %v5017_v40, %v4950_v41  ;;  %v2455_v40 = vpop.permute.xlu0 %2454 }
 0xbec   :  { %vm2203_vm1 = vcmp.gt.f32.partialorder %v2201_v15, 0.0  ;;  %v2538_v2 = vsel %vm336_vm7, %v5107_v53, -inf  ;;  %v5118_v27 = vsel %vm1289_vm14, %v2261_v5, -1e+30  ;;  %v2415_v37 = vmul.f32 %v4992_v56, %v2414_v44 }
 0xbed   :  { %v2207_v24 = vsel %vm2203_vm1, %v2201_v15, %v2205_v42  ;;  %v2313_v62 = vmul.f32 0.2, %v2309_v45  ;;  %v2363_v61 = vadd.f32 %v2361_v33, %v2357_v30  ;;  %v2411_v1 = vadd.f32 %v5026_v47, %v4952_v8 }
 0xbee   :  { %vm2311_vm8 = vcmp.gt.f32.partialorder %v2309_v45, 0.0  ;;  %v2265_v41 = vsel %vm332_vm5, %v5118_v27, -inf  ;;  %v5129_v63 = vsel %vm1289_vm14, %v2207_v24, -1e+30  ;;  %v2469_v44 = vmul.f32 %v4992_v56, %v2468_v12 }
 0xbef   :  { %2485 = vmax.xlane.f32.xlu0 %v2484_v7  ;;  %v2315_v22 = vsel %vm2311_vm8, %v2309_v45, %v2313_v62  ;;  %v2367_v38 = vmul.f32 0.2, %v2363_v61  ;;  %v2417_v25 = vadd.f32 %v2415_v37, %v2411_v1  ;;  %v2465_v17 = vadd.f32 %v5020_v9, %v2455_v40 }
 0xbf0   :  { %vm2365_vm9 = vcmp.gt.f32.partialorder %v2363_v61, 0.0  ;;  %v2211_v8 = vsel %vm332_vm5, %v5129_v63, -inf  ;;  %v5139_v47 = vsel %vm1289_vm14, %v2315_v22, -1e+30  ;;  %v2523_v58 = vmul.f32 %v4992_v56, %v2522_v34 }
 0xbf1   :  { %v2369_v14 = vsel %vm2365_vm9, %v2363_v61, %v2367_v38  ;;  %v2421_v12 = vmul.f32 0.2, %v2417_v25  ;;  %v2471_v35 = vadd.f32 %v2469_v44, %v2465_v17  ;;  %v2519_v29 = vadd.f32 %v5040_v13, %v4964_v23 }
 0xbf2   :  { %vm2419_vm10 = vcmp.gt.f32.partialorder %v2417_v25, 0.0  ;;  %v2319_v9 = vsel %vm332_vm5, %v5139_v47, -inf  ;;  %v5150_v57 = vsel %vm1289_vm14, %v2369_v14, -1e+30  ;;  %v2578_v0 = vmul.f32 %v4980_v21, %v2576_v28 }
 0xbf3   :  { %2431 = vmax.xlane.f32.xlu0 %v2430_v20  ;;  %v2423_v39 = vsel %vm2419_vm10, %v2417_v25, %v2421_v12  ;;  %v2475_v56 = vmul.f32 0.2, %v2471_v35  ;;  %v2525_v34 = vadd.f32 %v2523_v58, %v2519_v29  ;;  %v2574_v7 = vadd.f32 %v5011_v26, %v5067_v19 }
 0xbf4   :  { %vm2473_vm11 = vcmp.gt.f32.partialorder %v2471_v35, 0.0  ;;  %v2373_v23 = vsel %vm332_vm5, %v5150_v57, -inf  ;;  %v5161_v13 = vsel %vm1289_vm14, %v2423_v39, -1e+30 }
 0xbf5   :  { %v2477_v52 = vsel %vm2473_vm11, %v2471_v35, %v2475_v56  ;;  %v2529_v54 = vmul.f32 0.2, %v2525_v34  ;;  %v2580_v32 = vadd.f32 %v2578_v0, %v2574_v7  ;;  %vm2527_vm12 = vcmp.gt.f32.partialorder %v2525_v34, 0.0 }
 0xbf6   :  { %v2427_v28 = vsel %vm332_vm5, %v5161_v13, -inf  ;;  %v5167_v21 = vsel %vm1289_vm14, %v2477_v52, -1e+30 }
 0xbf7   :  { %2539 = vmax.xlane.f32.xlu0 %v2538_v2  ;;  %v2531_v26 = vsel %vm2527_vm12, %v2525_v34, %v2529_v54  ;;  %v2584_v19 = vmul.f32 0.2, %v2580_v32  ;;  %vm2582_vm13 = vcmp.gt.f32.partialorder %v2580_v32, 0.0  ;;  %v2481_v15 = vsel %vm332_vm5, %v5167_v21, -inf }
 0xbf8   :  { %v5173_v3 = vsel %vm1289_vm14, %v2531_v26, -1e+30 }
 0xbf9   :  { %v2586_v20 = vsel %vm2582_vm13, %v2580_v32, %v2584_v19  ;;  %v2535_v33 = vsel %vm332_vm5, %v5173_v3, -inf }
 0xbfa   :  { %v5179_v5 = vsel %vm1290_vm15, %v2586_v20, -1e+30 }
 0xbfb   :  { %2266 = vmax.xlane.f32.xlu0 %v2265_v41  ;;  %v2592_v42 = vsel %vm336_vm7, %v5179_v5, -inf }
 0xbff   :  { %2212 = vmax.xlane.f32.xlu0 %v2211_v8 }
 0xc03   :  { %2320 = vmax.xlane.f32.xlu0 %v2319_v9 }
 0xc07   :  { %2374 = vmax.xlane.f32.xlu0 %v2373_v23 }
 0xc0b   :  { %2428 = vmax.xlane.f32.xlu0 %v2427_v28 }
 0xc0f   :  { %2482 = vmax.xlane.f32.xlu0 %v2481_v15 }
 0xc13   :  { %2536 = vmax.xlane.f32.xlu0 %v2535_v33 }
 0xc17   :  { %2593 = vmax.xlane.f32.xlu0 %v2592_v42 }
 0xc6c   :  { %v2270_v45 = vpop.xlane.xlu1 %2269  ;;  %v2216_v30 = vpop.xlane.xlu0 %2215 }
 0xc6d   :  { %v2272_v2 = vsub.f32 %v5044_v50, %v2270_v45  ;;  %v2218_v37 = vsub.f32 %v5048_v6, %v2216_v30 }
 0xc6f   :  { %v2275_v24 = vmul.f32 1.442695, %v2272_v2  ;;  %v2221_v62 = vmul.f32 1.442695, %v2218_v37 }
 0xc70   :  { %v2324_v61 = vpop.xlane.xlu0 %2323  ;;  %v2591_v45 = vpop.xlane.xlu1 %2590 }
 0xc71   :  { %3712 = vpow2.f32 %v2275_v24  ;;  %v2326_v1 = vsub.f32 %v5060_v4, %v2324_v61  ;;  %v2595_v37 = vsub.f32 %v5056_v16, %v2591_v45 }
 0xc72   :  { %3714 = vpow2.f32 %v2221_v62 }
 0xc73   :  { %v2329_v41 = vmul.f32 1.442695, %v2326_v1  ;;  %v2597_v1 = vmul.f32 1.442695, %v2595_v37 }
 0xc74   :  { %v2378_v40 = vpop.xlane.xlu0 %2377 }
 0xc75   :  { %v2380_v44 = vsub.f32 %v5075_v55, %v2378_v40  ;;  %3716 = vpow2.f32 %v2329_v41 }
 0xc77   :  { %v2383_v22 = vmul.f32 1.442695, %v2380_v44 }
 0xc78   :  { %v2486_v38 = vpop.xlane.xlu0 %2485 }
 0xc79   :  { %3718 = vpow2.f32 %v2383_v22  ;;  %v2488_v25 = vsub.f32 %v5086_v43, %v2486_v38 }
 0xc7b   :  { %v2491_v50 = vmul.f32 1.442695, %v2488_v25 }
 0xc7c   :  { %v2432_v17 = vpop.xlane.xlu0 %2431 }
 0xc7d   :  { %3720 = vpow2.f32 %v2491_v50  ;;  %v2434_v26 = vsub.f32 %v5096_v18, %v2432_v17 }
 0xc7e   :  { %v3713_v6 = vpop.eup %3712 }
 0xc7f   :  { %v3715_v8 = vpop.eup %3714  ;;  %v5190_v58 = vsel %vm1290_vm15, %v3713_v6, 0.0 }
 0xc80   :  { %v2540_v4 = vpop.xlane.xlu0 %2539  ;;  %v5194_v14 = vsel %vm1290_vm15, %v3715_v8, 0.0  ;;  %v2282_v55 = vsel %vm336_vm7, %v5190_v58, 0.0 }
 0xc81   :  { %v2228_v43 = vsel %vm336_vm7, %v5194_v14, 0.0  ;;  %2283 = vadd.xlane.f32.xlu0 %v2282_v55  ;;  %v2542_v35 = vsub.f32 %v5107_v53, %v2540_v4 }
 0xc82   :  { %2229 = vadd.xlane.f32.xlu1 %v2228_v43  ;;  %v3717_v12 = vpop.eup %3716 }
 0xc83   :  { %v5203_v9 = vsel %vm1290_vm15, %v3717_v12, 0.0  ;;  %v2545_v23 = vmul.f32 1.442695, %v2542_v35 }
 0xc84   :  { %v2267_v29 = vpop.xlane.xlu0 %2266  ;;  %v2336_v39 = vsel %vm336_vm7, %v5203_v9, 0.0 }
 0xc85   :  { %v2271_v0 = vsub.f32 %v5118_v27, %v2267_v29  ;;  %2337 = vadd.xlane.f32.xlu0 %v2336_v39 }
 0xc86   :  { %v3719_v56 = vpop.eup %3718 }
 0xc87   :  { %v2273_v34 = vmul.f32 1.442695, %v2271_v0  ;;  %v5210_v7 = vsel %vm1290_vm15, %v3719_v56, 0.0 }
 0xc88   :  { %v2213_v52 = vpop.xlane.xlu0 %2212  ;;  %v2390_v53 = vsel %vm336_vm7, %v5210_v7, 0.0 }
 0xc89   :  { %3722 = vpow2.f32 %v2273_v34  ;;  %v2217_v54 = vsub.f32 %v5129_v63, %v2213_v52  ;;  %2391 = vadd.xlane.f32.xlu0 %v2390_v53  ;;  %v2437_v63 = vmul.f32 1.442695, %v2434_v26 }
 0xc8a   :  { %v3721_v32 = vpop.eup %3720  ;;  %3724 = vpow2.f32 %v2545_v23 }
 0xc8b   :  { %v2219_v27 = vmul.f32 1.442695, %v2217_v54  ;;  %v5217_v28 = vsel %vm1290_vm15, %v3721_v32, 0.0 }
 0xc8c   :  { %v2321_v19 = vpop.xlane.xlu0 %2320  ;;  %v2498_v15 = vsel %vm336_vm7, %v5217_v28, 0.0 }
 0xc8d   :  { %3726 = vpow2.f32 %v2219_v27  ;;  %v2325_v20 = vsub.f32 %v5139_v47, %v2321_v19  ;;  %2499 = vadd.xlane.f32.xlu1 %v2498_v15 }
 0xc8f   :  { %v2327_v33 = vmul.f32 1.442695, %v2325_v20 }
 0xc90   :  { %v2375_v42 = vpop.xlane.xlu0 %2374 }
 0xc91   :  { %3728 = vpow2.f32 %v2327_v33  ;;  %v2379_v30 = vsub.f32 %v5150_v57, %v2375_v42 }
 0xc92   :  { %3730 = vpow2.f32 %v2437_v63 }
 0xc93   :  { %v2381_v2 = vmul.f32 1.442695, %v2379_v30 }
 0xc94   :  { %v2429_v18 = vpop.xlane.xlu0 %2428 }
 0xc95   :  { %3732 = vpow2.f32 %v2381_v2  ;;  %v2433_v24 = vsub.f32 %v5161_v13, %v2429_v18 }
 0xc96   :  { %v3723_v62 = vpop.eup %3722 }
 0xc97   :  { %v2435_v61 = vmul.f32 1.442695, %v2433_v24  ;;  %v5228_v47 = vsel %vm1289_vm14, %v3723_v62, 0.0  ;;  %v3725_v57 = vpop.eup %3724 }
 0xc98   :  { %v2483_v41 = vpop.xlane.xlu0 %2482  ;;  %v2279_v40 = vsel %vm332_vm5, %v5228_v47, 0.0  ;;  %v5242_v17 = vsel %vm1290_vm15, %v3725_v57, 0.0 }
 0xc99   :  { %3734 = vpow2.f32 %v2435_v61  ;;  %v2487_v16 = vsub.f32 %v5167_v21, %v2483_v41  ;;  %2280 = vadd.xlane.f32.xlu1 %v2279_v40  ;;  %v2552_v55 = vsel %vm336_vm7, %v5242_v17, 0.0 }
 0xc9a   :  { %v3727_v44 = vpop.eup %3726  ;;  %3736 = vpow2.f32 %v2597_v1 }
 0xc9b   :  { %v2489_v22 = vmul.f32 1.442695, %v2487_v16  ;;  %v5235_v13 = vsel %vm1289_vm14, %v3727_v44, 0.0 }
 0xc9c   :  { %v2537_v38 = vpop.xlane.xlu0 %2536  ;;  %v2225_v25 = vsel %vm332_vm5, %v5235_v13, 0.0 }
 0xc9d   :  { %3738 = vpow2.f32 %v2489_v22  ;;  %v2541_v50 = vsub.f32 %v5173_v3, %v2537_v38  ;;  %2226 = vadd.xlane.f32.xlu0 %v2225_v25 }
 0xc9e   :  { %v3729_v21 = vpop.eup %3728 }
 0xc9f   :  { %v2543_v6 = vmul.f32 1.442695, %v2541_v50  ;;  %v5246_v8 = vsel %vm1289_vm14, %v3729_v21, 0.0  ;;  %v3731_v12 = vpop.eup %3730 }
 0xca0   :  { %v2594_v4 = vpop.xlane.xlu0 %2593  ;;  %v2333_v43 = vsel %vm332_vm5, %v5246_v8, 0.0  ;;  %v5261_v56 = vsel %vm1290_vm15, %v3731_v12, 0.0 }
 0xca1   :  { %3740 = vpow2.f32 %v2543_v6  ;;  %v2596_v3 = vsub.f32 %v5179_v5, %v2594_v4  ;;  %2553 = vadd.xlane.f32.xlu0 %v2552_v55  ;;  %2334 = vadd.xlane.f32.xlu1 %v2333_v43  ;;  %v2444_v5 = vsel %vm336_vm7, %v5261_v56, 0.0 }
 0xca2   :  { %v3733_v35 = vpop.eup %3732 }
 0xca3   :  { %v2599_v29 = vmul.f32 1.442695, %v2596_v3  ;;  %v5255_v0 = vsel %vm1289_vm14, %v3733_v35, 0.0 }
 0xca4   :  { %v2387_v39 = vsel %vm332_vm5, %v5255_v0, 0.0 }
 0xca5   :  { %3742 = vpow2.f32 %v2599_v29  ;;  %2388 = vadd.xlane.f32.xlu1 %v2387_v39 }
 0xca6   :  { %v3735_v34 = vpop.eup %3734 }
 0xca7   :  { %v3737_v23 = vpop.eup %3736  ;;  %v5267_v52 = vsel %vm1289_vm14, %v3735_v34, 0.0 }
 0xca8   :  { %v2441_v32 = vsel %vm332_vm5, %v5267_v52, 0.0  ;;  %v5279_v26 = vsel %vm1289_vm14, %v3737_v23, 0.0 }
 0xca9   :  { %2445 = vadd.xlane.f32.xlu1 %v2444_v5  ;;  %v2603_v20 = vsel %vm332_vm5, %v5279_v26, 0.0 }
 0xcaa   :  { %v3739_v53 = vpop.eup %3738 }
 0xcab   :  { %v5271_v54 = vsel %vm1289_vm14, %v3739_v53, 0.0 }
 0xcac   :  { %v2495_v27 = vsel %vm332_vm5, %v5271_v54, 0.0 }
 0xcad   :  { %2442 = vadd.xlane.f32.xlu1 %v2441_v32  ;;  %2496 = vadd.xlane.f32.xlu0 %v2495_v27 }
 0xcae   :  { %v3741_v19 = vpop.eup %3740 }
 0xcaf   :  { %v5283_v15 = vsel %vm1289_vm14, %v3741_v19, 0.0 }
 0xcb0   :  { %v2549_v33 = vsel %vm332_vm5, %v5283_v15, 0.0 }
 0xcb1   :  { %2604 = vadd.xlane.f32.xlu1 %v2603_v20  ;;  %2550 = vadd.xlane.f32.xlu0 %v2549_v33 }
 0xcb2   :  { %v3743_v63 = vpop.eup %3742 }
 0xcb3   :  { %v5291_v42 = vsel %vm1290_vm15, %v3743_v63, 0.0 }
 0xcb4   :  { %v2606_v45 = vsel %vm336_vm7, %v5291_v42, 0.0  ;;  %vm3802_vm7 = vmmov 0  }
 0xcb5   :  { %2607 = vadd.xlane.f32.xlu0 %v2606_v45 }
 0xd0a   :  { %v2284_v46 = vpop.xlane.xlu0 %2283 }
 0xd0b   :  { %v2230_v30 = vpop.xlane.xlu1 %2229  ;;  %v2286_v1 = vmax.f32 %v2284_v46, 1e-20 }
 0xd0c   :  { %v2232_v18 = vmax.f32 %v2230_v30, 1e-20 }
 0xd0e   :  { %v2338_v2 = vpop.xlane.xlu0 %2337 }
 0xd0f   :  { %v2340_v40 = vmax.f32 %v2338_v2, 1e-20 }
 0xd12   :  { %v2392_v24 = vpop.xlane.xlu0 %2391 }
 0xd13   :  { %v2394_v57 = vmax.f32 %v2392_v24, 1e-20 }
 0xd16   :  { %v2500_v37 = vpop.xlane.xlu1 %2499 }
 0xd17   :  { %v2502_v21 = vmax.f32 %v2500_v37, 1e-20 }
 0xd22   :  { %v2281_v62 = vpop.xlane.xlu1 %2280 }
 0xd23   :  { %v2285_v61 = vmax.f32 %v2281_v62, 1e-20 }
 0xd25   :  { %3744 = vrcp.f32 %v2285_v61 }
 0xd26   :  { %3746 = vrcp.f32 %v2232_v18  ;;  %v2227_v41 = vpop.xlane.xlu0 %2226 }
 0xd27   :  { %v2231_v51 = vmax.f32 %v2227_v41, 1e-20  ;;  %3748 = vrcp.f32 %v2286_v1 }
 0xd29   :  { %3750 = vrcp.f32 %v2231_v51 }
 0xd2a   :  { %v2335_v16 = vpop.xlane.xlu1 %2334  ;;  %3752 = vrcp.f32 %v2340_v40  ;;  %v2554_v25 = vpop.xlane.xlu0 %2553 }
 0xd2b   :  { %v2339_v44 = vmax.f32 %v2335_v16, 1e-20  ;;  %3754 = vrcp.f32 %v2394_v57  ;;  %v2556_v55 = vmax.f32 %v2554_v25, 1e-20 }
 0xd2d   :  { %3756 = vrcp.f32 %v2339_v44 }
 0xd2e   :  { %v2389_v22 = vpop.xlane.xlu1 %2388 }
 0xd2f   :  { %v2393_v38 = vmax.f32 %v2389_v22, 1e-20 }
 0xd31   :  { %3758 = vrcp.f32 %v2393_v38 }
 0xd32   :  { %v3745_v50 = vpop.eup %3744  ;;  %v2446_v6 = vpop.xlane.xlu1 %2445  ;;  %3760 = vrcp.f32 %v2502_v21 }
 0xd33   :  { %v3747_v4 = vpop.eup %3746  ;;  %v2288_v43 = vmul.f32 %v3745_v50, %v5228_v47  ;;  %v2448_v12 = vmax.f32 %v2446_v6, 1e-20  ;;  %3762 = vrcp.f32 %v2556_v55 }
 0xd34   :  { %v3749_v3 = vpop.eup %3748  ;;  %v2236_v5 = vmul.f32 %v3747_v4, %v5194_v14 }
 0xd35   :  { %v2617_v35 = vrot.slane %v2288_v43, 6  ;;  %3764 = vrcp.f32 %v2448_v12  ;;  %v2290_v19 = vmul.f32 %v3749_v3, %v5190_v58 }
 0xd36   :  { %v3751_v29 = vpop.eup %3750  ;;  %v2443_v39 = vpop.xlane.xlu1 %2442 }
 0xd37   :  { %v2497_v34 = vpop.xlane.xlu0 %2496  ;;  %v2447_v23 = vmax.f32 %v2443_v39, 1e-20  ;;  %v2234_v32 = vmul.f32 %v3751_v29, %v5235_v13  ;;  %v3753_v27 = vpop.eup %3752  ;;  %v2655_v47 = vsel %vm740_vm2, %v2236_v5, %v2617_v35  ;;  %v2618_v30 = vrot.slane %v2290_v19, 6 }
 0xd38   :  { %v2501_v53 = vmax.f32 %v2497_v34, 1e-20  ;;  %v3755_v20 = vpop.eup %3754  ;;  %v2344_v2 = vmul.f32 %v3753_v27, %v5203_v9 }
 0xd39   :  { %3766 = vrcp.f32 %v2447_v23  ;;  %3472 = vmatprep.mubr.msk.f32.mxu1 %vm332_vm5, %v2234_v32  ;;  %v2398_v37 = vmul.f32 %v3755_v20, %v5210_v7  ;;  %v2619_v62 = vsel %vm740_vm2, %v2617_v35, %v2618_v30  ;;  %v3801_v32 = vmov 0.0  }
 0xd3a   :  { %v3757_v33 = vpop.eup %3756  ;;  %3768 = vrcp.f32 %v2501_v53  ;;  %v2605_v63 = vpop.xlane.xlu1 %2604  ;;  %3473 = vmatmul.mubr.msk.f32.vlgmr.msra.gmra.mxu1 %vm332_vm5, %v2655_v47  ;;  %3487 = vmatprep.subr.mxu0 %v3801_v32 }
 0xd3b   :  { %v2551_v14 = vpop.xlane.xlu0 %2550  ;;  %v2609_v45 = vmax.f32 %v2605_v63, 1e-20  ;;  %v2342_v13 = vmul.f32 %v3757_v33, %v5246_v8  ;;  %v2625_v8 = vrot.slane %v2344_v2, 4  ;;  %v2632_v9 = vrot.slane %v2398_v37, 2  ;;  %3513 = vmatprep.subr.mxu1 %v3801_v32  ;;  %3491 = vmatprep.mubr.msk.f32.mxu0 %vm3802_vm7, %v3801_v32  ;;  %v3217_v63 = vld [vmem:[%s5442_s16] ss:$0 sm:$0xff] }
 0xd3c   :  { %v2555_v46 = vmax.f32 %v2551_v14, 1e-20 }
 0xd3d   :  { %3770 = vrcp.f32 %v2609_v45  ;;  %v2624_v58 = vrot.slane %v2342_v13, 4 }
 0xd3e   :  { %v3759_v18 = vpop.eup %3758  ;;  %3772 = vrcp.f32 %v2555_v46 }
 0xd3f   :  { %v2608_v24 = vpop.xlane.xlu0 %2607  ;;  %v2656_v1 = vsel %vm748_vm4, %v2619_v62, %v2624_v58  ;;  %v2396_v41 = vmul.f32 %v3759_v18, %v5255_v0  ;;  %v2626_v51 = vsel %vm748_vm4, %v2624_v58, %v2625_v8  ;;  %v3761_v57 = vpop.eup %3760 }
 0xd40   :  { %v2610_v61 = vmax.f32 %v2608_v24, 1e-20  ;;  %3475 = vmatprep.mubr.msk.f32.mxu1 %vm332_vm5, %v2656_v1  ;;  %v3763_v44 = vpop.eup %3762  ;;  %v2506_v21 = vmul.f32 %v3761_v57, %v5217_v28 }
 0xd41   :  { %v2631_v40 = vrot.slane %v2396_v41, 2  ;;  %v2560_v43 = vmul.f32 %v3763_v44, %v5242_v17 }
 0xd42   :  { %3774 = vrcp.f32 %v2610_v61  ;;  %v3765_v22 = vpop.eup %3764 }
 0xd43   :  { %v2657_v7 = vsel %vm756_vm6, %v2626_v51, %v2631_v40  ;;  %v2633_v16 = vsel %vm756_vm6, %v2631_v40, %v2632_v9  ;;  %v2452_v4 = vmul.f32 %v3765_v22, %v5261_v56  ;;  %v2645_v28 = vrot.slane %v2560_v43, 4 }
 0xd44   :  { %3476 = vmatmul.mubr.msk.f32.gmra.mxu1 %vm332_vm5, %v2657_v7 }
 0xd45   :  { %3478 = vmatprep.mubr.msk.f32.mxu1 %vm332_vm5, %v2633_v16 }
 0xd46   :  { %v3767_v0 = vpop.eup %3766 }
 0xd47   :  { %v3769_v38 = vpop.eup %3768  ;;  %v2450_v25 = vmul.f32 %v3767_v0, %v5267_v52  ;;  %v2638_v52 = vrot.slane %v2506_v21, 6 }
 0xd48   :  { %v2504_v50 = vmul.f32 %v3769_v38, %v5271_v54 }
 0xd49   :  { %3479 = vmatmul.mubr.msk.f32.gmra.mxu1 %vm332_vm5, %v2450_v25 }
 0xd4a   :  { %v3771_v6 = vpop.eup %3770  ;;  %v2637_v55 = vrot.slane %v2504_v50, 6 }
 0xd4b   :  { %v3773_v12 = vpop.eup %3772  ;;  %v2612_v3 = vmul.f32 %v3771_v6, %v5279_v26 }
 0xd4c   :  { %v2658_v35 = vsel %vm740_vm2, %v2452_v4, %v2637_v55  ;;  %v2558_v29 = vmul.f32 %v3773_v12, %v5283_v15  ;;  %v2639_v5 = vsel %vm740_vm2, %v2637_v55, %v2638_v52 }
 0xd4d   :  { %3481 = vmatprep.mubr.msk.f32.mxu1 %vm332_vm5, %v2658_v35  ;;  %v2651_v54 = vrot.slane %v2612_v3, 2 }
 0xd4e   :  { %v2644_v34 = vrot.slane %v2558_v29, 4 }
 0xd4f   :  { %v3775_v39 = vpop.eup %3774 }
 0xd50   :  { %v2614_v56 = vmul.f32 %v3775_v39, %v5291_v42  ;;  %v2659_v17 = vsel %vm748_vm4, %v2639_v5, %v2644_v34  ;;  %v2646_v23 = vsel %vm748_vm4, %v2644_v34, %v2645_v28 }
 0xd51   :  { %3482 = vmatmul.mubr.msk.f32.gmra.mxu1 %vm332_vm5, %v2659_v17  ;;  %v2660_v26 = vsel %vm756_vm6, %v2646_v23, %v2651_v54 }
 0xd52   :  { %v2652_v15 = vrot.slane %v2614_v56, 2  ;;  %3484 = vmatprep.mubr.msk.f32.mxu1 %vm332_vm5, %v2660_v26 }
 0xd54   :  { %v2653_v53 = vsel %vm756_vm6, %v2651_v54, %v2652_v15 }
 0xd55   :  { %3485 = vmatmul.mubr.msk.f32.gmra.mxu1 %vm332_vm5, %v2653_v53 }
 0xd56   :  { %3521 = vmatprep.mubr.msk.f32.mxu1 %vm3802_vm7, %v3801_v32 }
 0xdfa   :  { %v3474_v42 = vpop.f32.mrf.mxu1 }
 0xdfb   :  { %v2816_v20 = vmul.f32 %v3474_v42, %v4409_v10  ;;  %v2807_v47 = vmul.f32 %v3474_v42, %v4412_v11 }
 0xdfc   :  { %v2757_v27 = vpop.f32.mrf.mxu1 }
 0xdfd   :  { %v2806_v14 = vmul.f32 %v2757_v27, %v4412_v11  ;;  %v2820_v13 = vrot.slane %v2816_v20, 2  ;;  %v2815_v58 = vadd.f32 %v3217_v63, %v2807_v47  ;;  %v2970_v20 = vld [vmem:[%s5443_s17 + $0x28] sm:$0xff]  ;;  %v2969_v47 = vld [vmem:[%s5443_s17 + $0x20] sm:$0xff] }
 0xdff   :  { %v2814_v18 = vadd.f32 %v3217_v63, %v2806_v14  ;;  %v2967_v63 = vld [vmem:[%s5443_s17 + $0x10] sm:$0xff]  ;;  %v2966_v14 = vld [vmem:[%s5443_s17 + $0x8] sm:$0xff] }
 0xe04   :  { %v3477_v19 = vpop.f32.mrf.mxu1 }
 0xe05   :  { %v2828_v37 = vmul.f32 %v3477_v19, %v4417_v31  ;;  %v2838_v61 = vmul.f32 %v3477_v19, %v4425_v60  ;;  %v2971_v19 = vld [vmem:[%s5443_s17 + $0x30] sm:$0xff] }
 0xe06   :  { %v2767_v33 = vpop.f32.mrf.mxu1 }
 0xe07   :  { %v2817_v45 = vmul.f32 %v2767_v33, %v4409_v10  ;;  %v2827_v46 = vmul.f32 %v2767_v33, %v4417_v31  ;;  %v2832_v10 = vrot.slane %v2828_v37, 4  ;;  %v2842_v9 = vrot.slane %v2838_v61, 6  ;;  %v2968_v33 = vld [vmem:[%s5443_s17 + $0x18] sm:$0xff]  ;;  %v3054_v37 = vld [vmem:[%s5445_s19] sm:$0xff] }
 0xe09   :  { %v2821_v30 = vrot.slane %v2817_v45, 2  ;;  %v3480_v2 = vpop.f32.mrf.mxu1  ;;  %v2831_v41 = vrot.slane %v2827_v46, 4  ;;  %v2965_v45 = vld [vmem:[%s5443_s17] sm:$0xff]  ;;  %v3057_v46 = vld [vmem:[%s5445_s19 + $0x18] sm:$0xff] }
 0xe0a   :  { %v2849_v43 = vmul.f32 %v3480_v2, %v4437_v49  ;;  %3514 = vmatpush3.msra.mxu1 %v3057_v46 }
 0xe0b   :  { %v2822_v24 = vsel %vm756_vm6, %v2820_v13, %v2821_v30  ;;  %v2777_v62 = vpop.f32.mrf.mxu1  ;;  %v2826_v1 = vadd.f32 %v2821_v30, %v2815_v58  ;;  %v2833_v51 = vsel %vm748_vm4, %v2831_v41, %v2832_v10  ;;  %v3056_v13 = vld [vmem:[%s5445_s19 + $0x10] sm:$0xff]  ;;  %3515 = vmatprep.subr.mxu1 %v3801_v32  ;;  %v3055_v30 = vld [vmem:[%s5445_s19 + $0x8] sm:$0xff] }
 0xe0c   :  { %v2839_v11 = vmul.f32 %v2777_v62, %v4425_v60  ;;  %v2825_v8 = vadd.f32 %v2822_v24, %v2814_v18  ;;  %3516 = vmatpush3.msra.mxu1 %v3056_v13  ;;  %v3220_v18 = vld [vmem:[%s5444_s18] ss:$0 sm:$0xff] }
 0xe0d   :  { %v2837_v57 = vadd.f32 %v2832_v10, %v2826_v1  ;;  %3517 = vmatprep.subr.mxu1 %v3801_v32 }
 0xe0e   :  { %v2843_v40 = vrot.slane %v2839_v11, 6  ;;  %v2836_v7 = vadd.f32 %v2833_v51, %v2825_v8  ;;  %3518 = vmatpush3.msra.mxu1 %v3055_v30 }
 0xe0f   :  { %3519 = vmatprep.subr.mxu1 %v3801_v32 }
 0xe10   :  { %v2844_v31 = vsel %vm740_vm2, %v2842_v9, %v2843_v40  ;;  %v2848_v0 = vadd.f32 %v2843_v40, %v2837_v57  ;;  %3520 = vmatpush3.msra.mxu1 %v3054_v37 }
 0xe11   :  { %v3483_v16 = vpop.f32.mrf.mxu1  ;;  %v2847_v60 = vadd.f32 %v2844_v31, %v2836_v7 }
 0xe12   :  { %v2854_v44 = vmul.f32 %v3483_v16, %v4433_v48  ;;  %v2864_v6 = vmul.f32 %v3483_v16, %v4440_v36 }
 0xe13   :  { %v2787_v22 = vpop.f32.mrf.mxu1  ;;  %v2851_v52 = vadd.f32 %v2849_v43, %v2847_v60 }
 0xe14   :  { %v2850_v38 = vmul.f32 %v2787_v22, %v4437_v49  ;;  %v2853_v25 = vmul.f32 %v2787_v22, %v4433_v48  ;;  %v2858_v21 = vrot.slane %v2854_v44, 2  ;;  %v2868_v48 = vrot.slane %v2864_v6, 4 }
 0xe15   :  { %v3486_v50 = vpop.f32.mrf.mxu1 }
 0xe16   :  { %v2852_v4 = vadd.f32 %v2850_v38, %v2848_v0  ;;  %v2857_v55 = vrot.slane %v2853_v25, 2  ;;  %v2876_v35 = vmul.f32 %v3486_v50, %v4447_v59 }
 0xe17   :  { %v2797_v12 = vpop.f32.mrf.mxu1 }
 0xe18   :  { %v2859_v3 = vsel %vm756_vm6, %v2857_v55, %v2858_v21  ;;  %v2865_v29 = vmul.f32 %v2797_v12, %v4440_v36  ;;  %v2875_v54 = vmul.f32 %v2797_v12, %v4447_v59  ;;  %v2863_v39 = vadd.f32 %v2858_v21, %v2852_v4  ;;  %v2888_v36 = vld [vmem:[%s5432_s6] sm:$0x3]  ;;  %v2972_v59 = vld [vmem:[%s5443_s17 + $0x38] sm:$0xff] }
 0xe19   :  { %v2862_v28 = vadd.f32 %v2859_v3, %v2851_v52  ;;  %v2880_v56 = vrot.slane %v2876_v35, 6 }
 0xe1a   :  { %v2869_v34 = vrot.slane %v2865_v29, 4  ;;  %v2879_v5 = vrot.slane %v2875_v54, 6 }
 0xe1c   :  { %v2870_v17 = vsel %vm748_vm4, %v2868_v48, %v2869_v34  ;;  %v2874_v23 = vadd.f32 %v2869_v34, %v2863_v39  ;;  %v2881_v26 = vsel %vm740_vm2, %v2879_v5, %v2880_v56 }
 0xe1d   :  { %v2873_v49 = vadd.f32 %v2870_v17, %v2862_v28 }
 0xe1e   :  { %v2885_v15 = vadd.f32 %v2880_v56, %v2874_v23 }
 0xe1f   :  { %v2884_v53 = vadd.f32 %v2881_v26, %v2873_v49 }
 0xe20   :  { %v2887_v42 = vmax.f32 %v2885_v15, 0.0 }
 0xe21   :  { %v2886_v27 = vmax.f32 %v2884_v53, 0.0 }
 0xe22   :  { %3488 = vmatpush3.msk.msra.mxu0 %vm740_vm2, %v2887_v42  ;;  %vm3065_vm2 = vcmask 261120  }
 0xe23   :  { %3489 = vmatprep.subr.mxu0 %v3801_v32 }
 0xe24   :  { %3490 = vmatpush3.msra.mxu0 %v2886_v27 }
 0xe25   :  { %3492 = vmatmul.mubr.msk.f32.vlgmr.msra.gmra.mxu0 %vm332_vm5, %v2888_v36  ;;  %3494 = vmatprep.subr.mxu0 %v3801_v32  ;;  %vm3139_vm5 = vcmask 1024  }
 0xe26   :  { %3495 = vmatpush3.msra.mxu0 %v2972_v59  ;;  %3510 = vmatprep.mubr.msk.f32.mxu0 %vm3802_vm7, %v3801_v32 }
 0xe27   :  { %3496 = vmatprep.subr.mxu0 %v3801_v32 }
 0xe28   :  { %3497 = vmatpush3.msra.mxu0 %v2971_v19 }
 0xe29   :  { %3498 = vmatprep.subr.mxu0 %v3801_v32 }
 0xe2a   :  { %3499 = vmatpush3.msra.mxu0 %v2970_v20 }
 0xe2b   :  { %3500 = vmatprep.subr.mxu0 %v3801_v32 }
 0xe2c   :  { %3501 = vmatpush3.msra.mxu0 %v2969_v47 }
 0xe2d   :  { %3502 = vmatprep.subr.mxu0 %v3801_v32 }
 0xe2e   :  { %3503 = vmatpush3.msra.mxu0 %v2968_v33 }
 0xe2f   :  { %3504 = vmatprep.subr.mxu0 %v3801_v32 }
 0xe30   :  { %3505 = vmatpush3.msra.mxu0 %v2967_v63 }
 0xe31   :  { %3506 = vmatprep.subr.mxu0 %v3801_v32 }
 0xe32   :  { %3507 = vmatpush3.msra.mxu0 %v2966_v14 }
 0xe33   :  { %3508 = vmatprep.subr.mxu0 %v3801_v32  ;;  %v3222_v32 = vld [vmem:[#allocation2] ss:$0 sm:$0xff] }
 0xe34   :  { %3509 = vmatpush3.msra.mxu0 %v2965_v45 }
 0xee5   :  { %v2961_v2 = vpop.f32.mrf.mxu0 }
 0xee6   :  { %3511 = vmatmul.mubr.msk.f32.vlgmr.msra.gmra.mxu0 %vm186_vm3, %v2961_v2 }
 0xee7   :  { %v3493_v58 = vpop.f32.mrf.mxu0 }
 0xfa6   :  { %v3049_v24 = vpop.f32.mrf.mxu0 }
 0xfa7   :  { %v3050_v62 = vadd.f32 %v3220_v18, %v3049_v24 }
 0xfa8   :  { %v3512_v61 = vpop.f32.mrf.mxu0 }
 0xfa9   :  { %v3053_v1 = vmax.f32 %v3050_v62, 0.0 }
 0xfab   :  { %3522 = vmatmul.mubr.msk.f32.vlgmr.msra.gmra.mxu1 %vm3065_vm2, %v3053_v1 }
0x106b   :  { %v3135_v41 = vpop.f32.mrf.mxu1 }
0x106c   :  { %v3136_v11 = vadd.f32 %v3222_v32, %v3135_v41 }
0x106d   :  { %v3523_v8 = vpop.f32.mrf.mxu1 }
0x106e   :  { %3140 = vst.msk [vmem:[%s5447_s21] sm:$0x3] %vm3139_vm5, %v3136_v11 }
0x106f   :  { %3145 = vsyncpa [#allocation4], 1 }

</bundles_post_ra>
